<compile_context>
chip_gen: v5e
topology: v5e:2x2
jax: 0.10.0
libtpu: 0.0.40
codegen_flags: <defaults>
</compile_context>

<pallas_src>
import functools
import math

import jax
import jax.numpy as jnp
from jax import lax
from jax.experimental import pallas as pl
from jax.experimental.pallas import tpu as pltpu

# ---------------- synthetic (small) model config ----------------
VOCAB = 50
MAX_POS = 64
TYPE_VOCAB = 2
HIDDEN = 32
N_HEADS = 2
HEAD_DIM = HIDDEN // N_HEADS
N_LAYERS = 2
INTERMEDIATE = 64
NUM_TAGS = 4                      # CRF tag count
NUM_LABELS = 2 * NUM_TAGS         # BERT classifier width (reshaped x2 for CRF)
LN_EPS = 1e-12
LANE = 128                        # lane-tile width used for head/output padding


# ---------------- in-kernel helpers ----------------
def _ln(h, g, b, eps=LN_EPS):
    mu = jnp.mean(h, axis=-1, keepdims=True)
    c = h - mu
    var = jnp.mean(c * c, axis=-1, keepdims=True)
    return c * lax.rsqrt(var + eps) * g + b


def _gelu(x):
    # TODO(synk): tanh-approx GELU; HF BertIntermediate default is exact erf GELU.
    return 0.5 * x * (1.0 + jnp.tanh(0.7978845608028654 * (x + 0.044715 * x * x * x)))


# ---------------- fused whole-model kernel (one grid step = one sequence) ----
def _bert_crf_fused_kernel(
        x_ref, bias_ref, tags_ref, cmask_ref,
        embg_ref, embb_ref,
        wqkv_ref, bqkv_ref, wo_ref, bo_ref,
        ln1g_ref, ln1b_ref, w1_ref, b1_ref, w2_ref, b2_ref,
        ln2g_ref, ln2b_ref,
        wc_ref, bc_ref, start_ref, end_ref, trans_ref,
        logits_ref, llh_ref,
        *, n_layers, num_heads, scale, num_tags, seq_len):
    # ---- embedding LayerNorm (no residual) ----
    x = _ln(x_ref[...], embg_ref[...], embb_ref[...])        # (S, H)
    bias = bias_ref[...]                                     # (1, S) additive key mask

    # ---- encoder layers, unrolled at trace time; activations stay in vregs ----
    for li in range(n_layers):
        wqkv = wqkv_ref[li]                                  # (H, 3*NH*128), lane-padded heads
        bqkv = bqkv_ref[li]                                  # (1, 3*NH*128)
        wo = wo_ref[li]                                      # (NH*128, H)
        qkv = jnp.dot(x, wqkv, preferred_element_type=jnp.float32) + bqkv

        attn = bo_ref[li]                                    # (1, H), broadcast
        for h in range(num_heads):
            base = 3 * LANE * h
            # 128-lane-aligned slices of qkv: tile-aligned, no lane shuffles.
            qh = qkv[:, base:base + LANE]
            kh = qkv[:, base + LANE:base + 2 * LANE]
            vh = qkv[:, base + 2 * LANE:base + 3 * LANE]
            s = lax.dot_general(qh, kh, (((1,), (1,)), ((), ())),
                                preferred_element_type=jnp.float32) * scale + bias
            m = jnp.max(s, axis=-1, keepdims=True)
            p = jnp.exp(s - m)
            p = p * pl.reciprocal(jnp.sum(p, axis=-1, keepdims=True), approx=True)
            ctx = jnp.dot(p, vh, preferred_element_type=jnp.float32)      # (S, 128)
            # fold head merge into the O-projection (padded rows are zero)
            attn = attn + jnp.dot(ctx, wo[h * LANE:(h + 1) * LANE, :],
                                  preferred_element_type=jnp.float32)

        x1 = _ln(attn + x, ln1g_ref[li], ln1b_ref[li])
        hmid = _gelu(jnp.dot(x1, w1_ref[li], preferred_element_type=jnp.float32)
                     + b1_ref[li])
        ffn = jnp.dot(hmid, w2_ref[li], preferred_element_type=jnp.float32) + b2_ref[li]
        x = _ln(ffn + x1, ln2g_ref[li], ln2b_ref[li])

    # ---- token classifier: lane-dense, padded to 128 output lanes ----
    logits = jnp.dot(x, wc_ref[...], preferred_element_type=jnp.float32) + bc_ref[...]
    logits_ref[...] = logits                                 # (S, 128) unmasked store

    # ---- CRF log-likelihood for this sequence, fully unrolled (T = 2*S) ----
    K = num_tags
    T = 2 * seq_len
    tags = tags_ref[...]                                     # (1, T) int32
    cmask = cmask_ref[...]                                   # (1, T) f32
    start = start_ref[...]                                   # (1, K)
    end = end_ref[...]                                       # (1, K)
    trans = trans_ref[...]                                   # (K, K)
    iota_k = lax.broadcasted_iota(jnp.int32, (1, K), 1)

    def em_at(t):
        # em[t] = logits[t//2, (t%2)*K : (t%2)*K + K]  (labels reshaped x2 in time)
        return logits[t // 2:t // 2 + 1, (t % 2) * K:(t % 2) * K + K]

    def oh_at(t):
        return (tags[:, t:t + 1] == iota_k).astype(jnp.float32)

    t0_oh = oh_at(0)
    alpha = start + em_at(0)                                         # (1, K)
    score = jnp.sum(t0_oh * alpha, axis=-1, keepdims=True)           # (1, 1)
    prev_oh = t0_oh
    last_oh = t0_oh
    for t in range(1, T):
        em_t = em_at(t)
        m_t = cmask[:, t:t + 1]                                      # (1, 1)
        cur_oh = oh_at(t)
        # numerator: transition(prev->cur) + emission(cur), gated by mask (VPU only)
        tf = jnp.sum(prev_oh[:, :, None] * trans[None, :, :], axis=1)  # (1, K)
        trans_sc = jnp.sum(tf * cur_oh, axis=-1, keepdims=True)
        emis_sc = jnp.sum(cur_oh * em_t, axis=-1, keepdims=True)
        score = score + (trans_sc + emis_sc) * m_t
        # partition function: forward recursion (logsumexp over previous tag)
        bs = alpha[:, :, None] + trans[None, :, :] + em_t[:, None, :]  # (1, K, K)
        mx = jnp.max(bs, axis=1, keepdims=True)
        nxt = mx[:, 0, :] + jnp.log(jnp.sum(jnp.exp(bs - mx), axis=1))
        alpha = jnp.where(m_t > 0.0, nxt, alpha)
        last_oh = jnp.where(m_t > 0.0, cur_oh, last_oh)
        prev_oh = cur_oh

    score = score + jnp.sum(last_oh * end, axis=-1, keepdims=True)
    es = alpha + end
    mx = jnp.max(es, axis=-1, keepdims=True)
    den = mx + jnp.log(jnp.sum(jnp.exp(es - mx), axis=-1, keepdims=True))
    llh_ref[...] = jnp.broadcast_to(score - den, (1, LANE))          # lane-dense store


# ---------------- model forward (glue in JAX, everything hot in one kernel) --
def bert_crf_forward(packed, input_ids, attention_mask, labels=None):
    B, S = input_ids.shape
    H, I, L = HIDDEN, INTERMEDIATE, N_LAYERS

    # embeddings (gathers are glue); token_type hardcoded to type 0
    # TODO(synk): the reference consumes token_type_ids; type 0 assumed here.
    x_emb = (packed["word_emb"][input_ids]
             + packed["pos_emb"][:S][None, :, :]
             + packed["type_emb"][0][None, None, :]).astype(jnp.float32)   # (B, S, H)

    # additive key-mask bias computed once, fed per sequence as (1, S)
    bias = ((1.0 - attention_mask.astype(jnp.float32)) * -1e9).reshape(B, 1, S)

    # CRF extended labels / mask (glue); dummy zeros when labels is None
    if labels is not None:
        even = labels // (NUM_TAGS + 1) - 1
        odd = labels % (NUM_TAGS + 1) - 1
        ext = jnp.zeros((B, 2 * S), jnp.int32)
        ext = ext.at[:, 0::2].set(even).at[:, 1::2].set(odd)
        cmask = jnp.repeat(attention_mask.astype(jnp.int32), 2, axis=1)
        cmask = jnp.where(ext == -1, 0, cmask)
        ext = jnp.where(ext == -1, 0, ext)
    else:
        ext = jnp.zeros((B, 2 * S), jnp.int32)
        cmask = jnp.zeros((B, 2 * S), jnp.int32)
    tags = ext.reshape(B, 1, 2 * S).astype(jnp.int32)
    cmaskf = cmask.reshape(B, 1, 2 * S).astype(jnp.float32)

    kernel = functools.partial(
        _bert_crf_fused_kernel,
        n_layers=L, num_heads=N_HEADS, scale=1.0 / math.sqrt(HEAD_DIM),
        num_tags=NUM_TAGS, seq_len=S)

    def const(shape):
        # full-array block, same block every grid step (Pallas skips re-DMA)
        return pl.BlockSpec(shape, lambda b, _n=len(shape): (0,) * _n)

    def per_seq(*tail):
        # leading batch dim squeezed out of the kernel ref
        return pl.BlockSpec((None,) + tail, lambda b, _k=len(tail): (b,) + (0,) * _k)

    in_specs = [
        per_seq(S, H),                                         # x_emb
        per_seq(1, S),                                         # attention-mask bias
        per_seq(1, 2 * S),                                     # CRF tags
        per_seq(1, 2 * S),                                     # CRF mask
        const((1, H)), const((1, H)),                          # embedding LN
        const((L, H, 3 * N_HEADS * LANE)),                     # fused lane-padded QKV
        const((L, 1, 3 * N_HEADS * LANE)),
        const((L, N_HEADS * LANE, H)), const((L, 1, H)),       # O-proj (padded rows)
        const((L, 1, H)), const((L, 1, H)),                    # LN1
        const((L, H, I)), const((L, 1, I)),                    # FFN up
        const((L, I, H)), const((L, 1, H)),                    # FFN down
        const((L, 1, H)), const((L, 1, H)),                    # LN2
        const((H, LANE)), const((1, LANE)),                    # classifier (lane-padded)
        const((1, NUM_TAGS)), const((1, NUM_TAGS)), const((NUM_TAGS, NUM_TAGS)),
    ]
    out_specs = (per_seq(S, LANE), per_seq(1, LANE))
    out_shape = (jax.ShapeDtypeStruct((B, S, LANE), jnp.float32),
                 jax.ShapeDtypeStruct((B, 1, LANE), jnp.float32))

    logits_pad, llh_pad = pl.pallas_call(
        kernel,
        grid=(B,),
        out_shape=out_shape,
        in_specs=in_specs,
        out_specs=out_specs,
        compiler_params=pltpu.CompilerParams(dimension_semantics=("parallel",)),
    )(x_emb, bias, tags, cmaskf,
      packed["emb_ln_g"], packed["emb_ln_b"],
      packed["wqkv"], packed["bqkv"], packed["wo"], packed["bo"],
      packed["ln1_g"], packed["ln1_b"], packed["w1"], packed["b1"],
      packed["w2"], packed["b2"], packed["ln2_g"], packed["ln2_b"],
      packed["wc"], packed["bc"],
      packed["crf_start"], packed["crf_end"], packed["crf_trans"])

    logits = logits_pad[:, :, :NUM_LABELS]                     # (B, S, NUM_LABELS)
    nll = None
    if labels is not None:
        # TODO(synk): reference repo's CRF sign/reduction convention is not shown;
        # we return negative log-likelihood summed over the batch.
        nll = -jnp.sum(llh_pad[:, 0, 0])
    return nll, logits


# ---------------- deterministic parameter init + one-time kernel packing ----
def init_params(key):
    def nrm(k, shape, scale=0.02):
        return (scale * jax.random.normal(k, shape)).astype(jnp.float32)

    keys = iter(jax.random.split(key, 128))
    params = {
        "word_emb": nrm(next(keys), (VOCAB, HIDDEN)),
        "pos_emb": nrm(next(keys), (MAX_POS, HIDDEN)),
        "type_emb": nrm(next(keys), (TYPE_VOCAB, HIDDEN)),
        "emb_ln_g": jnp.ones((HIDDEN,), jnp.float32),
        "emb_ln_b": jnp.zeros((HIDDEN,), jnp.float32),
        "layers": [],
        "wc": nrm(next(keys), (HIDDEN, NUM_LABELS)),
        "bc": jnp.zeros((NUM_LABELS,), jnp.float32),
        "crf": {
            "start": nrm(next(keys), (NUM_TAGS,), 0.1),
            "end": nrm(next(keys), (NUM_TAGS,), 0.1),
            "trans": nrm(next(keys), (NUM_TAGS, NUM_TAGS), 0.1),
        },
    }
    for _ in range(N_LAYERS):
        params["layers"].append({
            "wq": nrm(next(keys), (HIDDEN, HIDDEN)),
            "wk": nrm(next(keys), (HIDDEN, HIDDEN)),
            "wv": nrm(next(keys), (HIDDEN, HIDDEN)),
            "bq": jnp.zeros((HIDDEN,), jnp.float32),
            "bk": jnp.zeros((HIDDEN,), jnp.float32),
            "bv": jnp.zeros((HIDDEN,), jnp.float32),
            "wo": nrm(next(keys), (HIDDEN, HIDDEN)),
            "bo": jnp.zeros((HIDDEN,), jnp.float32),
            "ln1_g": jnp.ones((HIDDEN,), jnp.float32),
            "ln1_b": jnp.zeros((HIDDEN,), jnp.float32),
            "w1": nrm(next(keys), (HIDDEN, INTERMEDIATE)),
            "b1": jnp.zeros((INTERMEDIATE,), jnp.float32),
            "w2": nrm(next(keys), (INTERMEDIATE, HIDDEN)),
            "b2": jnp.zeros((HIDDEN,), jnp.float32),
            "ln2_g": jnp.ones((HIDDEN,), jnp.float32),
            "ln2_b": jnp.zeros((HIDDEN,), jnp.float32),
        })
    return params


def pack_params(params):
    """One-time re-layout into the fused kernel's lane-padded / layer-stacked form."""
    H, I, L, NH, DH = HIDDEN, INTERMEDIATE, N_LAYERS, N_HEADS, HEAD_DIM
    wqkv = jnp.zeros((L, H, 3 * NH * LANE), jnp.float32)
    bqkv = jnp.zeros((L, 1, 3 * NH * LANE), jnp.float32)
    wo = jnp.zeros((L, NH * LANE, H), jnp.float32)

    for li, lyr in enumerate(params["layers"]):
        for h in range(NH):
            base = 3 * LANE * h
            cs, ce = h * DH, (h + 1) * DH
            wqkv = wqkv.at[li, :, base:base + DH].set(lyr["wq"][:, cs:ce])
            wqkv = wqkv.at[li, :, base + LANE:base + LANE + DH].set(lyr["wk"][:, cs:ce])
            wqkv = wqkv.at[li, :, base + 2 * LANE:base + 2 * LANE + DH].set(lyr["wv"][:, cs:ce])
            bqkv = bqkv.at[li, 0, base:base + DH].set(lyr["bq"][cs:ce])
            bqkv = bqkv.at[li, 0, base + LANE:base + LANE + DH].set(lyr["bk"][cs:ce])
            bqkv = bqkv.at[li, 0, base + 2 * LANE:base + 2 * LANE + DH].set(lyr["bv"][cs:ce])
            wo = wo.at[li, h * LANE:h * LANE + DH, :].set(lyr["wo"][cs:ce, :])

    def stack(name, shape):
        return jnp.stack([params["layers"][li][name].reshape(shape) for li in range(L)])

    wc = jnp.zeros((H, LANE), jnp.float32).at[:, :NUM_LABELS].set(params["wc"])
    bc = jnp.zeros((1, LANE), jnp.float32).at[0, :NUM_LABELS].set(params["bc"])

    return {
        "word_emb": params["word_emb"],
        "pos_emb": params["pos_emb"],
        "type_emb": params["type_emb"],
        "emb_ln_g": params["emb_ln_g"].reshape(1, H),
        "emb_ln_b": params["emb_ln_b"].reshape(1, H),
        "wqkv": wqkv, "bqkv": bqkv, "wo": wo,
        "bo": stack("bo", (1, H)),
        "ln1_g": stack("ln1_g", (1, H)), "ln1_b": stack("ln1_b", (1, H)),
        "w1": stack("w1", (H, I)), "b1": stack("b1", (1, I)),
        "w2": stack("w2", (I, H)), "b2": stack("b2", (1, H)),
        "ln2_g": stack("ln2_g", (1, H)), "ln2_b": stack("ln2_b", (1, H)),
        "wc": wc, "bc": bc,
        "crf_start": params["crf"]["start"].reshape(1, NUM_TAGS),
        "crf_end": params["crf"]["end"].reshape(1, NUM_TAGS),
        "crf_trans": params["crf"]["trans"],
    }


if __name__ == "__main__":
    key = jax.random.PRNGKey(0)
    kp, kid, klab = jax.random.split(key, 3)
    params = init_params(kp)
    packed = pack_params(params)          # one-time weight re-layout, outside jit

    B, S = 2, 8
    input_ids = jax.random.randint(kid, (B, S), 0, VOCAB, dtype=jnp.int32)
    attention_mask = jnp.array(
        [[1, 1, 1, 1, 1, 1, 1, 1],
         [1, 1, 1, 1, 1, 1, 0, 0]], dtype=jnp.int32)
    labels = jax.random.randint(klab, (B, S), 0, (NUM_TAGS + 1) ** 2, dtype=jnp.int32)
    # ensure both even/odd sub-labels at position 0 are valid (CRF first step on)
    labels = labels.at[:, 0].set(NUM_TAGS + 2)

    fwd = jax.jit(bert_crf_forward)
    nll, logits = fwd(packed, input_ids, attention_mask, labels)
    jax.block_until_ready((nll, logits))
    assert logits.shape == (B, S, NUM_LABELS)
    assert bool(jnp.isfinite(nll))
    print("KERNEL_OK")
</pallas_src>

<mosaic_0001>
module attributes {stable_mosaic.version = 11 : i64} {
  func.func @_bert_crf_fused_kernel(%arg0: i32, %arg1: memref<1x8x32xf32, #tpu.memory_space<vmem>>, %arg2: memref<1x1x8xf32, #tpu.memory_space<vmem>>, %arg3: memref<1x1x16xi32, #tpu.memory_space<vmem>>, %arg4: memref<1x1x16xf32, #tpu.memory_space<vmem>>, %arg5: memref<1x32xf32, #tpu.memory_space<vmem>>, %arg6: memref<1x32xf32, #tpu.memory_space<vmem>>, %arg7: memref<2x32x768xf32, #tpu.memory_space<vmem>>, %arg8: memref<2x1x768xf32, #tpu.memory_space<vmem>>, %arg9: memref<2x256x32xf32, #tpu.memory_space<vmem>>, %arg10: memref<2x1x32xf32, #tpu.memory_space<vmem>>, %arg11: memref<2x1x32xf32, #tpu.memory_space<vmem>>, %arg12: memref<2x1x32xf32, #tpu.memory_space<vmem>>, %arg13: memref<2x32x64xf32, #tpu.memory_space<vmem>>, %arg14: memref<2x1x64xf32, #tpu.memory_space<vmem>>, %arg15: memref<2x64x32xf32, #tpu.memory_space<vmem>>, %arg16: memref<2x1x32xf32, #tpu.memory_space<vmem>>, %arg17: memref<2x1x32xf32, #tpu.memory_space<vmem>>, %arg18: memref<2x1x32xf32, #tpu.memory_space<vmem>>, %arg19: memref<32x128xf32, #tpu.memory_space<vmem>>, %arg20: memref<1x128xf32, #tpu.memory_space<vmem>>, %arg21: memref<1x4xf32, #tpu.memory_space<vmem>>, %arg22: memref<1x4xf32, #tpu.memory_space<vmem>>, %arg23: memref<4x4xf32, #tpu.memory_space<vmem>>, %arg24: memref<1x8x128xf32, #tpu.memory_space<vmem>>, %arg25: memref<1x1x128xf32, #tpu.memory_space<vmem>>) attributes {dimension_semantics = [#tpu.dimension_semantics<parallel>], iteration_bounds = array<i64: 2>, scalar_prefetch = 0 : i64, scratch_operands = 0 : i64, tpu.core_type = #tpu.core_type<tc>, window_params = [{transform_indices = @transform_0, window_bounds = array<i64: 1, 8, 32>}, {transform_indices = @transform_1, window_bounds = array<i64: 1, 1, 8>}, {transform_indices = @transform_2, window_bounds = array<i64: 1, 1, 16>}, {transform_indices = @transform_3, window_bounds = array<i64: 1, 1, 16>}, {pipeline_mode = #tpu.pipeline_mode<synchronous>, transform_indices = @transform_4, window_bounds = array<i64: 1, 32>}, {pipeline_mode = #tpu.pipeline_mode<synchronous>, transform_indices = @transform_5, window_bounds = array<i64: 1, 32>}, {pipeline_mode = #tpu.pipeline_mode<synchronous>, transform_indices = @transform_6, window_bounds = array<i64: 2, 32, 768>}, {pipeline_mode = #tpu.pipeline_mode<synchronous>, transform_indices = @transform_7, window_bounds = array<i64: 2, 1, 768>}, {pipeline_mode = #tpu.pipeline_mode<synchronous>, transform_indices = @transform_8, window_bounds = array<i64: 2, 256, 32>}, {pipeline_mode = #tpu.pipeline_mode<synchronous>, transform_indices = @transform_9, window_bounds = array<i64: 2, 1, 32>}, {pipeline_mode = #tpu.pipeline_mode<synchronous>, transform_indices = @transform_10, window_bounds = array<i64: 2, 1, 32>}, {pipeline_mode = #tpu.pipeline_mode<synchronous>, transform_indices = @transform_11, window_bounds = array<i64: 2, 1, 32>}, {pipeline_mode = #tpu.pipeline_mode<synchronous>, transform_indices = @transform_12, window_bounds = array<i64: 2, 32, 64>}, {pipeline_mode = #tpu.pipeline_mode<synchronous>, transform_indices = @transform_13, window_bounds = array<i64: 2, 1, 64>}, {pipeline_mode = #tpu.pipeline_mode<synchronous>, transform_indices = @transform_14, window_bounds = array<i64: 2, 64, 32>}, {pipeline_mode = #tpu.pipeline_mode<synchronous>, transform_indices = @transform_15, window_bounds = array<i64: 2, 1, 32>}, {pipeline_mode = #tpu.pipeline_mode<synchronous>, transform_indices = @transform_16, window_bounds = array<i64: 2, 1, 32>}, {pipeline_mode = #tpu.pipeline_mode<synchronous>, transform_indices = @transform_17, window_bounds = array<i64: 2, 1, 32>}, {pipeline_mode = #tpu.pipeline_mode<synchronous>, transform_indices = @transform_18, window_bounds = array<i64: 32, 128>}, {pipeline_mode = #tpu.pipeline_mode<synchronous>, transform_indices = @transform_19, window_bounds = array<i64: 1, 128>}, {pipeline_mode = #tpu.pipeline_mode<synchronous>, transform_indices = @transform_20, window_bounds = array<i64: 1, 4>}, {pipeline_mode = #tpu.pipeline_mode<synchronous>, transform_indices = @transform_21, window_bounds = array<i64: 1, 4>}, {pipeline_mode = #tpu.pipeline_mode<synchronous>, transform_indices = @transform_22, window_bounds = array<i64: 4, 4>}, {transform_indices = @transform_23, window_bounds = array<i64: 1, 8, 128>}, {transform_indices = @transform_24, window_bounds = array<i64: 1, 1, 128>}]} {
    %c0 = arith.constant 0 : index
    %c0_0 = arith.constant 0 : index
    %c0_1 = arith.constant 0 : index
    %0 = vector.load %arg1[%c0, %c0_0, %c0_1] : memref<1x8x32xf32, #tpu.memory_space<vmem>>, vector<1x8x32xf32>
    %1 = vector.shape_cast %0 : vector<1x8x32xf32> to vector<8x32xf32>
    %c0_2 = arith.constant 0 : index
    %c0_3 = arith.constant 0 : index
    %2 = vector.load %arg5[%c0_2, %c0_3] : memref<1x32xf32, #tpu.memory_space<vmem>>, vector<1x32xf32>
    %c0_4 = arith.constant 0 : index
    %c0_5 = arith.constant 0 : index
    %3 = vector.load %arg6[%c0_4, %c0_5] : memref<1x32xf32, #tpu.memory_space<vmem>>, vector<1x32xf32>
    %cst = arith.constant dense<0.000000e+00> : vector<8xf32>
    %4 = vector.multi_reduction <add>, %1, %cst [1] : vector<8x32xf32> to vector<8xf32>
    %5 = vector.shape_cast %4 : vector<8xf32> to vector<8x1xf32>
    %cst_6 = arith.constant 3.200000e+01 : f32
    %6 = vector.broadcast %cst_6 : f32 to vector<8x1xf32>
    %7 = arith.divf %5, %6 : vector<8x1xf32>
    %8 = vector.broadcast %7 : vector<8x1xf32> to vector<8x32xf32>
    %9 = arith.subf %1, %8 : vector<8x32xf32>
    %10 = arith.mulf %9, %9 : vector<8x32xf32>
    %cst_7 = arith.constant dense<0.000000e+00> : vector<8xf32>
    %11 = vector.multi_reduction <add>, %10, %cst_7 [1] : vector<8x32xf32> to vector<8xf32>
    %12 = vector.shape_cast %11 : vector<8xf32> to vector<8x1xf32>
    %cst_8 = arith.constant 3.200000e+01 : f32
    %13 = vector.broadcast %cst_8 : f32 to vector<8x1xf32>
    %14 = arith.divf %12, %13 : vector<8x1xf32>
    %cst_9 = arith.constant 9.99999996E-13 : f32
    %15 = vector.broadcast %cst_9 : f32 to vector<8x1xf32>
    %16 = arith.addf %14, %15 : vector<8x1xf32>
    %17 = math.rsqrt %16 : vector<8x1xf32>
    %18 = vector.broadcast %17 : vector<8x1xf32> to vector<8x32xf32>
    %19 = arith.mulf %9, %18 : vector<8x32xf32>
    %20 = vector.broadcast %2 : vector<1x32xf32> to vector<8x32xf32>
    %21 = arith.mulf %19, %20 : vector<8x32xf32>
    %22 = vector.broadcast %3 : vector<1x32xf32> to vector<8x32xf32>
    %23 = arith.addf %21, %22 : vector<8x32xf32>
    %c0_10 = arith.constant 0 : index
    %c0_11 = arith.constant 0 : index
    %c0_12 = arith.constant 0 : index
    %24 = vector.load %arg2[%c0_10, %c0_11, %c0_12] : memref<1x1x8xf32, #tpu.memory_space<vmem>>, vector<1x1x8xf32>
    %25 = vector.shape_cast %24 : vector<1x1x8xf32> to vector<1x8xf32>
    %c0_13 = arith.constant 0 : index
    %c0_14 = arith.constant 0 : index
    %c0_15 = arith.constant 0 : index
    %26 = vector.load %arg7[%c0_13, %c0_14, %c0_15] : memref<2x32x768xf32, #tpu.memory_space<vmem>>, vector<1x32x768xf32>
    %27 = vector.shape_cast %26 : vector<1x32x768xf32> to vector<32x768xf32>
    %c0_16 = arith.constant 0 : index
    %c0_17 = arith.constant 0 : index
    %c0_18 = arith.constant 0 : index
    %28 = vector.load %arg8[%c0_16, %c0_17, %c0_18] : memref<2x1x768xf32, #tpu.memory_space<vmem>>, vector<1x1x768xf32>
    %29 = vector.shape_cast %28 : vector<1x1x768xf32> to vector<1x768xf32>
    %c0_19 = arith.constant 0 : index
    %c0_20 = arith.constant 0 : index
    %c0_21 = arith.constant 0 : index
    %30 = vector.load %arg9[%c0_19, %c0_20, %c0_21] : memref<2x256x32xf32, #tpu.memory_space<vmem>>, vector<1x256x32xf32>
    %31 = vector.shape_cast %30 : vector<1x256x32xf32> to vector<256x32xf32>
    %cst_22 = arith.constant dense<0.000000e+00> : vector<8x768xf32>
    %32 = tpu.matmul %23, %27, %cst_22 {dimension_numbers = #tpu.dot_dimension_numbers<[1], [0], [0], [1], [0, 0, 1, 1], [], []>} : vector<8x32xf32>, vector<32x768xf32>, vector<8x768xf32> -> vector<8x768xf32>
    %33 = vector.broadcast %29 : vector<1x768xf32> to vector<8x768xf32>
    %34 = arith.addf %32, %33 : vector<8x768xf32>
    %c0_23 = arith.constant 0 : index
    %c0_24 = arith.constant 0 : index
    %c0_25 = arith.constant 0 : index
    %35 = vector.load %arg10[%c0_23, %c0_24, %c0_25] : memref<2x1x32xf32, #tpu.memory_space<vmem>>, vector<1x1x32xf32>
    %36 = vector.shape_cast %35 : vector<1x1x32xf32> to vector<1x32xf32>
    %37 = vector.extract_strided_slice %34 {offsets = [0, 0], sizes = [8, 128], strides = [1, 1]} : vector<8x768xf32> to vector<8x128xf32>
    %38 = vector.extract_strided_slice %34 {offsets = [0, 128], sizes = [8, 128], strides = [1, 1]} : vector<8x768xf32> to vector<8x128xf32>
    %39 = vector.extract_strided_slice %34 {offsets = [0, 256], sizes = [8, 128], strides = [1, 1]} : vector<8x768xf32> to vector<8x128xf32>
    %cst_26 = arith.constant dense<0.000000e+00> : vector<8x8xf32>
    %40 = tpu.matmul %37, %38, %cst_26 {dimension_numbers = #tpu.dot_dimension_numbers<[1], [1], [0], [0], [0, 0, 1, 0], [], []>} : vector<8x128xf32>, vector<8x128xf32>, vector<8x8xf32> -> vector<8x8xf32>
    %cst_27 = arith.constant 2.500000e-01 : f32
    %41 = vector.broadcast %cst_27 : f32 to vector<8x8xf32>
    %42 = arith.mulf %40, %41 : vector<8x8xf32>
    %43 = vector.broadcast %25 : vector<1x8xf32> to vector<8x8xf32>
    %44 = arith.addf %42, %43 : vector<8x8xf32>
    %cst_28 = arith.constant dense<0xFF800000> : vector<8xf32>
    %45 = vector.multi_reduction <maximumf>, %44, %cst_28 [1] : vector<8x8xf32> to vector<8xf32>
    %46 = vector.shape_cast %45 : vector<8xf32> to vector<8x1xf32>
    %47 = vector.broadcast %46 : vector<8x1xf32> to vector<8x8xf32>
    %48 = arith.subf %44, %47 : vector<8x8xf32>
    %49 = math.exp %48 : vector<8x8xf32>
    %cst_29 = arith.constant dense<0.000000e+00> : vector<8xf32>
    %50 = vector.multi_reduction <add>, %49, %cst_29 [1] : vector<8x8xf32> to vector<8xf32>
    %51 = vector.shape_cast %50 : vector<8xf32> to vector<8x1xf32>
    %52 = tpu.reciprocal %51 {approx = true} : vector<8x1xf32> -> vector<8x1xf32>
    %53 = vector.broadcast %52 : vector<8x1xf32> to vector<8x8xf32>
    %54 = arith.mulf %49, %53 : vector<8x8xf32>
    %cst_30 = arith.constant dense<0.000000e+00> : vector<8x128xf32>
    %55 = tpu.matmul %54, %39, %cst_30 {dimension_numbers = #tpu.dot_dimension_numbers<[1], [0], [0], [1], [0, 0, 1, 1], [], []>} : vector<8x8xf32>, vector<8x128xf32>, vector<8x128xf32> -> vector<8x128xf32>
    %56 = vector.extract_strided_slice %31 {offsets = [0, 0], sizes = [128, 32], strides = [1, 1]} : vector<256x32xf32> to vector<128x32xf32>
    %cst_31 = arith.constant dense<0.000000e+00> : vector<8x32xf32>
    %57 = tpu.matmul %55, %56, %cst_31 {dimension_numbers = #tpu.dot_dimension_numbers<[1], [0], [0], [1], [0, 0, 1, 1], [], []>} : vector<8x128xf32>, vector<128x32xf32>, vector<8x32xf32> -> vector<8x32xf32>
    %58 = vector.broadcast %36 : vector<1x32xf32> to vector<8x32xf32>
    %59 = arith.addf %58, %57 : vector<8x32xf32>
    %60 = vector.extract_strided_slice %34 {offsets = [0, 384], sizes = [8, 128], strides = [1, 1]} : vector<8x768xf32> to vector<8x128xf32>
    %61 = vector.extract_strided_slice %34 {offsets = [0, 512], sizes = [8, 128], strides = [1, 1]} : vector<8x768xf32> to vector<8x128xf32>
    %62 = vector.extract_strided_slice %34 {offsets = [0, 640], sizes = [8, 128], strides = [1, 1]} : vector<8x768xf32> to vector<8x128xf32>
    %cst_32 = arith.constant dense<0.000000e+00> : vector<8x8xf32>
    %63 = tpu.matmul %60, %61, %cst_32 {dimension_numbers = #tpu.dot_dimension_numbers<[1], [1], [0], [0], [0, 0, 1, 0], [], []>} : vector<8x128xf32>, vector<8x128xf32>, vector<8x8xf32> -> vector<8x8xf32>
    %cst_33 = arith.constant 2.500000e-01 : f32
    %64 = vector.broadcast %cst_33 : f32 to vector<8x8xf32>
    %65 = arith.mulf %63, %64 : vector<8x8xf32>
    %66 = vector.broadcast %25 : vector<1x8xf32> to vector<8x8xf32>
    %67 = arith.addf %65, %66 : vector<8x8xf32>
    %cst_34 = arith.constant dense<0xFF800000> : vector<8xf32>
    %68 = vector.multi_reduction <maximumf>, %67, %cst_34 [1] : vector<8x8xf32> to vector<8xf32>
    %69 = vector.shape_cast %68 : vector<8xf32> to vector<8x1xf32>
    %70 = vector.broadcast %69 : vector<8x1xf32> to vector<8x8xf32>
    %71 = arith.subf %67, %70 : vector<8x8xf32>
    %72 = math.exp %71 : vector<8x8xf32>
    %cst_35 = arith.constant dense<0.000000e+00> : vector<8xf32>
    %73 = vector.multi_reduction <add>, %72, %cst_35 [1] : vector<8x8xf32> to vector<8xf32>
    %74 = vector.shape_cast %73 : vector<8xf32> to vector<8x1xf32>
    %75 = tpu.reciprocal %74 {approx = true} : vector<8x1xf32> -> vector<8x1xf32>
    %76 = vector.broadcast %75 : vector<8x1xf32> to vector<8x8xf32>
    %77 = arith.mulf %72, %76 : vector<8x8xf32>
    %cst_36 = arith.constant dense<0.000000e+00> : vector<8x128xf32>
    %78 = tpu.matmul %77, %62, %cst_36 {dimension_numbers = #tpu.dot_dimension_numbers<[1], [0], [0], [1], [0, 0, 1, 1], [], []>} : vector<8x8xf32>, vector<8x128xf32>, vector<8x128xf32> -> vector<8x128xf32>
    %79 = vector.extract_strided_slice %31 {offsets = [128, 0], sizes = [128, 32], strides = [1, 1]} : vector<256x32xf32> to vector<128x32xf32>
    %cst_37 = arith.constant dense<0.000000e+00> : vector<8x32xf32>
    %80 = tpu.matmul %78, %79, %cst_37 {dimension_numbers = #tpu.dot_dimension_numbers<[1], [0], [0], [1], [0, 0, 1, 1], [], []>} : vector<8x128xf32>, vector<128x32xf32>, vector<8x32xf32> -> vector<8x32xf32>
    %81 = arith.addf %59, %80 : vector<8x32xf32>
    %82 = arith.addf %81, %23 : vector<8x32xf32>
    %c0_38 = arith.constant 0 : index
    %c0_39 = arith.constant 0 : index
    %c0_40 = arith.constant 0 : index
    %83 = vector.load %arg11[%c0_38, %c0_39, %c0_40] : memref<2x1x32xf32, #tpu.memory_space<vmem>>, vector<1x1x32xf32>
    %84 = vector.shape_cast %83 : vector<1x1x32xf32> to vector<1x32xf32>
    %c0_41 = arith.constant 0 : index
    %c0_42 = arith.constant 0 : index
    %c0_43 = arith.constant 0 : index
    %85 = vector.load %arg12[%c0_41, %c0_42, %c0_43] : memref<2x1x32xf32, #tpu.memory_space<vmem>>, vector<1x1x32xf32>
    %86 = vector.shape_cast %85 : vector<1x1x32xf32> to vector<1x32xf32>
    %cst_44 = arith.constant dense<0.000000e+00> : vector<8xf32>
    %87 = vector.multi_reduction <add>, %82, %cst_44 [1] : vector<8x32xf32> to vector<8xf32>
    %88 = vector.shape_cast %87 : vector<8xf32> to vector<8x1xf32>
    %cst_45 = arith.constant 3.200000e+01 : f32
    %89 = vector.broadcast %cst_45 : f32 to vector<8x1xf32>
    %90 = arith.divf %88, %89 : vector<8x1xf32>
    %91 = vector.broadcast %90 : vector<8x1xf32> to vector<8x32xf32>
    %92 = arith.subf %82, %91 : vector<8x32xf32>
    %93 = arith.mulf %92, %92 : vector<8x32xf32>
    %cst_46 = arith.constant dense<0.000000e+00> : vector<8xf32>
    %94 = vector.multi_reduction <add>, %93, %cst_46 [1] : vector<8x32xf32> to vector<8xf32>
    %95 = vector.shape_cast %94 : vector<8xf32> to vector<8x1xf32>
    %cst_47 = arith.constant 3.200000e+01 : f32
    %96 = vector.broadcast %cst_47 : f32 to vector<8x1xf32>
    %97 = arith.divf %95, %96 : vector<8x1xf32>
    %cst_48 = arith.constant 9.99999996E-13 : f32
    %98 = vector.broadcast %cst_48 : f32 to vector<8x1xf32>
    %99 = arith.addf %97, %98 : vector<8x1xf32>
    %100 = math.rsqrt %99 : vector<8x1xf32>
    %101 = vector.broadcast %100 : vector<8x1xf32> to vector<8x32xf32>
    %102 = arith.mulf %92, %101 : vector<8x32xf32>
    %103 = vector.broadcast %84 : vector<1x32xf32> to vector<8x32xf32>
    %104 = arith.mulf %102, %103 : vector<8x32xf32>
    %105 = vector.broadcast %86 : vector<1x32xf32> to vector<8x32xf32>
    %106 = arith.addf %104, %105 : vector<8x32xf32>
    %c0_49 = arith.constant 0 : index
    %c0_50 = arith.constant 0 : index
    %c0_51 = arith.constant 0 : index
    %107 = vector.load %arg13[%c0_49, %c0_50, %c0_51] : memref<2x32x64xf32, #tpu.memory_space<vmem>>, vector<1x32x64xf32>
    %108 = vector.shape_cast %107 : vector<1x32x64xf32> to vector<32x64xf32>
    %cst_52 = arith.constant dense<0.000000e+00> : vector<8x64xf32>
    %109 = tpu.matmul %106, %108, %cst_52 {dimension_numbers = #tpu.dot_dimension_numbers<[1], [0], [0], [1], [0, 0, 1, 1], [], []>} : vector<8x32xf32>, vector<32x64xf32>, vector<8x64xf32> -> vector<8x64xf32>
    %c0_53 = arith.constant 0 : index
    %c0_54 = arith.constant 0 : index
    %c0_55 = arith.constant 0 : index
    %110 = vector.load %arg14[%c0_53, %c0_54, %c0_55] : memref<2x1x64xf32, #tpu.memory_space<vmem>>, vector<1x1x64xf32>
    %111 = vector.shape_cast %110 : vector<1x1x64xf32> to vector<1x64xf32>
    %112 = vector.broadcast %111 : vector<1x64xf32> to vector<8x64xf32>
    %113 = arith.addf %109, %112 : vector<8x64xf32>
    %cst_56 = arith.constant 5.000000e-01 : f32
    %114 = vector.broadcast %cst_56 : f32 to vector<8x64xf32>
    %115 = arith.mulf %114, %113 : vector<8x64xf32>
    %cst_57 = arith.constant 4.471500e-02 : f32
    %116 = vector.broadcast %cst_57 : f32 to vector<8x64xf32>
    %117 = arith.mulf %116, %113 : vector<8x64xf32>
    %118 = arith.mulf %117, %113 : vector<8x64xf32>
    %119 = arith.mulf %118, %113 : vector<8x64xf32>
    %120 = arith.addf %113, %119 : vector<8x64xf32>
    %cst_58 = arith.constant 0.797884583 : f32
    %121 = vector.broadcast %cst_58 : f32 to vector<8x64xf32>
    %122 = arith.mulf %121, %120 : vector<8x64xf32>
    %123 = math.tanh %122 : vector<8x64xf32>
    %cst_59 = arith.constant 1.000000e+00 : f32
    %124 = vector.broadcast %cst_59 : f32 to vector<8x64xf32>
    %125 = arith.addf %124, %123 : vector<8x64xf32>
    %126 = arith.mulf %115, %125 : vector<8x64xf32>
    %c0_60 = arith.constant 0 : index
    %c0_61 = arith.constant 0 : index
    %c0_62 = arith.constant 0 : index
    %127 = vector.load %arg15[%c0_60, %c0_61, %c0_62] : memref<2x64x32xf32, #tpu.memory_space<vmem>>, vector<1x64x32xf32>
    %128 = vector.shape_cast %127 : vector<1x64x32xf32> to vector<64x32xf32>
    %cst_63 = arith.constant dense<0.000000e+00> : vector<8x32xf32>
    %129 = tpu.matmul %126, %128, %cst_63 {dimension_numbers = #tpu.dot_dimension_numbers<[1], [0], [0], [1], [0, 0, 1, 1], [], []>} : vector<8x64xf32>, vector<64x32xf32>, vector<8x32xf32> -> vector<8x32xf32>
    %c0_64 = arith.constant 0 : index
    %c0_65 = arith.constant 0 : index
    %c0_66 = arith.constant 0 : index
    %130 = vector.load %arg16[%c0_64, %c0_65, %c0_66] : memref<2x1x32xf32, #tpu.memory_space<vmem>>, vector<1x1x32xf32>
    %131 = vector.shape_cast %130 : vector<1x1x32xf32> to vector<1x32xf32>
    %132 = vector.broadcast %131 : vector<1x32xf32> to vector<8x32xf32>
    %133 = arith.addf %129, %132 : vector<8x32xf32>
    %134 = arith.addf %133, %106 : vector<8x32xf32>
    %c0_67 = arith.constant 0 : index
    %c0_68 = arith.constant 0 : index
    %c0_69 = arith.constant 0 : index
    %135 = vector.load %arg17[%c0_67, %c0_68, %c0_69] : memref<2x1x32xf32, #tpu.memory_space<vmem>>, vector<1x1x32xf32>
    %136 = vector.shape_cast %135 : vector<1x1x32xf32> to vector<1x32xf32>
    %c0_70 = arith.constant 0 : index
    %c0_71 = arith.constant 0 : index
    %c0_72 = arith.constant 0 : index
    %137 = vector.load %arg18[%c0_70, %c0_71, %c0_72] : memref<2x1x32xf32, #tpu.memory_space<vmem>>, vector<1x1x32xf32>
    %138 = vector.shape_cast %137 : vector<1x1x32xf32> to vector<1x32xf32>
    %cst_73 = arith.constant dense<0.000000e+00> : vector<8xf32>
    %139 = vector.multi_reduction <add>, %134, %cst_73 [1] : vector<8x32xf32> to vector<8xf32>
    %140 = vector.shape_cast %139 : vector<8xf32> to vector<8x1xf32>
    %cst_74 = arith.constant 3.200000e+01 : f32
    %141 = vector.broadcast %cst_74 : f32 to vector<8x1xf32>
    %142 = arith.divf %140, %141 : vector<8x1xf32>
    %143 = vector.broadcast %142 : vector<8x1xf32> to vector<8x32xf32>
    %144 = arith.subf %134, %143 : vector<8x32xf32>
    %145 = arith.mulf %144, %144 : vector<8x32xf32>
    %cst_75 = arith.constant dense<0.000000e+00> : vector<8xf32>
    %146 = vector.multi_reduction <add>, %145, %cst_75 [1] : vector<8x32xf32> to vector<8xf32>
    %147 = vector.shape_cast %146 : vector<8xf32> to vector<8x1xf32>
    %cst_76 = arith.constant 3.200000e+01 : f32
    %148 = vector.broadcast %cst_76 : f32 to vector<8x1xf32>
    %149 = arith.divf %147, %148 : vector<8x1xf32>
    %cst_77 = arith.constant 9.99999996E-13 : f32
    %150 = vector.broadcast %cst_77 : f32 to vector<8x1xf32>
    %151 = arith.addf %149, %150 : vector<8x1xf32>
    %152 = math.rsqrt %151 : vector<8x1xf32>
    %153 = vector.broadcast %152 : vector<8x1xf32> to vector<8x32xf32>
    %154 = arith.mulf %144, %153 : vector<8x32xf32>
    %155 = vector.broadcast %136 : vector<1x32xf32> to vector<8x32xf32>
    %156 = arith.mulf %154, %155 : vector<8x32xf32>
    %157 = vector.broadcast %138 : vector<1x32xf32> to vector<8x32xf32>
    %158 = arith.addf %156, %157 : vector<8x32xf32>
    %c1 = arith.constant 1 : index
    %c0_78 = arith.constant 0 : index
    %c0_79 = arith.constant 0 : index
    %159 = vector.load %arg7[%c1, %c0_78, %c0_79] : memref<2x32x768xf32, #tpu.memory_space<vmem>>, vector<1x32x768xf32>
    %160 = vector.shape_cast %159 : vector<1x32x768xf32> to vector<32x768xf32>
    %c1_80 = arith.constant 1 : index
    %c0_81 = arith.constant 0 : index
    %c0_82 = arith.constant 0 : index
    %161 = vector.load %arg8[%c1_80, %c0_81, %c0_82] : memref<2x1x768xf32, #tpu.memory_space<vmem>>, vector<1x1x768xf32>
    %162 = vector.shape_cast %161 : vector<1x1x768xf32> to vector<1x768xf32>
    %c1_83 = arith.constant 1 : index
    %c0_84 = arith.constant 0 : index
    %c0_85 = arith.constant 0 : index
    %163 = vector.load %arg9[%c1_83, %c0_84, %c0_85] : memref<2x256x32xf32, #tpu.memory_space<vmem>>, vector<1x256x32xf32>
    %164 = vector.shape_cast %163 : vector<1x256x32xf32> to vector<256x32xf32>
    %cst_86 = arith.constant dense<0.000000e+00> : vector<8x768xf32>
    %165 = tpu.matmul %158, %160, %cst_86 {dimension_numbers = #tpu.dot_dimension_numbers<[1], [0], [0], [1], [0, 0, 1, 1], [], []>} : vector<8x32xf32>, vector<32x768xf32>, vector<8x768xf32> -> vector<8x768xf32>
    %166 = vector.broadcast %162 : vector<1x768xf32> to vector<8x768xf32>
    %167 = arith.addf %165, %166 : vector<8x768xf32>
    %c1_87 = arith.constant 1 : index
    %c0_88 = arith.constant 0 : index
    %c0_89 = arith.constant 0 : index
    %168 = vector.load %arg10[%c1_87, %c0_88, %c0_89] : memref<2x1x32xf32, #tpu.memory_space<vmem>>, vector<1x1x32xf32>
    %169 = vector.shape_cast %168 : vector<1x1x32xf32> to vector<1x32xf32>
    %170 = vector.extract_strided_slice %167 {offsets = [0, 0], sizes = [8, 128], strides = [1, 1]} : vector<8x768xf32> to vector<8x128xf32>
    %171 = vector.extract_strided_slice %167 {offsets = [0, 128], sizes = [8, 128], strides = [1, 1]} : vector<8x768xf32> to vector<8x128xf32>
    %172 = vector.extract_strided_slice %167 {offsets = [0, 256], sizes = [8, 128], strides = [1, 1]} : vector<8x768xf32> to vector<8x128xf32>
    %cst_90 = arith.constant dense<0.000000e+00> : vector<8x8xf32>
    %173 = tpu.matmul %170, %171, %cst_90 {dimension_numbers = #tpu.dot_dimension_numbers<[1], [1], [0], [0], [0, 0, 1, 0], [], []>} : vector<8x128xf32>, vector<8x128xf32>, vector<8x8xf32> -> vector<8x8xf32>
    %cst_91 = arith.constant 2.500000e-01 : f32
    %174 = vector.broadcast %cst_91 : f32 to vector<8x8xf32>
    %175 = arith.mulf %173, %174 : vector<8x8xf32>
    %176 = vector.broadcast %25 : vector<1x8xf32> to vector<8x8xf32>
    %177 = arith.addf %175, %176 : vector<8x8xf32>
    %cst_92 = arith.constant dense<0xFF800000> : vector<8xf32>
    %178 = vector.multi_reduction <maximumf>, %177, %cst_92 [1] : vector<8x8xf32> to vector<8xf32>
    %179 = vector.shape_cast %178 : vector<8xf32> to vector<8x1xf32>
    %180 = vector.broadcast %179 : vector<8x1xf32> to vector<8x8xf32>
    %181 = arith.subf %177, %180 : vector<8x8xf32>
    %182 = math.exp %181 : vector<8x8xf32>
    %cst_93 = arith.constant dense<0.000000e+00> : vector<8xf32>
    %183 = vector.multi_reduction <add>, %182, %cst_93 [1] : vector<8x8xf32> to vector<8xf32>
    %184 = vector.shape_cast %183 : vector<8xf32> to vector<8x1xf32>
    %185 = tpu.reciprocal %184 {approx = true} : vector<8x1xf32> -> vector<8x1xf32>
    %186 = vector.broadcast %185 : vector<8x1xf32> to vector<8x8xf32>
    %187 = arith.mulf %182, %186 : vector<8x8xf32>
    %cst_94 = arith.constant dense<0.000000e+00> : vector<8x128xf32>
    %188 = tpu.matmul %187, %172, %cst_94 {dimension_numbers = #tpu.dot_dimension_numbers<[1], [0], [0], [1], [0, 0, 1, 1], [], []>} : vector<8x8xf32>, vector<8x128xf32>, vector<8x128xf32> -> vector<8x128xf32>
    %189 = vector.extract_strided_slice %164 {offsets = [0, 0], sizes = [128, 32], strides = [1, 1]} : vector<256x32xf32> to vector<128x32xf32>
    %cst_95 = arith.constant dense<0.000000e+00> : vector<8x32xf32>
    %190 = tpu.matmul %188, %189, %cst_95 {dimension_numbers = #tpu.dot_dimension_numbers<[1], [0], [0], [1], [0, 0, 1, 1], [], []>} : vector<8x128xf32>, vector<128x32xf32>, vector<8x32xf32> -> vector<8x32xf32>
    %191 = vector.broadcast %169 : vector<1x32xf32> to vector<8x32xf32>
    %192 = arith.addf %191, %190 : vector<8x32xf32>
    %193 = vector.extract_strided_slice %167 {offsets = [0, 384], sizes = [8, 128], strides = [1, 1]} : vector<8x768xf32> to vector<8x128xf32>
    %194 = vector.extract_strided_slice %167 {offsets = [0, 512], sizes = [8, 128], strides = [1, 1]} : vector<8x768xf32> to vector<8x128xf32>
    %195 = vector.extract_strided_slice %167 {offsets = [0, 640], sizes = [8, 128], strides = [1, 1]} : vector<8x768xf32> to vector<8x128xf32>
    %cst_96 = arith.constant dense<0.000000e+00> : vector<8x8xf32>
    %196 = tpu.matmul %193, %194, %cst_96 {dimension_numbers = #tpu.dot_dimension_numbers<[1], [1], [0], [0], [0, 0, 1, 0], [], []>} : vector<8x128xf32>, vector<8x128xf32>, vector<8x8xf32> -> vector<8x8xf32>
    %cst_97 = arith.constant 2.500000e-01 : f32
    %197 = vector.broadcast %cst_97 : f32 to vector<8x8xf32>
    %198 = arith.mulf %196, %197 : vector<8x8xf32>
    %199 = vector.broadcast %25 : vector<1x8xf32> to vector<8x8xf32>
    %200 = arith.addf %198, %199 : vector<8x8xf32>
    %cst_98 = arith.constant dense<0xFF800000> : vector<8xf32>
    %201 = vector.multi_reduction <maximumf>, %200, %cst_98 [1] : vector<8x8xf32> to vector<8xf32>
    %202 = vector.shape_cast %201 : vector<8xf32> to vector<8x1xf32>
    %203 = vector.broadcast %202 : vector<8x1xf32> to vector<8x8xf32>
    %204 = arith.subf %200, %203 : vector<8x8xf32>
    %205 = math.exp %204 : vector<8x8xf32>
    %cst_99 = arith.constant dense<0.000000e+00> : vector<8xf32>
    %206 = vector.multi_reduction <add>, %205, %cst_99 [1] : vector<8x8xf32> to vector<8xf32>
    %207 = vector.shape_cast %206 : vector<8xf32> to vector<8x1xf32>
    %208 = tpu.reciprocal %207 {approx = true} : vector<8x1xf32> -> vector<8x1xf32>
    %209 = vector.broadcast %208 : vector<8x1xf32> to vector<8x8xf32>
    %210 = arith.mulf %205, %209 : vector<8x8xf32>
    %cst_100 = arith.constant dense<0.000000e+00> : vector<8x128xf32>
    %211 = tpu.matmul %210, %195, %cst_100 {dimension_numbers = #tpu.dot_dimension_numbers<[1], [0], [0], [1], [0, 0, 1, 1], [], []>} : vector<8x8xf32>, vector<8x128xf32>, vector<8x128xf32> -> vector<8x128xf32>
    %212 = vector.extract_strided_slice %164 {offsets = [128, 0], sizes = [128, 32], strides = [1, 1]} : vector<256x32xf32> to vector<128x32xf32>
    %cst_101 = arith.constant dense<0.000000e+00> : vector<8x32xf32>
    %213 = tpu.matmul %211, %212, %cst_101 {dimension_numbers = #tpu.dot_dimension_numbers<[1], [0], [0], [1], [0, 0, 1, 1], [], []>} : vector<8x128xf32>, vector<128x32xf32>, vector<8x32xf32> -> vector<8x32xf32>
    %214 = arith.addf %192, %213 : vector<8x32xf32>
    %215 = arith.addf %214, %158 : vector<8x32xf32>
    %c1_102 = arith.constant 1 : index
    %c0_103 = arith.constant 0 : index
    %c0_104 = arith.constant 0 : index
    %216 = vector.load %arg11[%c1_102, %c0_103, %c0_104] : memref<2x1x32xf32, #tpu.memory_space<vmem>>, vector<1x1x32xf32>
    %217 = vector.shape_cast %216 : vector<1x1x32xf32> to vector<1x32xf32>
    %c1_105 = arith.constant 1 : index
    %c0_106 = arith.constant 0 : index
    %c0_107 = arith.constant 0 : index
    %218 = vector.load %arg12[%c1_105, %c0_106, %c0_107] : memref<2x1x32xf32, #tpu.memory_space<vmem>>, vector<1x1x32xf32>
    %219 = vector.shape_cast %218 : vector<1x1x32xf32> to vector<1x32xf32>
    %cst_108 = arith.constant dense<0.000000e+00> : vector<8xf32>
    %220 = vector.multi_reduction <add>, %215, %cst_108 [1] : vector<8x32xf32> to vector<8xf32>
    %221 = vector.shape_cast %220 : vector<8xf32> to vector<8x1xf32>
    %cst_109 = arith.constant 3.200000e+01 : f32
    %222 = vector.broadcast %cst_109 : f32 to vector<8x1xf32>
    %223 = arith.divf %221, %222 : vector<8x1xf32>
    %224 = vector.broadcast %223 : vector<8x1xf32> to vector<8x32xf32>
    %225 = arith.subf %215, %224 : vector<8x32xf32>
    %226 = arith.mulf %225, %225 : vector<8x32xf32>
    %cst_110 = arith.constant dense<0.000000e+00> : vector<8xf32>
    %227 = vector.multi_reduction <add>, %226, %cst_110 [1] : vector<8x32xf32> to vector<8xf32>
    %228 = vector.shape_cast %227 : vector<8xf32> to vector<8x1xf32>
    %cst_111 = arith.constant 3.200000e+01 : f32
    %229 = vector.broadcast %cst_111 : f32 to vector<8x1xf32>
    %230 = arith.divf %228, %229 : vector<8x1xf32>
    %cst_112 = arith.constant 9.99999996E-13 : f32
    %231 = vector.broadcast %cst_112 : f32 to vector<8x1xf32>
    %232 = arith.addf %230, %231 : vector<8x1xf32>
    %233 = math.rsqrt %232 : vector<8x1xf32>
    %234 = vector.broadcast %233 : vector<8x1xf32> to vector<8x32xf32>
    %235 = arith.mulf %225, %234 : vector<8x32xf32>
    %236 = vector.broadcast %217 : vector<1x32xf32> to vector<8x32xf32>
    %237 = arith.mulf %235, %236 : vector<8x32xf32>
    %238 = vector.broadcast %219 : vector<1x32xf32> to vector<8x32xf32>
    %239 = arith.addf %237, %238 : vector<8x32xf32>
    %c1_113 = arith.constant 1 : index
    %c0_114 = arith.constant 0 : index
    %c0_115 = arith.constant 0 : index
    %240 = vector.load %arg13[%c1_113, %c0_114, %c0_115] : memref<2x32x64xf32, #tpu.memory_space<vmem>>, vector<1x32x64xf32>
    %241 = vector.shape_cast %240 : vector<1x32x64xf32> to vector<32x64xf32>
    %cst_116 = arith.constant dense<0.000000e+00> : vector<8x64xf32>
    %242 = tpu.matmul %239, %241, %cst_116 {dimension_numbers = #tpu.dot_dimension_numbers<[1], [0], [0], [1], [0, 0, 1, 1], [], []>} : vector<8x32xf32>, vector<32x64xf32>, vector<8x64xf32> -> vector<8x64xf32>
    %c1_117 = arith.constant 1 : index
    %c0_118 = arith.constant 0 : index
    %c0_119 = arith.constant 0 : index
    %243 = vector.load %arg14[%c1_117, %c0_118, %c0_119] : memref<2x1x64xf32, #tpu.memory_space<vmem>>, vector<1x1x64xf32>
    %244 = vector.shape_cast %243 : vector<1x1x64xf32> to vector<1x64xf32>
    %245 = vector.broadcast %244 : vector<1x64xf32> to vector<8x64xf32>
    %246 = arith.addf %242, %245 : vector<8x64xf32>
    %cst_120 = arith.constant 5.000000e-01 : f32
    %247 = vector.broadcast %cst_120 : f32 to vector<8x64xf32>
    %248 = arith.mulf %247, %246 : vector<8x64xf32>
    %cst_121 = arith.constant 4.471500e-02 : f32
    %249 = vector.broadcast %cst_121 : f32 to vector<8x64xf32>
    %250 = arith.mulf %249, %246 : vector<8x64xf32>
    %251 = arith.mulf %250, %246 : vector<8x64xf32>
    %252 = arith.mulf %251, %246 : vector<8x64xf32>
    %253 = arith.addf %246, %252 : vector<8x64xf32>
    %cst_122 = arith.constant 0.797884583 : f32
    %254 = vector.broadcast %cst_122 : f32 to vector<8x64xf32>
    %255 = arith.mulf %254, %253 : vector<8x64xf32>
    %256 = math.tanh %255 : vector<8x64xf32>
    %cst_123 = arith.constant 1.000000e+00 : f32
    %257 = vector.broadcast %cst_123 : f32 to vector<8x64xf32>
    %258 = arith.addf %257, %256 : vector<8x64xf32>
    %259 = arith.mulf %248, %258 : vector<8x64xf32>
    %c1_124 = arith.constant 1 : index
    %c0_125 = arith.constant 0 : index
    %c0_126 = arith.constant 0 : index
    %260 = vector.load %arg15[%c1_124, %c0_125, %c0_126] : memref<2x64x32xf32, #tpu.memory_space<vmem>>, vector<1x64x32xf32>
    %261 = vector.shape_cast %260 : vector<1x64x32xf32> to vector<64x32xf32>
    %cst_127 = arith.constant dense<0.000000e+00> : vector<8x32xf32>
    %262 = tpu.matmul %259, %261, %cst_127 {dimension_numbers = #tpu.dot_dimension_numbers<[1], [0], [0], [1], [0, 0, 1, 1], [], []>} : vector<8x64xf32>, vector<64x32xf32>, vector<8x32xf32> -> vector<8x32xf32>
    %c1_128 = arith.constant 1 : index
    %c0_129 = arith.constant 0 : index
    %c0_130 = arith.constant 0 : index
    %263 = vector.load %arg16[%c1_128, %c0_129, %c0_130] : memref<2x1x32xf32, #tpu.memory_space<vmem>>, vector<1x1x32xf32>
    %264 = vector.shape_cast %263 : vector<1x1x32xf32> to vector<1x32xf32>
    %265 = vector.broadcast %264 : vector<1x32xf32> to vector<8x32xf32>
    %266 = arith.addf %262, %265 : vector<8x32xf32>
    %267 = arith.addf %266, %239 : vector<8x32xf32>
    %c1_131 = arith.constant 1 : index
    %c0_132 = arith.constant 0 : index
    %c0_133 = arith.constant 0 : index
    %268 = vector.load %arg17[%c1_131, %c0_132, %c0_133] : memref<2x1x32xf32, #tpu.memory_space<vmem>>, vector<1x1x32xf32>
    %269 = vector.shape_cast %268 : vector<1x1x32xf32> to vector<1x32xf32>
    %c1_134 = arith.constant 1 : index
    %c0_135 = arith.constant 0 : index
    %c0_136 = arith.constant 0 : index
    %270 = vector.load %arg18[%c1_134, %c0_135, %c0_136] : memref<2x1x32xf32, #tpu.memory_space<vmem>>, vector<1x1x32xf32>
    %271 = vector.shape_cast %270 : vector<1x1x32xf32> to vector<1x32xf32>
    %cst_137 = arith.constant dense<0.000000e+00> : vector<8xf32>
    %272 = vector.multi_reduction <add>, %267, %cst_137 [1] : vector<8x32xf32> to vector<8xf32>
    %273 = vector.shape_cast %272 : vector<8xf32> to vector<8x1xf32>
    %cst_138 = arith.constant 3.200000e+01 : f32
    %274 = vector.broadcast %cst_138 : f32 to vector<8x1xf32>
    %275 = arith.divf %273, %274 : vector<8x1xf32>
    %276 = vector.broadcast %275 : vector<8x1xf32> to vector<8x32xf32>
    %277 = arith.subf %267, %276 : vector<8x32xf32>
    %278 = arith.mulf %277, %277 : vector<8x32xf32>
    %cst_139 = arith.constant dense<0.000000e+00> : vector<8xf32>
    %279 = vector.multi_reduction <add>, %278, %cst_139 [1] : vector<8x32xf32> to vector<8xf32>
    %280 = vector.shape_cast %279 : vector<8xf32> to vector<8x1xf32>
    %cst_140 = arith.constant 3.200000e+01 : f32
    %281 = vector.broadcast %cst_140 : f32 to vector<8x1xf32>
    %282 = arith.divf %280, %281 : vector<8x1xf32>
    %cst_141 = arith.constant 9.99999996E-13 : f32
    %283 = vector.broadcast %cst_141 : f32 to vector<8x1xf32>
    %284 = arith.addf %282, %283 : vector<8x1xf32>
    %285 = math.rsqrt %284 : vector<8x1xf32>
    %286 = vector.broadcast %285 : vector<8x1xf32> to vector<8x32xf32>
    %287 = arith.mulf %277, %286 : vector<8x32xf32>
    %288 = vector.broadcast %269 : vector<1x32xf32> to vector<8x32xf32>
    %289 = arith.mulf %287, %288 : vector<8x32xf32>
    %290 = vector.broadcast %271 : vector<1x32xf32> to vector<8x32xf32>
    %291 = arith.addf %289, %290 : vector<8x32xf32>
    %c0_142 = arith.constant 0 : index
    %c0_143 = arith.constant 0 : index
    %292 = vector.load %arg19[%c0_142, %c0_143] : memref<32x128xf32, #tpu.memory_space<vmem>>, vector<32x128xf32>
    %cst_144 = arith.constant dense<0.000000e+00> : vector<8x128xf32>
    %293 = tpu.matmul %291, %292, %cst_144 {dimension_numbers = #tpu.dot_dimension_numbers<[1], [0], [0], [1], [0, 0, 1, 1], [], []>} : vector<8x32xf32>, vector<32x128xf32>, vector<8x128xf32> -> vector<8x128xf32>
    %c0_145 = arith.constant 0 : index
    %c0_146 = arith.constant 0 : index
    %294 = vector.load %arg20[%c0_145, %c0_146] : memref<1x128xf32, #tpu.memory_space<vmem>>, vector<1x128xf32>
    %295 = vector.broadcast %294 : vector<1x128xf32> to vector<8x128xf32>
    %296 = arith.addf %293, %295 : vector<8x128xf32>
    %c0_147 = arith.constant 0 : index
    %c0_148 = arith.constant 0 : index
    %c0_149 = arith.constant 0 : index
    %297 = vector.load %arg24[%c0_147, %c0_148, %c0_149] : memref<1x8x128xf32, #tpu.memory_space<vmem>>, vector<1x8x128xf32>
    %298 = vector.shape_cast %297 : vector<1x8x128xf32> to vector<8x128xf32>
    %299 = vector.shape_cast %296 : vector<8x128xf32> to vector<1x8x128xf32>
    tpu.vector_store %arg24[%c0_147, %c0_148, %c0_149], %299 {strides = array<i32>} : memref<1x8x128xf32, #tpu.memory_space<vmem>>, vector<1x8x128xf32>,
    %c0_150 = arith.constant 0 : index
    %c0_151 = arith.constant 0 : index
    %c0_152 = arith.constant 0 : index
    %300 = vector.load %arg3[%c0_150, %c0_151, %c0_152] : memref<1x1x16xi32, #tpu.memory_space<vmem>>, vector<1x1x16xi32>
    %301 = vector.shape_cast %300 : vector<1x1x16xi32> to vector<1x16xi32>
    %c0_153 = arith.constant 0 : index
    %c0_154 = arith.constant 0 : index
    %c0_155 = arith.constant 0 : index
    %302 = vector.load %arg4[%c0_153, %c0_154, %c0_155] : memref<1x1x16xf32, #tpu.memory_space<vmem>>, vector<1x1x16xf32>
    %303 = vector.shape_cast %302 : vector<1x1x16xf32> to vector<1x16xf32>
    %c0_156 = arith.constant 0 : index
    %c0_157 = arith.constant 0 : index
    %304 = vector.load %arg21[%c0_156, %c0_157] : memref<1x4xf32, #tpu.memory_space<vmem>>, vector<1x4xf32>
    %c0_158 = arith.constant 0 : index
    %c0_159 = arith.constant 0 : index
    %305 = vector.load %arg22[%c0_158, %c0_159] : memref<1x4xf32, #tpu.memory_space<vmem>>, vector<1x4xf32>
    %c0_160 = arith.constant 0 : index
    %c0_161 = arith.constant 0 : index
    %306 = vector.load %arg23[%c0_160, %c0_161] : memref<4x4xf32, #tpu.memory_space<vmem>>, vector<4x4xf32>
    %307 = tpu.iota {dimensions = array<i32: 1>} : vector<1x4xi32>
    %308 = vector.extract_strided_slice %301 {offsets = [0, 0], sizes = [1, 1], strides = [1, 1]} : vector<1x16xi32> to vector<1x1xi32>
    %309 = vector.broadcast %308 : vector<1x1xi32> to vector<1x4xi32>
    %310 = arith.cmpi eq, %309, %307 : vector<1x4xi32>
    %311 = arith.extui %310 : vector<1x4xi1> to vector<1x4xi32>
    %312 = arith.sitofp %311 : vector<1x4xi32> to vector<1x4xf32>
    %313 = vector.extract_strided_slice %296 {offsets = [0, 0], sizes = [1, 4], strides = [1, 1]} : vector<8x128xf32> to vector<1x4xf32>
    %314 = arith.addf %304, %313 : vector<1x4xf32>
    %315 = arith.mulf %312, %314 : vector<1x4xf32>
    %cst_162 = arith.constant dense<0.000000e+00> : vector<1xf32>
    %316 = vector.multi_reduction <add>, %315, %cst_162 [1] : vector<1x4xf32> to vector<1xf32>
    %317 = vector.shape_cast %316 : vector<1xf32> to vector<1x1xf32>
    %318 = vector.extract_strided_slice %296 {offsets = [0, 4], sizes = [1, 4], strides = [1, 1]} : vector<8x128xf32> to vector<1x4xf32>
    %319 = vector.extract_strided_slice %303 {offsets = [0, 1], sizes = [1, 1], strides = [1, 1]} : vector<1x16xf32> to vector<1x1xf32>
    %320 = vector.extract_strided_slice %301 {offsets = [0, 1], sizes = [1, 1], strides = [1, 1]} : vector<1x16xi32> to vector<1x1xi32>
    %321 = vector.broadcast %320 : vector<1x1xi32> to vector<1x4xi32>
    %322 = arith.cmpi eq, %321, %307 : vector<1x4xi32>
    %323 = arith.extui %322 : vector<1x4xi1> to vector<1x4xi32>
    %324 = arith.sitofp %323 : vector<1x4xi32> to vector<1x4xf32>
    %325 = vector.shape_cast %312 : vector<1x4xf32> to vector<1x4x1xf32>
    %326 = vector.shape_cast %306 : vector<4x4xf32> to vector<1x4x4xf32>
    %327 = vector.broadcast %325 : vector<1x4x1xf32> to vector<1x4x4xf32>
    %328 = arith.mulf %327, %326 : vector<1x4x4xf32>
    %cst_163 = arith.constant dense<0.000000e+00> : vector<1x4xf32>
    %329 = vector.multi_reduction <add>, %328, %cst_163 [1] : vector<1x4x4xf32> to vector<1x4xf32>
    %330 = arith.mulf %329, %324 : vector<1x4xf32>
    %cst_164 = arith.constant dense<0.000000e+00> : vector<1xf32>
    %331 = vector.multi_reduction <add>, %330, %cst_164 [1] : vector<1x4xf32> to vector<1xf32>
    %332 = vector.shape_cast %331 : vector<1xf32> to vector<1x1xf32>
    %333 = arith.mulf %324, %318 : vector<1x4xf32>
    %cst_165 = arith.constant dense<0.000000e+00> : vector<1xf32>
    %334 = vector.multi_reduction <add>, %333, %cst_165 [1] : vector<1x4xf32> to vector<1xf32>
    %335 = vector.shape_cast %334 : vector<1xf32> to vector<1x1xf32>
    %336 = arith.addf %332, %335 : vector<1x1xf32>
    %337 = arith.mulf %336, %319 : vector<1x1xf32>
    %338 = arith.addf %317, %337 : vector<1x1xf32>
    %339 = vector.shape_cast %314 : vector<1x4xf32> to vector<1x4x1xf32>
    %340 = vector.shape_cast %306 : vector<4x4xf32> to vector<1x4x4xf32>
    %341 = vector.broadcast %339 : vector<1x4x1xf32> to vector<1x4x4xf32>
    %342 = arith.addf %341, %340 : vector<1x4x4xf32>
    %343 = vector.shape_cast %318 : vector<1x4xf32> to vector<1x1x4xf32>
    %344 = vector.broadcast %343 : vector<1x1x4xf32> to vector<1x4x4xf32>
    %345 = arith.addf %342, %344 : vector<1x4x4xf32>
    %cst_166 = arith.constant dense<0xFF800000> : vector<1x4xf32>
    %346 = vector.multi_reduction <maximumf>, %345, %cst_166 [1] : vector<1x4x4xf32> to vector<1x4xf32>
    %347 = vector.shape_cast %346 : vector<1x4xf32> to vector<1x1x4xf32>
    %348 = vector.shape_cast %347 : vector<1x1x4xf32> to vector<1x4xf32>
    %349 = vector.broadcast %347 : vector<1x1x4xf32> to vector<1x4x4xf32>
    %350 = arith.subf %345, %349 : vector<1x4x4xf32>
    %351 = math.exp %350 : vector<1x4x4xf32>
    %cst_167 = arith.constant dense<0.000000e+00> : vector<1x4xf32>
    %352 = vector.multi_reduction <add>, %351, %cst_167 [1] : vector<1x4x4xf32> to vector<1x4xf32>
    %353 = math.log %352 : vector<1x4xf32>
    %354 = arith.addf %348, %353 : vector<1x4xf32>
    %cst_168 = arith.constant 0.000000e+00 : f32
    %355 = vector.broadcast %cst_168 : f32 to vector<1x1xf32>
    %356 = arith.cmpf ogt, %319, %355 : vector<1x1xf32>
    %357 = vector.shape_cast %356 : vector<1x1xi1> to vector<1x1xi1>
    %358 = vector.broadcast %357 : vector<1x1xi1> to vector<1x4xi1>
    %359 = arith.select %358, %354, %314 : vector<1x4xi1>, vector<1x4xf32>
    %cst_169 = arith.constant 0.000000e+00 : f32
    %360 = vector.broadcast %cst_169 : f32 to vector<1x1xf32>
    %361 = arith.cmpf ogt, %319, %360 : vector<1x1xf32>
    %362 = vector.shape_cast %361 : vector<1x1xi1> to vector<1x1xi1>
    %363 = vector.broadcast %362 : vector<1x1xi1> to vector<1x4xi1>
    %364 = arith.select %363, %324, %312 : vector<1x4xi1>, vector<1x4xf32>
    %365 = vector.extract_strided_slice %296 {offsets = [1, 0], sizes = [1, 4], strides = [1, 1]} : vector<8x128xf32> to vector<1x4xf32>
    %366 = vector.extract_strided_slice %303 {offsets = [0, 2], sizes = [1, 1], strides = [1, 1]} : vector<1x16xf32> to vector<1x1xf32>
    %367 = vector.extract_strided_slice %301 {offsets = [0, 2], sizes = [1, 1], strides = [1, 1]} : vector<1x16xi32> to vector<1x1xi32>
    %368 = vector.broadcast %367 : vector<1x1xi32> to vector<1x4xi32>
    %369 = arith.cmpi eq, %368, %307 : vector<1x4xi32>
    %370 = arith.extui %369 : vector<1x4xi1> to vector<1x4xi32>
    %371 = arith.sitofp %370 : vector<1x4xi32> to vector<1x4xf32>
    %372 = vector.shape_cast %324 : vector<1x4xf32> to vector<1x4x1xf32>
    %373 = vector.shape_cast %306 : vector<4x4xf32> to vector<1x4x4xf32>
    %374 = vector.broadcast %372 : vector<1x4x1xf32> to vector<1x4x4xf32>
    %375 = arith.mulf %374, %373 : vector<1x4x4xf32>
    %cst_170 = arith.constant dense<0.000000e+00> : vector<1x4xf32>
    %376 = vector.multi_reduction <add>, %375, %cst_170 [1] : vector<1x4x4xf32> to vector<1x4xf32>
    %377 = arith.mulf %376, %371 : vector<1x4xf32>
    %cst_171 = arith.constant dense<0.000000e+00> : vector<1xf32>
    %378 = vector.multi_reduction <add>, %377, %cst_171 [1] : vector<1x4xf32> to vector<1xf32>
    %379 = vector.shape_cast %378 : vector<1xf32> to vector<1x1xf32>
    %380 = arith.mulf %371, %365 : vector<1x4xf32>
    %cst_172 = arith.constant dense<0.000000e+00> : vector<1xf32>
    %381 = vector.multi_reduction <add>, %380, %cst_172 [1] : vector<1x4xf32> to vector<1xf32>
    %382 = vector.shape_cast %381 : vector<1xf32> to vector<1x1xf32>
    %383 = arith.addf %379, %382 : vector<1x1xf32>
    %384 = arith.mulf %383, %366 : vector<1x1xf32>
    %385 = arith.addf %338, %384 : vector<1x1xf32>
    %386 = vector.shape_cast %359 : vector<1x4xf32> to vector<1x4x1xf32>
    %387 = vector.shape_cast %306 : vector<4x4xf32> to vector<1x4x4xf32>
    %388 = vector.broadcast %386 : vector<1x4x1xf32> to vector<1x4x4xf32>
    %389 = arith.addf %388, %387 : vector<1x4x4xf32>
    %390 = vector.shape_cast %365 : vector<1x4xf32> to vector<1x1x4xf32>
    %391 = vector.broadcast %390 : vector<1x1x4xf32> to vector<1x4x4xf32>
    %392 = arith.addf %389, %391 : vector<1x4x4xf32>
    %cst_173 = arith.constant dense<0xFF800000> : vector<1x4xf32>
    %393 = vector.multi_reduction <maximumf>, %392, %cst_173 [1] : vector<1x4x4xf32> to vector<1x4xf32>
    %394 = vector.shape_cast %393 : vector<1x4xf32> to vector<1x1x4xf32>
    %395 = vector.shape_cast %394 : vector<1x1x4xf32> to vector<1x4xf32>
    %396 = vector.broadcast %394 : vector<1x1x4xf32> to vector<1x4x4xf32>
    %397 = arith.subf %392, %396 : vector<1x4x4xf32>
    %398 = math.exp %397 : vector<1x4x4xf32>
    %cst_174 = arith.constant dense<0.000000e+00> : vector<1x4xf32>
    %399 = vector.multi_reduction <add>, %398, %cst_174 [1] : vector<1x4x4xf32> to vector<1x4xf32>
    %400 = math.log %399 : vector<1x4xf32>
    %401 = arith.addf %395, %400 : vector<1x4xf32>
    %cst_175 = arith.constant 0.000000e+00 : f32
    %402 = vector.broadcast %cst_175 : f32 to vector<1x1xf32>
    %403 = arith.cmpf ogt, %366, %402 : vector<1x1xf32>
    %404 = vector.shape_cast %403 : vector<1x1xi1> to vector<1x1xi1>
    %405 = vector.broadcast %404 : vector<1x1xi1> to vector<1x4xi1>
    %406 = arith.select %405, %401, %359 : vector<1x4xi1>, vector<1x4xf32>
    %cst_176 = arith.constant 0.000000e+00 : f32
    %407 = vector.broadcast %cst_176 : f32 to vector<1x1xf32>
    %408 = arith.cmpf ogt, %366, %407 : vector<1x1xf32>
    %409 = vector.shape_cast %408 : vector<1x1xi1> to vector<1x1xi1>
    %410 = vector.broadcast %409 : vector<1x1xi1> to vector<1x4xi1>
    %411 = arith.select %410, %371, %364 : vector<1x4xi1>, vector<1x4xf32>
    %412 = vector.extract_strided_slice %296 {offsets = [1, 4], sizes = [1, 4], strides = [1, 1]} : vector<8x128xf32> to vector<1x4xf32>
    %413 = vector.extract_strided_slice %303 {offsets = [0, 3], sizes = [1, 1], strides = [1, 1]} : vector<1x16xf32> to vector<1x1xf32>
    %414 = vector.extract_strided_slice %301 {offsets = [0, 3], sizes = [1, 1], strides = [1, 1]} : vector<1x16xi32> to vector<1x1xi32>
    %415 = vector.broadcast %414 : vector<1x1xi32> to vector<1x4xi32>
    %416 = arith.cmpi eq, %415, %307 : vector<1x4xi32>
    %417 = arith.extui %416 : vector<1x4xi1> to vector<1x4xi32>
    %418 = arith.sitofp %417 : vector<1x4xi32> to vector<1x4xf32>
    %419 = vector.shape_cast %371 : vector<1x4xf32> to vector<1x4x1xf32>
    %420 = vector.shape_cast %306 : vector<4x4xf32> to vector<1x4x4xf32>
    %421 = vector.broadcast %419 : vector<1x4x1xf32> to vector<1x4x4xf32>
    %422 = arith.mulf %421, %420 : vector<1x4x4xf32>
    %cst_177 = arith.constant dense<0.000000e+00> : vector<1x4xf32>
    %423 = vector.multi_reduction <add>, %422, %cst_177 [1] : vector<1x4x4xf32> to vector<1x4xf32>
    %424 = arith.mulf %423, %418 : vector<1x4xf32>
    %cst_178 = arith.constant dense<0.000000e+00> : vector<1xf32>
    %425 = vector.multi_reduction <add>, %424, %cst_178 [1] : vector<1x4xf32> to vector<1xf32>
    %426 = vector.shape_cast %425 : vector<1xf32> to vector<1x1xf32>
    %427 = arith.mulf %418, %412 : vector<1x4xf32>
    %cst_179 = arith.constant dense<0.000000e+00> : vector<1xf32>
    %428 = vector.multi_reduction <add>, %427, %cst_179 [1] : vector<1x4xf32> to vector<1xf32>
    %429 = vector.shape_cast %428 : vector<1xf32> to vector<1x1xf32>
    %430 = arith.addf %426, %429 : vector<1x1xf32>
    %431 = arith.mulf %430, %413 : vector<1x1xf32>
    %432 = arith.addf %385, %431 : vector<1x1xf32>
    %433 = vector.shape_cast %406 : vector<1x4xf32> to vector<1x4x1xf32>
    %434 = vector.shape_cast %306 : vector<4x4xf32> to vector<1x4x4xf32>
    %435 = vector.broadcast %433 : vector<1x4x1xf32> to vector<1x4x4xf32>
    %436 = arith.addf %435, %434 : vector<1x4x4xf32>
    %437 = vector.shape_cast %412 : vector<1x4xf32> to vector<1x1x4xf32>
    %438 = vector.broadcast %437 : vector<1x1x4xf32> to vector<1x4x4xf32>
    %439 = arith.addf %436, %438 : vector<1x4x4xf32>
    %cst_180 = arith.constant dense<0xFF800000> : vector<1x4xf32>
    %440 = vector.multi_reduction <maximumf>, %439, %cst_180 [1] : vector<1x4x4xf32> to vector<1x4xf32>
    %441 = vector.shape_cast %440 : vector<1x4xf32> to vector<1x1x4xf32>
    %442 = vector.shape_cast %441 : vector<1x1x4xf32> to vector<1x4xf32>
    %443 = vector.broadcast %441 : vector<1x1x4xf32> to vector<1x4x4xf32>
    %444 = arith.subf %439, %443 : vector<1x4x4xf32>
    %445 = math.exp %444 : vector<1x4x4xf32>
    %cst_181 = arith.constant dense<0.000000e+00> : vector<1x4xf32>
    %446 = vector.multi_reduction <add>, %445, %cst_181 [1] : vector<1x4x4xf32> to vector<1x4xf32>
    %447 = math.log %446 : vector<1x4xf32>
    %448 = arith.addf %442, %447 : vector<1x4xf32>
    %cst_182 = arith.constant 0.000000e+00 : f32
    %449 = vector.broadcast %cst_182 : f32 to vector<1x1xf32>
    %450 = arith.cmpf ogt, %413, %449 : vector<1x1xf32>
    %451 = vector.shape_cast %450 : vector<1x1xi1> to vector<1x1xi1>
    %452 = vector.broadcast %451 : vector<1x1xi1> to vector<1x4xi1>
    %453 = arith.select %452, %448, %406 : vector<1x4xi1>, vector<1x4xf32>
    %cst_183 = arith.constant 0.000000e+00 : f32
    %454 = vector.broadcast %cst_183 : f32 to vector<1x1xf32>
    %455 = arith.cmpf ogt, %413, %454 : vector<1x1xf32>
    %456 = vector.shape_cast %455 : vector<1x1xi1> to vector<1x1xi1>
    %457 = vector.broadcast %456 : vector<1x1xi1> to vector<1x4xi1>
    %458 = arith.select %457, %418, %411 : vector<1x4xi1>, vector<1x4xf32>
    %459 = vector.extract_strided_slice %296 {offsets = [2, 0], sizes = [1, 4], strides = [1, 1]} : vector<8x128xf32> to vector<1x4xf32>
    %460 = vector.extract_strided_slice %303 {offsets = [0, 4], sizes = [1, 1], strides = [1, 1]} : vector<1x16xf32> to vector<1x1xf32>
    %461 = vector.extract_strided_slice %301 {offsets = [0, 4], sizes = [1, 1], strides = [1, 1]} : vector<1x16xi32> to vector<1x1xi32>
    %462 = vector.broadcast %461 : vector<1x1xi32> to vector<1x4xi32>
    %463 = arith.cmpi eq, %462, %307 : vector<1x4xi32>
    %464 = arith.extui %463 : vector<1x4xi1> to vector<1x4xi32>
    %465 = arith.sitofp %464 : vector<1x4xi32> to vector<1x4xf32>
    %466 = vector.shape_cast %418 : vector<1x4xf32> to vector<1x4x1xf32>
    %467 = vector.shape_cast %306 : vector<4x4xf32> to vector<1x4x4xf32>
    %468 = vector.broadcast %466 : vector<1x4x1xf32> to vector<1x4x4xf32>
    %469 = arith.mulf %468, %467 : vector<1x4x4xf32>
    %cst_184 = arith.constant dense<0.000000e+00> : vector<1x4xf32>
    %470 = vector.multi_reduction <add>, %469, %cst_184 [1] : vector<1x4x4xf32> to vector<1x4xf32>
    %471 = arith.mulf %470, %465 : vector<1x4xf32>
    %cst_185 = arith.constant dense<0.000000e+00> : vector<1xf32>
    %472 = vector.multi_reduction <add>, %471, %cst_185 [1] : vector<1x4xf32> to vector<1xf32>
    %473 = vector.shape_cast %472 : vector<1xf32> to vector<1x1xf32>
    %474 = arith.mulf %465, %459 : vector<1x4xf32>
    %cst_186 = arith.constant dense<0.000000e+00> : vector<1xf32>
    %475 = vector.multi_reduction <add>, %474, %cst_186 [1] : vector<1x4xf32> to vector<1xf32>
    %476 = vector.shape_cast %475 : vector<1xf32> to vector<1x1xf32>
    %477 = arith.addf %473, %476 : vector<1x1xf32>
    %478 = arith.mulf %477, %460 : vector<1x1xf32>
    %479 = arith.addf %432, %478 : vector<1x1xf32>
    %480 = vector.shape_cast %453 : vector<1x4xf32> to vector<1x4x1xf32>
    %481 = vector.shape_cast %306 : vector<4x4xf32> to vector<1x4x4xf32>
    %482 = vector.broadcast %480 : vector<1x4x1xf32> to vector<1x4x4xf32>
    %483 = arith.addf %482, %481 : vector<1x4x4xf32>
    %484 = vector.shape_cast %459 : vector<1x4xf32> to vector<1x1x4xf32>
    %485 = vector.broadcast %484 : vector<1x1x4xf32> to vector<1x4x4xf32>
    %486 = arith.addf %483, %485 : vector<1x4x4xf32>
    %cst_187 = arith.constant dense<0xFF800000> : vector<1x4xf32>
    %487 = vector.multi_reduction <maximumf>, %486, %cst_187 [1] : vector<1x4x4xf32> to vector<1x4xf32>
    %488 = vector.shape_cast %487 : vector<1x4xf32> to vector<1x1x4xf32>
    %489 = vector.shape_cast %488 : vector<1x1x4xf32> to vector<1x4xf32>
    %490 = vector.broadcast %488 : vector<1x1x4xf32> to vector<1x4x4xf32>
    %491 = arith.subf %486, %490 : vector<1x4x4xf32>
    %492 = math.exp %491 : vector<1x4x4xf32>
    %cst_188 = arith.constant dense<0.000000e+00> : vector<1x4xf32>
    %493 = vector.multi_reduction <add>, %492, %cst_188 [1] : vector<1x4x4xf32> to vector<1x4xf32>
    %494 = math.log %493 : vector<1x4xf32>
    %495 = arith.addf %489, %494 : vector<1x4xf32>
    %cst_189 = arith.constant 0.000000e+00 : f32
    %496 = vector.broadcast %cst_189 : f32 to vector<1x1xf32>
    %497 = arith.cmpf ogt, %460, %496 : vector<1x1xf32>
    %498 = vector.shape_cast %497 : vector<1x1xi1> to vector<1x1xi1>
    %499 = vector.broadcast %498 : vector<1x1xi1> to vector<1x4xi1>
    %500 = arith.select %499, %495, %453 : vector<1x4xi1>, vector<1x4xf32>
    %cst_190 = arith.constant 0.000000e+00 : f32
    %501 = vector.broadcast %cst_190 : f32 to vector<1x1xf32>
    %502 = arith.cmpf ogt, %460, %501 : vector<1x1xf32>
    %503 = vector.shape_cast %502 : vector<1x1xi1> to vector<1x1xi1>
    %504 = vector.broadcast %503 : vector<1x1xi1> to vector<1x4xi1>
    %505 = arith.select %504, %465, %458 : vector<1x4xi1>, vector<1x4xf32>
    %506 = vector.extract_strided_slice %296 {offsets = [2, 4], sizes = [1, 4], strides = [1, 1]} : vector<8x128xf32> to vector<1x4xf32>
    %507 = vector.extract_strided_slice %303 {offsets = [0, 5], sizes = [1, 1], strides = [1, 1]} : vector<1x16xf32> to vector<1x1xf32>
    %508 = vector.extract_strided_slice %301 {offsets = [0, 5], sizes = [1, 1], strides = [1, 1]} : vector<1x16xi32> to vector<1x1xi32>
    %509 = vector.broadcast %508 : vector<1x1xi32> to vector<1x4xi32>
    %510 = arith.cmpi eq, %509, %307 : vector<1x4xi32>
    %511 = arith.extui %510 : vector<1x4xi1> to vector<1x4xi32>
    %512 = arith.sitofp %511 : vector<1x4xi32> to vector<1x4xf32>
    %513 = vector.shape_cast %465 : vector<1x4xf32> to vector<1x4x1xf32>
    %514 = vector.shape_cast %306 : vector<4x4xf32> to vector<1x4x4xf32>
    %515 = vector.broadcast %513 : vector<1x4x1xf32> to vector<1x4x4xf32>
    %516 = arith.mulf %515, %514 : vector<1x4x4xf32>
    %cst_191 = arith.constant dense<0.000000e+00> : vector<1x4xf32>
    %517 = vector.multi_reduction <add>, %516, %cst_191 [1] : vector<1x4x4xf32> to vector<1x4xf32>
    %518 = arith.mulf %517, %512 : vector<1x4xf32>
    %cst_192 = arith.constant dense<0.000000e+00> : vector<1xf32>
    %519 = vector.multi_reduction <add>, %518, %cst_192 [1] : vector<1x4xf32> to vector<1xf32>
    %520 = vector.shape_cast %519 : vector<1xf32> to vector<1x1xf32>
    %521 = arith.mulf %512, %506 : vector<1x4xf32>
    %cst_193 = arith.constant dense<0.000000e+00> : vector<1xf32>
    %522 = vector.multi_reduction <add>, %521, %cst_193 [1] : vector<1x4xf32> to vector<1xf32>
    %523 = vector.shape_cast %522 : vector<1xf32> to vector<1x1xf32>
    %524 = arith.addf %520, %523 : vector<1x1xf32>
    %525 = arith.mulf %524, %507 : vector<1x1xf32>
    %526 = arith.addf %479, %525 : vector<1x1xf32>
    %527 = vector.shape_cast %500 : vector<1x4xf32> to vector<1x4x1xf32>
    %528 = vector.shape_cast %306 : vector<4x4xf32> to vector<1x4x4xf32>
    %529 = vector.broadcast %527 : vector<1x4x1xf32> to vector<1x4x4xf32>
    %530 = arith.addf %529, %528 : vector<1x4x4xf32>
    %531 = vector.shape_cast %506 : vector<1x4xf32> to vector<1x1x4xf32>
    %532 = vector.broadcast %531 : vector<1x1x4xf32> to vector<1x4x4xf32>
    %533 = arith.addf %530, %532 : vector<1x4x4xf32>
    %cst_194 = arith.constant dense<0xFF800000> : vector<1x4xf32>
    %534 = vector.multi_reduction <maximumf>, %533, %cst_194 [1] : vector<1x4x4xf32> to vector<1x4xf32>
    %535 = vector.shape_cast %534 : vector<1x4xf32> to vector<1x1x4xf32>
    %536 = vector.shape_cast %535 : vector<1x1x4xf32> to vector<1x4xf32>
    %537 = vector.broadcast %535 : vector<1x1x4xf32> to vector<1x4x4xf32>
    %538 = arith.subf %533, %537 : vector<1x4x4xf32>
    %539 = math.exp %538 : vector<1x4x4xf32>
    %cst_195 = arith.constant dense<0.000000e+00> : vector<1x4xf32>
    %540 = vector.multi_reduction <add>, %539, %cst_195 [1] : vector<1x4x4xf32> to vector<1x4xf32>
    %541 = math.log %540 : vector<1x4xf32>
    %542 = arith.addf %536, %541 : vector<1x4xf32>
    %cst_196 = arith.constant 0.000000e+00 : f32
    %543 = vector.broadcast %cst_196 : f32 to vector<1x1xf32>
    %544 = arith.cmpf ogt, %507, %543 : vector<1x1xf32>
    %545 = vector.shape_cast %544 : vector<1x1xi1> to vector<1x1xi1>
    %546 = vector.broadcast %545 : vector<1x1xi1> to vector<1x4xi1>
    %547 = arith.select %546, %542, %500 : vector<1x4xi1>, vector<1x4xf32>
    %cst_197 = arith.constant 0.000000e+00 : f32
    %548 = vector.broadcast %cst_197 : f32 to vector<1x1xf32>
    %549 = arith.cmpf ogt, %507, %548 : vector<1x1xf32>
    %550 = vector.shape_cast %549 : vector<1x1xi1> to vector<1x1xi1>
    %551 = vector.broadcast %550 : vector<1x1xi1> to vector<1x4xi1>
    %552 = arith.select %551, %512, %505 : vector<1x4xi1>, vector<1x4xf32>
    %553 = vector.extract_strided_slice %296 {offsets = [3, 0], sizes = [1, 4], strides = [1, 1]} : vector<8x128xf32> to vector<1x4xf32>
    %554 = vector.extract_strided_slice %303 {offsets = [0, 6], sizes = [1, 1], strides = [1, 1]} : vector<1x16xf32> to vector<1x1xf32>
    %555 = vector.extract_strided_slice %301 {offsets = [0, 6], sizes = [1, 1], strides = [1, 1]} : vector<1x16xi32> to vector<1x1xi32>
    %556 = vector.broadcast %555 : vector<1x1xi32> to vector<1x4xi32>
    %557 = arith.cmpi eq, %556, %307 : vector<1x4xi32>
    %558 = arith.extui %557 : vector<1x4xi1> to vector<1x4xi32>
    %559 = arith.sitofp %558 : vector<1x4xi32> to vector<1x4xf32>
    %560 = vector.shape_cast %512 : vector<1x4xf32> to vector<1x4x1xf32>
    %561 = vector.shape_cast %306 : vector<4x4xf32> to vector<1x4x4xf32>
    %562 = vector.broadcast %560 : vector<1x4x1xf32> to vector<1x4x4xf32>
    %563 = arith.mulf %562, %561 : vector<1x4x4xf32>
    %cst_198 = arith.constant dense<0.000000e+00> : vector<1x4xf32>
    %564 = vector.multi_reduction <add>, %563, %cst_198 [1] : vector<1x4x4xf32> to vector<1x4xf32>
    %565 = arith.mulf %564, %559 : vector<1x4xf32>
    %cst_199 = arith.constant dense<0.000000e+00> : vector<1xf32>
    %566 = vector.multi_reduction <add>, %565, %cst_199 [1] : vector<1x4xf32> to vector<1xf32>
    %567 = vector.shape_cast %566 : vector<1xf32> to vector<1x1xf32>
    %568 = arith.mulf %559, %553 : vector<1x4xf32>
    %cst_200 = arith.constant dense<0.000000e+00> : vector<1xf32>
    %569 = vector.multi_reduction <add>, %568, %cst_200 [1] : vector<1x4xf32> to vector<1xf32>
    %570 = vector.shape_cast %569 : vector<1xf32> to vector<1x1xf32>
    %571 = arith.addf %567, %570 : vector<1x1xf32>
    %572 = arith.mulf %571, %554 : vector<1x1xf32>
    %573 = arith.addf %526, %572 : vector<1x1xf32>
    %574 = vector.shape_cast %547 : vector<1x4xf32> to vector<1x4x1xf32>
    %575 = vector.shape_cast %306 : vector<4x4xf32> to vector<1x4x4xf32>
    %576 = vector.broadcast %574 : vector<1x4x1xf32> to vector<1x4x4xf32>
    %577 = arith.addf %576, %575 : vector<1x4x4xf32>
    %578 = vector.shape_cast %553 : vector<1x4xf32> to vector<1x1x4xf32>
    %579 = vector.broadcast %578 : vector<1x1x4xf32> to vector<1x4x4xf32>
    %580 = arith.addf %577, %579 : vector<1x4x4xf32>
    %cst_201 = arith.constant dense<0xFF800000> : vector<1x4xf32>
    %581 = vector.multi_reduction <maximumf>, %580, %cst_201 [1] : vector<1x4x4xf32> to vector<1x4xf32>
    %582 = vector.shape_cast %581 : vector<1x4xf32> to vector<1x1x4xf32>
    %583 = vector.shape_cast %582 : vector<1x1x4xf32> to vector<1x4xf32>
    %584 = vector.broadcast %582 : vector<1x1x4xf32> to vector<1x4x4xf32>
    %585 = arith.subf %580, %584 : vector<1x4x4xf32>
    %586 = math.exp %585 : vector<1x4x4xf32>
    %cst_202 = arith.constant dense<0.000000e+00> : vector<1x4xf32>
    %587 = vector.multi_reduction <add>, %586, %cst_202 [1] : vector<1x4x4xf32> to vector<1x4xf32>
    %588 = math.log %587 : vector<1x4xf32>
    %589 = arith.addf %583, %588 : vector<1x4xf32>
    %cst_203 = arith.constant 0.000000e+00 : f32
    %590 = vector.broadcast %cst_203 : f32 to vector<1x1xf32>
    %591 = arith.cmpf ogt, %554, %590 : vector<1x1xf32>
    %592 = vector.shape_cast %591 : vector<1x1xi1> to vector<1x1xi1>
    %593 = vector.broadcast %592 : vector<1x1xi1> to vector<1x4xi1>
    %594 = arith.select %593, %589, %547 : vector<1x4xi1>, vector<1x4xf32>
    %cst_204 = arith.constant 0.000000e+00 : f32
    %595 = vector.broadcast %cst_204 : f32 to vector<1x1xf32>
    %596 = arith.cmpf ogt, %554, %595 : vector<1x1xf32>
    %597 = vector.shape_cast %596 : vector<1x1xi1> to vector<1x1xi1>
    %598 = vector.broadcast %597 : vector<1x1xi1> to vector<1x4xi1>
    %599 = arith.select %598, %559, %552 : vector<1x4xi1>, vector<1x4xf32>
    %600 = vector.extract_strided_slice %296 {offsets = [3, 4], sizes = [1, 4], strides = [1, 1]} : vector<8x128xf32> to vector<1x4xf32>
    %601 = vector.extract_strided_slice %303 {offsets = [0, 7], sizes = [1, 1], strides = [1, 1]} : vector<1x16xf32> to vector<1x1xf32>
    %602 = vector.extract_strided_slice %301 {offsets = [0, 7], sizes = [1, 1], strides = [1, 1]} : vector<1x16xi32> to vector<1x1xi32>
    %603 = vector.broadcast %602 : vector<1x1xi32> to vector<1x4xi32>
    %604 = arith.cmpi eq, %603, %307 : vector<1x4xi32>
    %605 = arith.extui %604 : vector<1x4xi1> to vector<1x4xi32>
    %606 = arith.sitofp %605 : vector<1x4xi32> to vector<1x4xf32>
    %607 = vector.shape_cast %559 : vector<1x4xf32> to vector<1x4x1xf32>
    %608 = vector.shape_cast %306 : vector<4x4xf32> to vector<1x4x4xf32>
    %609 = vector.broadcast %607 : vector<1x4x1xf32> to vector<1x4x4xf32>
    %610 = arith.mulf %609, %608 : vector<1x4x4xf32>
    %cst_205 = arith.constant dense<0.000000e+00> : vector<1x4xf32>
    %611 = vector.multi_reduction <add>, %610, %cst_205 [1] : vector<1x4x4xf32> to vector<1x4xf32>
    %612 = arith.mulf %611, %606 : vector<1x4xf32>
    %cst_206 = arith.constant dense<0.000000e+00> : vector<1xf32>
    %613 = vector.multi_reduction <add>, %612, %cst_206 [1] : vector<1x4xf32> to vector<1xf32>
    %614 = vector.shape_cast %613 : vector<1xf32> to vector<1x1xf32>
    %615 = arith.mulf %606, %600 : vector<1x4xf32>
    %cst_207 = arith.constant dense<0.000000e+00> : vector<1xf32>
    %616 = vector.multi_reduction <add>, %615, %cst_207 [1] : vector<1x4xf32> to vector<1xf32>
    %617 = vector.shape_cast %616 : vector<1xf32> to vector<1x1xf32>
    %618 = arith.addf %614, %617 : vector<1x1xf32>
    %619 = arith.mulf %618, %601 : vector<1x1xf32>
    %620 = arith.addf %573, %619 : vector<1x1xf32>
    %621 = vector.shape_cast %594 : vector<1x4xf32> to vector<1x4x1xf32>
    %622 = vector.shape_cast %306 : vector<4x4xf32> to vector<1x4x4xf32>
    %623 = vector.broadcast %621 : vector<1x4x1xf32> to vector<1x4x4xf32>
    %624 = arith.addf %623, %622 : vector<1x4x4xf32>
    %625 = vector.shape_cast %600 : vector<1x4xf32> to vector<1x1x4xf32>
    %626 = vector.broadcast %625 : vector<1x1x4xf32> to vector<1x4x4xf32>
    %627 = arith.addf %624, %626 : vector<1x4x4xf32>
    %cst_208 = arith.constant dense<0xFF800000> : vector<1x4xf32>
    %628 = vector.multi_reduction <maximumf>, %627, %cst_208 [1] : vector<1x4x4xf32> to vector<1x4xf32>
    %629 = vector.shape_cast %628 : vector<1x4xf32> to vector<1x1x4xf32>
    %630 = vector.shape_cast %629 : vector<1x1x4xf32> to vector<1x4xf32>
    %631 = vector.broadcast %629 : vector<1x1x4xf32> to vector<1x4x4xf32>
    %632 = arith.subf %627, %631 : vector<1x4x4xf32>
    %633 = math.exp %632 : vector<1x4x4xf32>
    %cst_209 = arith.constant dense<0.000000e+00> : vector<1x4xf32>
    %634 = vector.multi_reduction <add>, %633, %cst_209 [1] : vector<1x4x4xf32> to vector<1x4xf32>
    %635 = math.log %634 : vector<1x4xf32>
    %636 = arith.addf %630, %635 : vector<1x4xf32>
    %cst_210 = arith.constant 0.000000e+00 : f32
    %637 = vector.broadcast %cst_210 : f32 to vector<1x1xf32>
    %638 = arith.cmpf ogt, %601, %637 : vector<1x1xf32>
    %639 = vector.shape_cast %638 : vector<1x1xi1> to vector<1x1xi1>
    %640 = vector.broadcast %639 : vector<1x1xi1> to vector<1x4xi1>
    %641 = arith.select %640, %636, %594 : vector<1x4xi1>, vector<1x4xf32>
    %cst_211 = arith.constant 0.000000e+00 : f32
    %642 = vector.broadcast %cst_211 : f32 to vector<1x1xf32>
    %643 = arith.cmpf ogt, %601, %642 : vector<1x1xf32>
    %644 = vector.shape_cast %643 : vector<1x1xi1> to vector<1x1xi1>
    %645 = vector.broadcast %644 : vector<1x1xi1> to vector<1x4xi1>
    %646 = arith.select %645, %606, %599 : vector<1x4xi1>, vector<1x4xf32>
    %647 = vector.extract_strided_slice %296 {offsets = [4, 0], sizes = [1, 4], strides = [1, 1]} : vector<8x128xf32> to vector<1x4xf32>
    %648 = vector.extract_strided_slice %303 {offsets = [0, 8], sizes = [1, 1], strides = [1, 1]} : vector<1x16xf32> to vector<1x1xf32>
    %649 = vector.extract_strided_slice %301 {offsets = [0, 8], sizes = [1, 1], strides = [1, 1]} : vector<1x16xi32> to vector<1x1xi32>
    %650 = vector.broadcast %649 : vector<1x1xi32> to vector<1x4xi32>
    %651 = arith.cmpi eq, %650, %307 : vector<1x4xi32>
    %652 = arith.extui %651 : vector<1x4xi1> to vector<1x4xi32>
    %653 = arith.sitofp %652 : vector<1x4xi32> to vector<1x4xf32>
    %654 = vector.shape_cast %606 : vector<1x4xf32> to vector<1x4x1xf32>
    %655 = vector.shape_cast %306 : vector<4x4xf32> to vector<1x4x4xf32>
    %656 = vector.broadcast %654 : vector<1x4x1xf32> to vector<1x4x4xf32>
    %657 = arith.mulf %656, %655 : vector<1x4x4xf32>
    %cst_212 = arith.constant dense<0.000000e+00> : vector<1x4xf32>
    %658 = vector.multi_reduction <add>, %657, %cst_212 [1] : vector<1x4x4xf32> to vector<1x4xf32>
    %659 = arith.mulf %658, %653 : vector<1x4xf32>
    %cst_213 = arith.constant dense<0.000000e+00> : vector<1xf32>
    %660 = vector.multi_reduction <add>, %659, %cst_213 [1] : vector<1x4xf32> to vector<1xf32>
    %661 = vector.shape_cast %660 : vector<1xf32> to vector<1x1xf32>
    %662 = arith.mulf %653, %647 : vector<1x4xf32>
    %cst_214 = arith.constant dense<0.000000e+00> : vector<1xf32>
    %663 = vector.multi_reduction <add>, %662, %cst_214 [1] : vector<1x4xf32> to vector<1xf32>
    %664 = vector.shape_cast %663 : vector<1xf32> to vector<1x1xf32>
    %665 = arith.addf %661, %664 : vector<1x1xf32>
    %666 = arith.mulf %665, %648 : vector<1x1xf32>
    %667 = arith.addf %620, %666 : vector<1x1xf32>
    %668 = vector.shape_cast %641 : vector<1x4xf32> to vector<1x4x1xf32>
    %669 = vector.shape_cast %306 : vector<4x4xf32> to vector<1x4x4xf32>
    %670 = vector.broadcast %668 : vector<1x4x1xf32> to vector<1x4x4xf32>
    %671 = arith.addf %670, %669 : vector<1x4x4xf32>
    %672 = vector.shape_cast %647 : vector<1x4xf32> to vector<1x1x4xf32>
    %673 = vector.broadcast %672 : vector<1x1x4xf32> to vector<1x4x4xf32>
    %674 = arith.addf %671, %673 : vector<1x4x4xf32>
    %cst_215 = arith.constant dense<0xFF800000> : vector<1x4xf32>
    %675 = vector.multi_reduction <maximumf>, %674, %cst_215 [1] : vector<1x4x4xf32> to vector<1x4xf32>
    %676 = vector.shape_cast %675 : vector<1x4xf32> to vector<1x1x4xf32>
    %677 = vector.shape_cast %676 : vector<1x1x4xf32> to vector<1x4xf32>
    %678 = vector.broadcast %676 : vector<1x1x4xf32> to vector<1x4x4xf32>
    %679 = arith.subf %674, %678 : vector<1x4x4xf32>
    %680 = math.exp %679 : vector<1x4x4xf32>
    %cst_216 = arith.constant dense<0.000000e+00> : vector<1x4xf32>
    %681 = vector.multi_reduction <add>, %680, %cst_216 [1] : vector<1x4x4xf32> to vector<1x4xf32>
    %682 = math.log %681 : vector<1x4xf32>
    %683 = arith.addf %677, %682 : vector<1x4xf32>
    %cst_217 = arith.constant 0.000000e+00 : f32
    %684 = vector.broadcast %cst_217 : f32 to vector<1x1xf32>
    %685 = arith.cmpf ogt, %648, %684 : vector<1x1xf32>
    %686 = vector.shape_cast %685 : vector<1x1xi1> to vector<1x1xi1>
    %687 = vector.broadcast %686 : vector<1x1xi1> to vector<1x4xi1>
    %688 = arith.select %687, %683, %641 : vector<1x4xi1>, vector<1x4xf32>
    %cst_218 = arith.constant 0.000000e+00 : f32
    %689 = vector.broadcast %cst_218 : f32 to vector<1x1xf32>
    %690 = arith.cmpf ogt, %648, %689 : vector<1x1xf32>
    %691 = vector.shape_cast %690 : vector<1x1xi1> to vector<1x1xi1>
    %692 = vector.broadcast %691 : vector<1x1xi1> to vector<1x4xi1>
    %693 = arith.select %692, %653, %646 : vector<1x4xi1>, vector<1x4xf32>
    %694 = vector.extract_strided_slice %296 {offsets = [4, 4], sizes = [1, 4], strides = [1, 1]} : vector<8x128xf32> to vector<1x4xf32>
    %695 = vector.extract_strided_slice %303 {offsets = [0, 9], sizes = [1, 1], strides = [1, 1]} : vector<1x16xf32> to vector<1x1xf32>
    %696 = vector.extract_strided_slice %301 {offsets = [0, 9], sizes = [1, 1], strides = [1, 1]} : vector<1x16xi32> to vector<1x1xi32>
    %697 = vector.broadcast %696 : vector<1x1xi32> to vector<1x4xi32>
    %698 = arith.cmpi eq, %697, %307 : vector<1x4xi32>
    %699 = arith.extui %698 : vector<1x4xi1> to vector<1x4xi32>
    %700 = arith.sitofp %699 : vector<1x4xi32> to vector<1x4xf32>
    %701 = vector.shape_cast %653 : vector<1x4xf32> to vector<1x4x1xf32>
    %702 = vector.shape_cast %306 : vector<4x4xf32> to vector<1x4x4xf32>
    %703 = vector.broadcast %701 : vector<1x4x1xf32> to vector<1x4x4xf32>
    %704 = arith.mulf %703, %702 : vector<1x4x4xf32>
    %cst_219 = arith.constant dense<0.000000e+00> : vector<1x4xf32>
    %705 = vector.multi_reduction <add>, %704, %cst_219 [1] : vector<1x4x4xf32> to vector<1x4xf32>
    %706 = arith.mulf %705, %700 : vector<1x4xf32>
    %cst_220 = arith.constant dense<0.000000e+00> : vector<1xf32>
    %707 = vector.multi_reduction <add>, %706, %cst_220 [1] : vector<1x4xf32> to vector<1xf32>
    %708 = vector.shape_cast %707 : vector<1xf32> to vector<1x1xf32>
    %709 = arith.mulf %700, %694 : vector<1x4xf32>
    %cst_221 = arith.constant dense<0.000000e+00> : vector<1xf32>
    %710 = vector.multi_reduction <add>, %709, %cst_221 [1] : vector<1x4xf32> to vector<1xf32>
    %711 = vector.shape_cast %710 : vector<1xf32> to vector<1x1xf32>
    %712 = arith.addf %708, %711 : vector<1x1xf32>
    %713 = arith.mulf %712, %695 : vector<1x1xf32>
    %714 = arith.addf %667, %713 : vector<1x1xf32>
    %715 = vector.shape_cast %688 : vector<1x4xf32> to vector<1x4x1xf32>
    %716 = vector.shape_cast %306 : vector<4x4xf32> to vector<1x4x4xf32>
    %717 = vector.broadcast %715 : vector<1x4x1xf32> to vector<1x4x4xf32>
    %718 = arith.addf %717, %716 : vector<1x4x4xf32>
    %719 = vector.shape_cast %694 : vector<1x4xf32> to vector<1x1x4xf32>
    %720 = vector.broadcast %719 : vector<1x1x4xf32> to vector<1x4x4xf32>
    %721 = arith.addf %718, %720 : vector<1x4x4xf32>
    %cst_222 = arith.constant dense<0xFF800000> : vector<1x4xf32>
    %722 = vector.multi_reduction <maximumf>, %721, %cst_222 [1] : vector<1x4x4xf32> to vector<1x4xf32>
    %723 = vector.shape_cast %722 : vector<1x4xf32> to vector<1x1x4xf32>
    %724 = vector.shape_cast %723 : vector<1x1x4xf32> to vector<1x4xf32>
    %725 = vector.broadcast %723 : vector<1x1x4xf32> to vector<1x4x4xf32>
    %726 = arith.subf %721, %725 : vector<1x4x4xf32>
    %727 = math.exp %726 : vector<1x4x4xf32>
    %cst_223 = arith.constant dense<0.000000e+00> : vector<1x4xf32>
    %728 = vector.multi_reduction <add>, %727, %cst_223 [1] : vector<1x4x4xf32> to vector<1x4xf32>
    %729 = math.log %728 : vector<1x4xf32>
    %730 = arith.addf %724, %729 : vector<1x4xf32>
    %cst_224 = arith.constant 0.000000e+00 : f32
    %731 = vector.broadcast %cst_224 : f32 to vector<1x1xf32>
    %732 = arith.cmpf ogt, %695, %731 : vector<1x1xf32>
    %733 = vector.shape_cast %732 : vector<1x1xi1> to vector<1x1xi1>
    %734 = vector.broadcast %733 : vector<1x1xi1> to vector<1x4xi1>
    %735 = arith.select %734, %730, %688 : vector<1x4xi1>, vector<1x4xf32>
    %cst_225 = arith.constant 0.000000e+00 : f32
    %736 = vector.broadcast %cst_225 : f32 to vector<1x1xf32>
    %737 = arith.cmpf ogt, %695, %736 : vector<1x1xf32>
    %738 = vector.shape_cast %737 : vector<1x1xi1> to vector<1x1xi1>
    %739 = vector.broadcast %738 : vector<1x1xi1> to vector<1x4xi1>
    %740 = arith.select %739, %700, %693 : vector<1x4xi1>, vector<1x4xf32>
    %741 = vector.extract_strided_slice %296 {offsets = [5, 0], sizes = [1, 4], strides = [1, 1]} : vector<8x128xf32> to vector<1x4xf32>
    %742 = vector.extract_strided_slice %303 {offsets = [0, 10], sizes = [1, 1], strides = [1, 1]} : vector<1x16xf32> to vector<1x1xf32>
    %743 = vector.extract_strided_slice %301 {offsets = [0, 10], sizes = [1, 1], strides = [1, 1]} : vector<1x16xi32> to vector<1x1xi32>
    %744 = vector.broadcast %743 : vector<1x1xi32> to vector<1x4xi32>
    %745 = arith.cmpi eq, %744, %307 : vector<1x4xi32>
    %746 = arith.extui %745 : vector<1x4xi1> to vector<1x4xi32>
    %747 = arith.sitofp %746 : vector<1x4xi32> to vector<1x4xf32>
    %748 = vector.shape_cast %700 : vector<1x4xf32> to vector<1x4x1xf32>
    %749 = vector.shape_cast %306 : vector<4x4xf32> to vector<1x4x4xf32>
    %750 = vector.broadcast %748 : vector<1x4x1xf32> to vector<1x4x4xf32>
    %751 = arith.mulf %750, %749 : vector<1x4x4xf32>
    %cst_226 = arith.constant dense<0.000000e+00> : vector<1x4xf32>
    %752 = vector.multi_reduction <add>, %751, %cst_226 [1] : vector<1x4x4xf32> to vector<1x4xf32>
    %753 = arith.mulf %752, %747 : vector<1x4xf32>
    %cst_227 = arith.constant dense<0.000000e+00> : vector<1xf32>
    %754 = vector.multi_reduction <add>, %753, %cst_227 [1] : vector<1x4xf32> to vector<1xf32>
    %755 = vector.shape_cast %754 : vector<1xf32> to vector<1x1xf32>
    %756 = arith.mulf %747, %741 : vector<1x4xf32>
    %cst_228 = arith.constant dense<0.000000e+00> : vector<1xf32>
    %757 = vector.multi_reduction <add>, %756, %cst_228 [1] : vector<1x4xf32> to vector<1xf32>
    %758 = vector.shape_cast %757 : vector<1xf32> to vector<1x1xf32>
    %759 = arith.addf %755, %758 : vector<1x1xf32>
    %760 = arith.mulf %759, %742 : vector<1x1xf32>
    %761 = arith.addf %714, %760 : vector<1x1xf32>
    %762 = vector.shape_cast %735 : vector<1x4xf32> to vector<1x4x1xf32>
    %763 = vector.shape_cast %306 : vector<4x4xf32> to vector<1x4x4xf32>
    %764 = vector.broadcast %762 : vector<1x4x1xf32> to vector<1x4x4xf32>
    %765 = arith.addf %764, %763 : vector<1x4x4xf32>
    %766 = vector.shape_cast %741 : vector<1x4xf32> to vector<1x1x4xf32>
    %767 = vector.broadcast %766 : vector<1x1x4xf32> to vector<1x4x4xf32>
    %768 = arith.addf %765, %767 : vector<1x4x4xf32>
    %cst_229 = arith.constant dense<0xFF800000> : vector<1x4xf32>
    %769 = vector.multi_reduction <maximumf>, %768, %cst_229 [1] : vector<1x4x4xf32> to vector<1x4xf32>
    %770 = vector.shape_cast %769 : vector<1x4xf32> to vector<1x1x4xf32>
    %771 = vector.shape_cast %770 : vector<1x1x4xf32> to vector<1x4xf32>
    %772 = vector.broadcast %770 : vector<1x1x4xf32> to vector<1x4x4xf32>
    %773 = arith.subf %768, %772 : vector<1x4x4xf32>
    %774 = math.exp %773 : vector<1x4x4xf32>
    %cst_230 = arith.constant dense<0.000000e+00> : vector<1x4xf32>
    %775 = vector.multi_reduction <add>, %774, %cst_230 [1] : vector<1x4x4xf32> to vector<1x4xf32>
    %776 = math.log %775 : vector<1x4xf32>
    %777 = arith.addf %771, %776 : vector<1x4xf32>
    %cst_231 = arith.constant 0.000000e+00 : f32
    %778 = vector.broadcast %cst_231 : f32 to vector<1x1xf32>
    %779 = arith.cmpf ogt, %742, %778 : vector<1x1xf32>
    %780 = vector.shape_cast %779 : vector<1x1xi1> to vector<1x1xi1>
    %781 = vector.broadcast %780 : vector<1x1xi1> to vector<1x4xi1>
    %782 = arith.select %781, %777, %735 : vector<1x4xi1>, vector<1x4xf32>
    %cst_232 = arith.constant 0.000000e+00 : f32
    %783 = vector.broadcast %cst_232 : f32 to vector<1x1xf32>
    %784 = arith.cmpf ogt, %742, %783 : vector<1x1xf32>
    %785 = vector.shape_cast %784 : vector<1x1xi1> to vector<1x1xi1>
    %786 = vector.broadcast %785 : vector<1x1xi1> to vector<1x4xi1>
    %787 = arith.select %786, %747, %740 : vector<1x4xi1>, vector<1x4xf32>
    %788 = vector.extract_strided_slice %296 {offsets = [5, 4], sizes = [1, 4], strides = [1, 1]} : vector<8x128xf32> to vector<1x4xf32>
    %789 = vector.extract_strided_slice %303 {offsets = [0, 11], sizes = [1, 1], strides = [1, 1]} : vector<1x16xf32> to vector<1x1xf32>
    %790 = vector.extract_strided_slice %301 {offsets = [0, 11], sizes = [1, 1], strides = [1, 1]} : vector<1x16xi32> to vector<1x1xi32>
    %791 = vector.broadcast %790 : vector<1x1xi32> to vector<1x4xi32>
    %792 = arith.cmpi eq, %791, %307 : vector<1x4xi32>
    %793 = arith.extui %792 : vector<1x4xi1> to vector<1x4xi32>
    %794 = arith.sitofp %793 : vector<1x4xi32> to vector<1x4xf32>
    %795 = vector.shape_cast %747 : vector<1x4xf32> to vector<1x4x1xf32>
    %796 = vector.shape_cast %306 : vector<4x4xf32> to vector<1x4x4xf32>
    %797 = vector.broadcast %795 : vector<1x4x1xf32> to vector<1x4x4xf32>
    %798 = arith.mulf %797, %796 : vector<1x4x4xf32>
    %cst_233 = arith.constant dense<0.000000e+00> : vector<1x4xf32>
    %799 = vector.multi_reduction <add>, %798, %cst_233 [1] : vector<1x4x4xf32> to vector<1x4xf32>
    %800 = arith.mulf %799, %794 : vector<1x4xf32>
    %cst_234 = arith.constant dense<0.000000e+00> : vector<1xf32>
    %801 = vector.multi_reduction <add>, %800, %cst_234 [1] : vector<1x4xf32> to vector<1xf32>
    %802 = vector.shape_cast %801 : vector<1xf32> to vector<1x1xf32>
    %803 = arith.mulf %794, %788 : vector<1x4xf32>
    %cst_235 = arith.constant dense<0.000000e+00> : vector<1xf32>
    %804 = vector.multi_reduction <add>, %803, %cst_235 [1] : vector<1x4xf32> to vector<1xf32>
    %805 = vector.shape_cast %804 : vector<1xf32> to vector<1x1xf32>
    %806 = arith.addf %802, %805 : vector<1x1xf32>
    %807 = arith.mulf %806, %789 : vector<1x1xf32>
    %808 = arith.addf %761, %807 : vector<1x1xf32>
    %809 = vector.shape_cast %782 : vector<1x4xf32> to vector<1x4x1xf32>
    %810 = vector.shape_cast %306 : vector<4x4xf32> to vector<1x4x4xf32>
    %811 = vector.broadcast %809 : vector<1x4x1xf32> to vector<1x4x4xf32>
    %812 = arith.addf %811, %810 : vector<1x4x4xf32>
    %813 = vector.shape_cast %788 : vector<1x4xf32> to vector<1x1x4xf32>
    %814 = vector.broadcast %813 : vector<1x1x4xf32> to vector<1x4x4xf32>
    %815 = arith.addf %812, %814 : vector<1x4x4xf32>
    %cst_236 = arith.constant dense<0xFF800000> : vector<1x4xf32>
    %816 = vector.multi_reduction <maximumf>, %815, %cst_236 [1] : vector<1x4x4xf32> to vector<1x4xf32>
    %817 = vector.shape_cast %816 : vector<1x4xf32> to vector<1x1x4xf32>
    %818 = vector.shape_cast %817 : vector<1x1x4xf32> to vector<1x4xf32>
    %819 = vector.broadcast %817 : vector<1x1x4xf32> to vector<1x4x4xf32>
    %820 = arith.subf %815, %819 : vector<1x4x4xf32>
    %821 = math.exp %820 : vector<1x4x4xf32>
    %cst_237 = arith.constant dense<0.000000e+00> : vector<1x4xf32>
    %822 = vector.multi_reduction <add>, %821, %cst_237 [1] : vector<1x4x4xf32> to vector<1x4xf32>
    %823 = math.log %822 : vector<1x4xf32>
    %824 = arith.addf %818, %823 : vector<1x4xf32>
    %cst_238 = arith.constant 0.000000e+00 : f32
    %825 = vector.broadcast %cst_238 : f32 to vector<1x1xf32>
    %826 = arith.cmpf ogt, %789, %825 : vector<1x1xf32>
    %827 = vector.shape_cast %826 : vector<1x1xi1> to vector<1x1xi1>
    %828 = vector.broadcast %827 : vector<1x1xi1> to vector<1x4xi1>
    %829 = arith.select %828, %824, %782 : vector<1x4xi1>, vector<1x4xf32>
    %cst_239 = arith.constant 0.000000e+00 : f32
    %830 = vector.broadcast %cst_239 : f32 to vector<1x1xf32>
    %831 = arith.cmpf ogt, %789, %830 : vector<1x1xf32>
    %832 = vector.shape_cast %831 : vector<1x1xi1> to vector<1x1xi1>
    %833 = vector.broadcast %832 : vector<1x1xi1> to vector<1x4xi1>
    %834 = arith.select %833, %794, %787 : vector<1x4xi1>, vector<1x4xf32>
    %835 = vector.extract_strided_slice %296 {offsets = [6, 0], sizes = [1, 4], strides = [1, 1]} : vector<8x128xf32> to vector<1x4xf32>
    %836 = vector.extract_strided_slice %303 {offsets = [0, 12], sizes = [1, 1], strides = [1, 1]} : vector<1x16xf32> to vector<1x1xf32>
    %837 = vector.extract_strided_slice %301 {offsets = [0, 12], sizes = [1, 1], strides = [1, 1]} : vector<1x16xi32> to vector<1x1xi32>
    %838 = vector.broadcast %837 : vector<1x1xi32> to vector<1x4xi32>
    %839 = arith.cmpi eq, %838, %307 : vector<1x4xi32>
    %840 = arith.extui %839 : vector<1x4xi1> to vector<1x4xi32>
    %841 = arith.sitofp %840 : vector<1x4xi32> to vector<1x4xf32>
    %842 = vector.shape_cast %794 : vector<1x4xf32> to vector<1x4x1xf32>
    %843 = vector.shape_cast %306 : vector<4x4xf32> to vector<1x4x4xf32>
    %844 = vector.broadcast %842 : vector<1x4x1xf32> to vector<1x4x4xf32>
    %845 = arith.mulf %844, %843 : vector<1x4x4xf32>
    %cst_240 = arith.constant dense<0.000000e+00> : vector<1x4xf32>
    %846 = vector.multi_reduction <add>, %845, %cst_240 [1] : vector<1x4x4xf32> to vector<1x4xf32>
    %847 = arith.mulf %846, %841 : vector<1x4xf32>
    %cst_241 = arith.constant dense<0.000000e+00> : vector<1xf32>
    %848 = vector.multi_reduction <add>, %847, %cst_241 [1] : vector<1x4xf32> to vector<1xf32>
    %849 = vector.shape_cast %848 : vector<1xf32> to vector<1x1xf32>
    %850 = arith.mulf %841, %835 : vector<1x4xf32>
    %cst_242 = arith.constant dense<0.000000e+00> : vector<1xf32>
    %851 = vector.multi_reduction <add>, %850, %cst_242 [1] : vector<1x4xf32> to vector<1xf32>
    %852 = vector.shape_cast %851 : vector<1xf32> to vector<1x1xf32>
    %853 = arith.addf %849, %852 : vector<1x1xf32>
    %854 = arith.mulf %853, %836 : vector<1x1xf32>
    %855 = arith.addf %808, %854 : vector<1x1xf32>
    %856 = vector.shape_cast %829 : vector<1x4xf32> to vector<1x4x1xf32>
    %857 = vector.shape_cast %306 : vector<4x4xf32> to vector<1x4x4xf32>
    %858 = vector.broadcast %856 : vector<1x4x1xf32> to vector<1x4x4xf32>
    %859 = arith.addf %858, %857 : vector<1x4x4xf32>
    %860 = vector.shape_cast %835 : vector<1x4xf32> to vector<1x1x4xf32>
    %861 = vector.broadcast %860 : vector<1x1x4xf32> to vector<1x4x4xf32>
    %862 = arith.addf %859, %861 : vector<1x4x4xf32>
    %cst_243 = arith.constant dense<0xFF800000> : vector<1x4xf32>
    %863 = vector.multi_reduction <maximumf>, %862, %cst_243 [1] : vector<1x4x4xf32> to vector<1x4xf32>
    %864 = vector.shape_cast %863 : vector<1x4xf32> to vector<1x1x4xf32>
    %865 = vector.shape_cast %864 : vector<1x1x4xf32> to vector<1x4xf32>
    %866 = vector.broadcast %864 : vector<1x1x4xf32> to vector<1x4x4xf32>
    %867 = arith.subf %862, %866 : vector<1x4x4xf32>
    %868 = math.exp %867 : vector<1x4x4xf32>
    %cst_244 = arith.constant dense<0.000000e+00> : vector<1x4xf32>
    %869 = vector.multi_reduction <add>, %868, %cst_244 [1] : vector<1x4x4xf32> to vector<1x4xf32>
    %870 = math.log %869 : vector<1x4xf32>
    %871 = arith.addf %865, %870 : vector<1x4xf32>
    %cst_245 = arith.constant 0.000000e+00 : f32
    %872 = vector.broadcast %cst_245 : f32 to vector<1x1xf32>
    %873 = arith.cmpf ogt, %836, %872 : vector<1x1xf32>
    %874 = vector.shape_cast %873 : vector<1x1xi1> to vector<1x1xi1>
    %875 = vector.broadcast %874 : vector<1x1xi1> to vector<1x4xi1>
    %876 = arith.select %875, %871, %829 : vector<1x4xi1>, vector<1x4xf32>
    %cst_246 = arith.constant 0.000000e+00 : f32
    %877 = vector.broadcast %cst_246 : f32 to vector<1x1xf32>
    %878 = arith.cmpf ogt, %836, %877 : vector<1x1xf32>
    %879 = vector.shape_cast %878 : vector<1x1xi1> to vector<1x1xi1>
    %880 = vector.broadcast %879 : vector<1x1xi1> to vector<1x4xi1>
    %881 = arith.select %880, %841, %834 : vector<1x4xi1>, vector<1x4xf32>
    %882 = vector.extract_strided_slice %296 {offsets = [6, 4], sizes = [1, 4], strides = [1, 1]} : vector<8x128xf32> to vector<1x4xf32>
    %883 = vector.extract_strided_slice %303 {offsets = [0, 13], sizes = [1, 1], strides = [1, 1]} : vector<1x16xf32> to vector<1x1xf32>
    %884 = vector.extract_strided_slice %301 {offsets = [0, 13], sizes = [1, 1], strides = [1, 1]} : vector<1x16xi32> to vector<1x1xi32>
    %885 = vector.broadcast %884 : vector<1x1xi32> to vector<1x4xi32>
    %886 = arith.cmpi eq, %885, %307 : vector<1x4xi32>
    %887 = arith.extui %886 : vector<1x4xi1> to vector<1x4xi32>
    %888 = arith.sitofp %887 : vector<1x4xi32> to vector<1x4xf32>
    %889 = vector.shape_cast %841 : vector<1x4xf32> to vector<1x4x1xf32>
    %890 = vector.shape_cast %306 : vector<4x4xf32> to vector<1x4x4xf32>
    %891 = vector.broadcast %889 : vector<1x4x1xf32> to vector<1x4x4xf32>
    %892 = arith.mulf %891, %890 : vector<1x4x4xf32>
    %cst_247 = arith.constant dense<0.000000e+00> : vector<1x4xf32>
    %893 = vector.multi_reduction <add>, %892, %cst_247 [1] : vector<1x4x4xf32> to vector<1x4xf32>
    %894 = arith.mulf %893, %888 : vector<1x4xf32>
    %cst_248 = arith.constant dense<0.000000e+00> : vector<1xf32>
    %895 = vector.multi_reduction <add>, %894, %cst_248 [1] : vector<1x4xf32> to vector<1xf32>
    %896 = vector.shape_cast %895 : vector<1xf32> to vector<1x1xf32>
    %897 = arith.mulf %888, %882 : vector<1x4xf32>
    %cst_249 = arith.constant dense<0.000000e+00> : vector<1xf32>
    %898 = vector.multi_reduction <add>, %897, %cst_249 [1] : vector<1x4xf32> to vector<1xf32>
    %899 = vector.shape_cast %898 : vector<1xf32> to vector<1x1xf32>
    %900 = arith.addf %896, %899 : vector<1x1xf32>
    %901 = arith.mulf %900, %883 : vector<1x1xf32>
    %902 = arith.addf %855, %901 : vector<1x1xf32>
    %903 = vector.shape_cast %876 : vector<1x4xf32> to vector<1x4x1xf32>
    %904 = vector.shape_cast %306 : vector<4x4xf32> to vector<1x4x4xf32>
    %905 = vector.broadcast %903 : vector<1x4x1xf32> to vector<1x4x4xf32>
    %906 = arith.addf %905, %904 : vector<1x4x4xf32>
    %907 = vector.shape_cast %882 : vector<1x4xf32> to vector<1x1x4xf32>
    %908 = vector.broadcast %907 : vector<1x1x4xf32> to vector<1x4x4xf32>
    %909 = arith.addf %906, %908 : vector<1x4x4xf32>
    %cst_250 = arith.constant dense<0xFF800000> : vector<1x4xf32>
    %910 = vector.multi_reduction <maximumf>, %909, %cst_250 [1] : vector<1x4x4xf32> to vector<1x4xf32>
    %911 = vector.shape_cast %910 : vector<1x4xf32> to vector<1x1x4xf32>
    %912 = vector.shape_cast %911 : vector<1x1x4xf32> to vector<1x4xf32>
    %913 = vector.broadcast %911 : vector<1x1x4xf32> to vector<1x4x4xf32>
    %914 = arith.subf %909, %913 : vector<1x4x4xf32>
    %915 = math.exp %914 : vector<1x4x4xf32>
    %cst_251 = arith.constant dense<0.000000e+00> : vector<1x4xf32>
    %916 = vector.multi_reduction <add>, %915, %cst_251 [1] : vector<1x4x4xf32> to vector<1x4xf32>
    %917 = math.log %916 : vector<1x4xf32>
    %918 = arith.addf %912, %917 : vector<1x4xf32>
    %cst_252 = arith.constant 0.000000e+00 : f32
    %919 = vector.broadcast %cst_252 : f32 to vector<1x1xf32>
    %920 = arith.cmpf ogt, %883, %919 : vector<1x1xf32>
    %921 = vector.shape_cast %920 : vector<1x1xi1> to vector<1x1xi1>
    %922 = vector.broadcast %921 : vector<1x1xi1> to vector<1x4xi1>
    %923 = arith.select %922, %918, %876 : vector<1x4xi1>, vector<1x4xf32>
    %cst_253 = arith.constant 0.000000e+00 : f32
    %924 = vector.broadcast %cst_253 : f32 to vector<1x1xf32>
    %925 = arith.cmpf ogt, %883, %924 : vector<1x1xf32>
    %926 = vector.shape_cast %925 : vector<1x1xi1> to vector<1x1xi1>
    %927 = vector.broadcast %926 : vector<1x1xi1> to vector<1x4xi1>
    %928 = arith.select %927, %888, %881 : vector<1x4xi1>, vector<1x4xf32>
    %929 = vector.extract_strided_slice %296 {offsets = [7, 0], sizes = [1, 4], strides = [1, 1]} : vector<8x128xf32> to vector<1x4xf32>
    %930 = vector.extract_strided_slice %303 {offsets = [0, 14], sizes = [1, 1], strides = [1, 1]} : vector<1x16xf32> to vector<1x1xf32>
    %931 = vector.extract_strided_slice %301 {offsets = [0, 14], sizes = [1, 1], strides = [1, 1]} : vector<1x16xi32> to vector<1x1xi32>
    %932 = vector.broadcast %931 : vector<1x1xi32> to vector<1x4xi32>
    %933 = arith.cmpi eq, %932, %307 : vector<1x4xi32>
    %934 = arith.extui %933 : vector<1x4xi1> to vector<1x4xi32>
    %935 = arith.sitofp %934 : vector<1x4xi32> to vector<1x4xf32>
    %936 = vector.shape_cast %888 : vector<1x4xf32> to vector<1x4x1xf32>
    %937 = vector.shape_cast %306 : vector<4x4xf32> to vector<1x4x4xf32>
    %938 = vector.broadcast %936 : vector<1x4x1xf32> to vector<1x4x4xf32>
    %939 = arith.mulf %938, %937 : vector<1x4x4xf32>
    %cst_254 = arith.constant dense<0.000000e+00> : vector<1x4xf32>
    %940 = vector.multi_reduction <add>, %939, %cst_254 [1] : vector<1x4x4xf32> to vector<1x4xf32>
    %941 = arith.mulf %940, %935 : vector<1x4xf32>
    %cst_255 = arith.constant dense<0.000000e+00> : vector<1xf32>
    %942 = vector.multi_reduction <add>, %941, %cst_255 [1] : vector<1x4xf32> to vector<1xf32>
    %943 = vector.shape_cast %942 : vector<1xf32> to vector<1x1xf32>
    %944 = arith.mulf %935, %929 : vector<1x4xf32>
    %cst_256 = arith.constant dense<0.000000e+00> : vector<1xf32>
    %945 = vector.multi_reduction <add>, %944, %cst_256 [1] : vector<1x4xf32> to vector<1xf32>
    %946 = vector.shape_cast %945 : vector<1xf32> to vector<1x1xf32>
    %947 = arith.addf %943, %946 : vector<1x1xf32>
    %948 = arith.mulf %947, %930 : vector<1x1xf32>
    %949 = arith.addf %902, %948 : vector<1x1xf32>
    %950 = vector.shape_cast %923 : vector<1x4xf32> to vector<1x4x1xf32>
    %951 = vector.shape_cast %306 : vector<4x4xf32> to vector<1x4x4xf32>
    %952 = vector.broadcast %950 : vector<1x4x1xf32> to vector<1x4x4xf32>
    %953 = arith.addf %952, %951 : vector<1x4x4xf32>
    %954 = vector.shape_cast %929 : vector<1x4xf32> to vector<1x1x4xf32>
    %955 = vector.broadcast %954 : vector<1x1x4xf32> to vector<1x4x4xf32>
    %956 = arith.addf %953, %955 : vector<1x4x4xf32>
    %cst_257 = arith.constant dense<0xFF800000> : vector<1x4xf32>
    %957 = vector.multi_reduction <maximumf>, %956, %cst_257 [1] : vector<1x4x4xf32> to vector<1x4xf32>
    %958 = vector.shape_cast %957 : vector<1x4xf32> to vector<1x1x4xf32>
    %959 = vector.shape_cast %958 : vector<1x1x4xf32> to vector<1x4xf32>
    %960 = vector.broadcast %958 : vector<1x1x4xf32> to vector<1x4x4xf32>
    %961 = arith.subf %956, %960 : vector<1x4x4xf32>
    %962 = math.exp %961 : vector<1x4x4xf32>
    %cst_258 = arith.constant dense<0.000000e+00> : vector<1x4xf32>
    %963 = vector.multi_reduction <add>, %962, %cst_258 [1] : vector<1x4x4xf32> to vector<1x4xf32>
    %964 = math.log %963 : vector<1x4xf32>
    %965 = arith.addf %959, %964 : vector<1x4xf32>
    %cst_259 = arith.constant 0.000000e+00 : f32
    %966 = vector.broadcast %cst_259 : f32 to vector<1x1xf32>
    %967 = arith.cmpf ogt, %930, %966 : vector<1x1xf32>
    %968 = vector.shape_cast %967 : vector<1x1xi1> to vector<1x1xi1>
    %969 = vector.broadcast %968 : vector<1x1xi1> to vector<1x4xi1>
    %970 = arith.select %969, %965, %923 : vector<1x4xi1>, vector<1x4xf32>
    %cst_260 = arith.constant 0.000000e+00 : f32
    %971 = vector.broadcast %cst_260 : f32 to vector<1x1xf32>
    %972 = arith.cmpf ogt, %930, %971 : vector<1x1xf32>
    %973 = vector.shape_cast %972 : vector<1x1xi1> to vector<1x1xi1>
    %974 = vector.broadcast %973 : vector<1x1xi1> to vector<1x4xi1>
    %975 = arith.select %974, %935, %928 : vector<1x4xi1>, vector<1x4xf32>
    %976 = vector.extract_strided_slice %296 {offsets = [7, 4], sizes = [1, 4], strides = [1, 1]} : vector<8x128xf32> to vector<1x4xf32>
    %977 = vector.extract_strided_slice %303 {offsets = [0, 15], sizes = [1, 1], strides = [1, 1]} : vector<1x16xf32> to vector<1x1xf32>
    %978 = vector.extract_strided_slice %301 {offsets = [0, 15], sizes = [1, 1], strides = [1, 1]} : vector<1x16xi32> to vector<1x1xi32>
    %979 = vector.broadcast %978 : vector<1x1xi32> to vector<1x4xi32>
    %980 = arith.cmpi eq, %979, %307 : vector<1x4xi32>
    %981 = arith.extui %980 : vector<1x4xi1> to vector<1x4xi32>
    %982 = arith.sitofp %981 : vector<1x4xi32> to vector<1x4xf32>
    %983 = vector.shape_cast %935 : vector<1x4xf32> to vector<1x4x1xf32>
    %984 = vector.shape_cast %306 : vector<4x4xf32> to vector<1x4x4xf32>
    %985 = vector.broadcast %983 : vector<1x4x1xf32> to vector<1x4x4xf32>
    %986 = arith.mulf %985, %984 : vector<1x4x4xf32>
    %cst_261 = arith.constant dense<0.000000e+00> : vector<1x4xf32>
    %987 = vector.multi_reduction <add>, %986, %cst_261 [1] : vector<1x4x4xf32> to vector<1x4xf32>
    %988 = arith.mulf %987, %982 : vector<1x4xf32>
    %cst_262 = arith.constant dense<0.000000e+00> : vector<1xf32>
    %989 = vector.multi_reduction <add>, %988, %cst_262 [1] : vector<1x4xf32> to vector<1xf32>
    %990 = vector.shape_cast %989 : vector<1xf32> to vector<1x1xf32>
    %991 = arith.mulf %982, %976 : vector<1x4xf32>
    %cst_263 = arith.constant dense<0.000000e+00> : vector<1xf32>
    %992 = vector.multi_reduction <add>, %991, %cst_263 [1] : vector<1x4xf32> to vector<1xf32>
    %993 = vector.shape_cast %992 : vector<1xf32> to vector<1x1xf32>
    %994 = arith.addf %990, %993 : vector<1x1xf32>
    %995 = arith.mulf %994, %977 : vector<1x1xf32>
    %996 = arith.addf %949, %995 : vector<1x1xf32>
    %997 = vector.shape_cast %970 : vector<1x4xf32> to vector<1x4x1xf32>
    %998 = vector.shape_cast %306 : vector<4x4xf32> to vector<1x4x4xf32>
    %999 = vector.broadcast %997 : vector<1x4x1xf32> to vector<1x4x4xf32>
    %1000 = arith.addf %999, %998 : vector<1x4x4xf32>
    %1001 = vector.shape_cast %976 : vector<1x4xf32> to vector<1x1x4xf32>
    %1002 = vector.broadcast %1001 : vector<1x1x4xf32> to vector<1x4x4xf32>
    %1003 = arith.addf %1000, %1002 : vector<1x4x4xf32>
    %cst_264 = arith.constant dense<0xFF800000> : vector<1x4xf32>
    %1004 = vector.multi_reduction <maximumf>, %1003, %cst_264 [1] : vector<1x4x4xf32> to vector<1x4xf32>
    %1005 = vector.shape_cast %1004 : vector<1x4xf32> to vector<1x1x4xf32>
    %1006 = vector.shape_cast %1005 : vector<1x1x4xf32> to vector<1x4xf32>
    %1007 = vector.broadcast %1005 : vector<1x1x4xf32> to vector<1x4x4xf32>
    %1008 = arith.subf %1003, %1007 : vector<1x4x4xf32>
    %1009 = math.exp %1008 : vector<1x4x4xf32>
    %cst_265 = arith.constant dense<0.000000e+00> : vector<1x4xf32>
    %1010 = vector.multi_reduction <add>, %1009, %cst_265 [1] : vector<1x4x4xf32> to vector<1x4xf32>
    %1011 = math.log %1010 : vector<1x4xf32>
    %1012 = arith.addf %1006, %1011 : vector<1x4xf32>
    %cst_266 = arith.constant 0.000000e+00 : f32
    %1013 = vector.broadcast %cst_266 : f32 to vector<1x1xf32>
    %1014 = arith.cmpf ogt, %977, %1013 : vector<1x1xf32>
    %1015 = vector.shape_cast %1014 : vector<1x1xi1> to vector<1x1xi1>
    %1016 = vector.broadcast %1015 : vector<1x1xi1> to vector<1x4xi1>
    %1017 = arith.select %1016, %1012, %970 : vector<1x4xi1>, vector<1x4xf32>
    %cst_267 = arith.constant 0.000000e+00 : f32
    %1018 = vector.broadcast %cst_267 : f32 to vector<1x1xf32>
    %1019 = arith.cmpf ogt, %977, %1018 : vector<1x1xf32>
    %1020 = vector.shape_cast %1019 : vector<1x1xi1> to vector<1x1xi1>
    %1021 = vector.broadcast %1020 : vector<1x1xi1> to vector<1x4xi1>
    %1022 = arith.select %1021, %982, %975 : vector<1x4xi1>, vector<1x4xf32>
    %1023 = arith.mulf %1022, %305 : vector<1x4xf32>
    %cst_268 = arith.constant dense<0.000000e+00> : vector<1xf32>
    %1024 = vector.multi_reduction <add>, %1023, %cst_268 [1] : vector<1x4xf32> to vector<1xf32>
    %1025 = vector.shape_cast %1024 : vector<1xf32> to vector<1x1xf32>
    %1026 = arith.addf %996, %1025 : vector<1x1xf32>
    %1027 = arith.addf %1017, %305 : vector<1x4xf32>
    %cst_269 = arith.constant dense<0xFF800000> : vector<1xf32>
    %1028 = vector.multi_reduction <maximumf>, %1027, %cst_269 [1] : vector<1x4xf32> to vector<1xf32>
    %1029 = vector.shape_cast %1028 : vector<1xf32> to vector<1x1xf32>
    %1030 = vector.broadcast %1029 : vector<1x1xf32> to vector<1x4xf32>
    %1031 = arith.subf %1027, %1030 : vector<1x4xf32>
    %1032 = math.exp %1031 : vector<1x4xf32>
    %cst_270 = arith.constant dense<0.000000e+00> : vector<1xf32>
    %1033 = vector.multi_reduction <add>, %1032, %cst_270 [1] : vector<1x4xf32> to vector<1xf32>
    %1034 = vector.shape_cast %1033 : vector<1xf32> to vector<1x1xf32>
    %1035 = math.log %1034 : vector<1x1xf32>
    %1036 = arith.addf %1029, %1035 : vector<1x1xf32>
    %1037 = arith.subf %1026, %1036 : vector<1x1xf32>
    %1038 = vector.shape_cast %1037 : vector<1x1xf32> to vector<1x1xf32>
    %1039 = vector.broadcast %1038 : vector<1x1xf32> to vector<1x128xf32>
    %c0_271 = arith.constant 0 : index
    %c0_272 = arith.constant 0 : index
    %c0_273 = arith.constant 0 : index
    %1040 = vector.load %arg25[%c0_271, %c0_272, %c0_273] : memref<1x1x128xf32, #tpu.memory_space<vmem>>, vector<1x1x128xf32>
    %1041 = vector.shape_cast %1040 : vector<1x1x128xf32> to vector<1x128xf32>
    %1042 = vector.shape_cast %1039 : vector<1x128xf32> to vector<1x1x128xf32>
    tpu.vector_store %arg25[%c0_271, %c0_272, %c0_273], %1042 {strides = array<i32>} : memref<1x1x128xf32, #tpu.memory_space<vmem>>, vector<1x1x128xf32>,
    return
  }
  func.func @transform_0(%arg0: i32) -> (i32, i32, i32) {
    %c0_i32 = arith.constant 0 : i32
    %c0_i32_0 = arith.constant 0 : i32
    %c0_i32_1 = arith.constant 0 : i32
    return %arg0, %c0_i32, %c0_i32_0 : i32, i32, i32
  }
  func.func @transform_1(%arg0: i32) -> (i32, i32, i32) {
    %c0_i32 = arith.constant 0 : i32
    %c0_i32_0 = arith.constant 0 : i32
    %c0_i32_1 = arith.constant 0 : i32
    return %arg0, %c0_i32, %c0_i32_0 : i32, i32, i32
  }
  func.func @transform_2(%arg0: i32) -> (i32, i32, i32) {
    %c0_i32 = arith.constant 0 : i32
    %c0_i32_0 = arith.constant 0 : i32
    %c0_i32_1 = arith.constant 0 : i32
    return %arg0, %c0_i32, %c0_i32_0 : i32, i32, i32
  }
  func.func @transform_3(%arg0: i32) -> (i32, i32, i32) {
    %c0_i32 = arith.constant 0 : i32
    %c0_i32_0 = arith.constant 0 : i32
    %c0_i32_1 = arith.constant 0 : i32
    return %arg0, %c0_i32, %c0_i32_0 : i32, i32, i32
  }
  func.func @transform_4(%arg0: i32) -> (i32, i32) {
    %c0_i32 = arith.constant 0 : i32
    %c0_i32_0 = arith.constant 0 : i32
    %c0_i32_1 = arith.constant 0 : i32
    return %c0_i32, %c0_i32_0 : i32, i32
  }
  func.func @transform_5(%arg0: i32) -> (i32, i32) {
    %c0_i32 = arith.constant 0 : i32
    %c0_i32_0 = arith.constant 0 : i32
    %c0_i32_1 = arith.constant 0 : i32
    return %c0_i32, %c0_i32_0 : i32, i32
  }
  func.func @transform_6(%arg0: i32) -> (i32, i32, i32) {
    %c0_i32 = arith.constant 0 : i32
    %c0_i32_0 = arith.constant 0 : i32
    %c0_i32_1 = arith.constant 0 : i32
    %c0_i32_2 = arith.constant 0 : i32
    return %c0_i32, %c0_i32_0, %c0_i32_1 : i32, i32, i32
  }
  func.func @transform_7(%arg0: i32) -> (i32, i32, i32) {
    %c0_i32 = arith.constant 0 : i32
    %c0_i32_0 = arith.constant 0 : i32
    %c0_i32_1 = arith.constant 0 : i32
    %c0_i32_2 = arith.constant 0 : i32
    return %c0_i32, %c0_i32_0, %c0_i32_1 : i32, i32, i32
  }
  func.func @transform_8(%arg0: i32) -> (i32, i32, i32) {
    %c0_i32 = arith.constant 0 : i32
    %c0_i32_0 = arith.constant 0 : i32
    %c0_i32_1 = arith.constant 0 : i32
    %c0_i32_2 = arith.constant 0 : i32
    return %c0_i32, %c0_i32_0, %c0_i32_1 : i32, i32, i32
  }
  func.func @transform_9(%arg0: i32) -> (i32, i32, i32) {
    %c0_i32 = arith.constant 0 : i32
    %c0_i32_0 = arith.constant 0 : i32
    %c0_i32_1 = arith.constant 0 : i32
    %c0_i32_2 = arith.constant 0 : i32
    return %c0_i32, %c0_i32_0, %c0_i32_1 : i32, i32, i32
  }
  func.func @transform_10(%arg0: i32) -> (i32, i32, i32) {
    %c0_i32 = arith.constant 0 : i32
    %c0_i32_0 = arith.constant 0 : i32
    %c0_i32_1 = arith.constant 0 : i32
    %c0_i32_2 = arith.constant 0 : i32
    return %c0_i32, %c0_i32_0, %c0_i32_1 : i32, i32, i32
  }
  func.func @transform_11(%arg0: i32) -> (i32, i32, i32) {
    %c0_i32 = arith.constant 0 : i32
    %c0_i32_0 = arith.constant 0 : i32
    %c0_i32_1 = arith.constant 0 : i32
    %c0_i32_2 = arith.constant 0 : i32
    return %c0_i32, %c0_i32_0, %c0_i32_1 : i32, i32, i32
  }
  func.func @transform_12(%arg0: i32) -> (i32, i32, i32) {
    %c0_i32 = arith.constant 0 : i32
    %c0_i32_0 = arith.constant 0 : i32
    %c0_i32_1 = arith.constant 0 : i32
    %c0_i32_2 = arith.constant 0 : i32
    return %c0_i32, %c0_i32_0, %c0_i32_1 : i32, i32, i32
  }
  func.func @transform_13(%arg0: i32) -> (i32, i32, i32) {
    %c0_i32 = arith.constant 0 : i32
    %c0_i32_0 = arith.constant 0 : i32
    %c0_i32_1 = arith.constant 0 : i32
    %c0_i32_2 = arith.constant 0 : i32
    return %c0_i32, %c0_i32_0, %c0_i32_1 : i32, i32, i32
  }
  func.func @transform_14(%arg0: i32) -> (i32, i32, i32) {
    %c0_i32 = arith.constant 0 : i32
    %c0_i32_0 = arith.constant 0 : i32
    %c0_i32_1 = arith.constant 0 : i32
    %c0_i32_2 = arith.constant 0 : i32
    return %c0_i32, %c0_i32_0, %c0_i32_1 : i32, i32, i32
  }
  func.func @transform_15(%arg0: i32) -> (i32, i32, i32) {
    %c0_i32 = arith.constant 0 : i32
    %c0_i32_0 = arith.constant 0 : i32
    %c0_i32_1 = arith.constant 0 : i32
    %c0_i32_2 = arith.constant 0 : i32
    return %c0_i32, %c0_i32_0, %c0_i32_1 : i32, i32, i32
  }
  func.func @transform_16(%arg0: i32) -> (i32, i32, i32) {
    %c0_i32 = arith.constant 0 : i32
    %c0_i32_0 = arith.constant 0 : i32
    %c0_i32_1 = arith.constant 0 : i32
    %c0_i32_2 = arith.constant 0 : i32
    return %c0_i32, %c0_i32_0, %c0_i32_1 : i32, i32, i32
  }
  func.func @transform_17(%arg0: i32) -> (i32, i32, i32) {
    %c0_i32 = arith.constant 0 : i32
    %c0_i32_0 = arith.constant 0 : i32
    %c0_i32_1 = arith.constant 0 : i32
    %c0_i32_2 = arith.constant 0 : i32
    return %c0_i32, %c0_i32_0, %c0_i32_1 : i32, i32, i32
  }
  func.func @transform_18(%arg0: i32) -> (i32, i32) {
    %c0_i32 = arith.constant 0 : i32
    %c0_i32_0 = arith.constant 0 : i32
    %c0_i32_1 = arith.constant 0 : i32
    return %c0_i32, %c0_i32_0 : i32, i32
  }
  func.func @transform_19(%arg0: i32) -> (i32, i32) {
    %c0_i32 = arith.constant 0 : i32
    %c0_i32_0 = arith.constant 0 : i32
    %c0_i32_1 = arith.constant 0 : i32
    return %c0_i32, %c0_i32_0 : i32, i32
  }
  func.func @transform_20(%arg0: i32) -> (i32, i32) {
    %c0_i32 = arith.constant 0 : i32
    %c0_i32_0 = arith.constant 0 : i32
    %c0_i32_1 = arith.constant 0 : i32
    return %c0_i32, %c0_i32_0 : i32, i32
  }
  func.func @transform_21(%arg0: i32) -> (i32, i32) {
    %c0_i32 = arith.constant 0 : i32
    %c0_i32_0 = arith.constant 0 : i32
    %c0_i32_1 = arith.constant 0 : i32
    return %c0_i32, %c0_i32_0 : i32, i32
  }
  func.func @transform_22(%arg0: i32) -> (i32, i32) {
    %c0_i32 = arith.constant 0 : i32
    %c0_i32_0 = arith.constant 0 : i32
    %c0_i32_1 = arith.constant 0 : i32
    return %c0_i32, %c0_i32_0 : i32, i32
  }
  func.func @transform_23(%arg0: i32) -> (i32, i32, i32) {
    %c0_i32 = arith.constant 0 : i32
    %c0_i32_0 = arith.constant 0 : i32
    %c0_i32_1 = arith.constant 0 : i32
    return %arg0, %c0_i32, %c0_i32_0 : i32, i32, i32
  }
  func.func @transform_24(%arg0: i32) -> (i32, i32, i32) {
    %c0_i32 = arith.constant 0 : i32
    %c0_i32_0 = arith.constant 0 : i32
    %c0_i32_1 = arith.constant 0 : i32
    return %arg0, %c0_i32, %c0_i32_0 : i32, i32, i32
  }
}

</mosaic_0001>

<bundles_post_ra>
// kernel: bert_crf_forward.1
= control target key start
LH: loop header
LB: loop body
LE: loop exit
PB: predicated region body
PF: predicated region fallthrough
CT: control target
= control target key end

     0   :  { %s5097_s0 = inlined_call_operand.vmem [shape: f32[2,8,32], index: 0, kind: input, shape index: {}]   ;;  %s5098_s1 = inlined_call_operand.vmem [shape: f32[2,1,8], index: 1, kind: input, shape index: {}]   ;;  %s5099_s2 = inlined_call_operand.vmem [shape: s32[2,1,16], index: 2, kind: input, shape index: {}]   ;;  %s5100_s3 = inlined_call_operand.vmem [shape: f32[2,1,16], index: 3, kind: input, shape index: {}]   ;;  %s5101_s4 = inlined_call_operand.vmem [shape: f32[1,32], index: 4, kind: input, shape index: {}]   ;;  %s5102_s5 = inlined_call_operand.vmem [shape: f32[1,32], index: 5, kind: input, shape index: {}]   ;;  %s5103_s6 = inlined_call_operand.vmem [shape: f32[2,32,768], index: 6, kind: input, shape index: {}]   ;;  %s5104_s7 = inlined_call_operand.vmem [shape: f32[2,1,768], index: 7, kind: input, shape index: {}]   ;;  %s5105_s8 = inlined_call_operand.vmem [shape: f32[2,256,32], index: 8, kind: input, shape index: {}]   ;;  %s5106_s9 = inlined_call_operand.vmem [shape: f32[2,1,32], index: 9, kind: input, shape index: {}]   ;;  %s5107_s10 = inlined_call_operand.vmem [shape: f32[2,1,32], index: 10, kind: input, shape index: {}]   ;;  %s5108_s11 = inlined_call_operand.vmem [shape: f32[2,1,32], index: 11, kind: input, shape index: {}]   ;;  %s5109_s12 = inlined_call_operand.vmem [shape: f32[2,32,64], index: 12, kind: input, shape index: {}]   ;;  %s5110_s13 = inlined_call_operand.vmem [shape: f32[2,1,64], index: 13, kind: input, shape index: {}]   ;;  %s5111_s14 = inlined_call_operand.vmem [shape: f32[2,64,32], index: 14, kind: input, shape index: {}]   ;;  %s5112_s15 = inlined_call_operand.vmem [shape: f32[2,1,32], index: 15, kind: input, shape index: {}]   ;;  %s5113_s16 = inlined_call_operand.vmem [shape: f32[2,1,32], index: 16, kind: input, shape index: {}]   ;;  %s5114_s17 = inlined_call_operand.vmem [shape: f32[2,1,32], index: 17, kind: input, shape index: {}]   ;;  %s5115_s18 = inlined_call_operand.vmem [shape: f32[32,128], index: 18, kind: input, shape index: {}]   ;;  %s5116_s19 = inlined_call_operand.vmem [shape: f32[1,128], index: 19, kind: input, shape index: {}]   ;;  %s5117_s20 = inlined_call_operand.vmem [shape: f32[1,4], index: 20, kind: input, shape index: {}]   ;;  %s5118_s21 = inlined_call_operand.vmem [shape: f32[1,4], index: 21, kind: input, shape index: {}]   ;;  %s5119_s22 = inlined_call_operand.vmem [shape: f32[4,4], index: 22, kind: input, shape index: {}]   ;;  %s5120_s23 = inlined_call_operand.hbm [shape: f32[2,8,128], index: 23, kind: output, shape index: {0}]   ;;  %s5121_s24 = inlined_call_operand.vmem [shape: f32[2,1,128], index: 24, kind: output, shape index: {1}]  }
   0x1   :  { %5134 = sst [smem:[#allocation11_spill]] %s5097_s0 }
   0x2   :  { %5135 = sst [smem:[#allocation12_spill]] %s5098_s1 }
   0x3   :  { %5136 = sst [smem:[#allocation13_spill]] %s5099_s2 }
   0x4   :  { %5137 = sst [smem:[#allocation14_spill]] %s5100_s3 }
   0x5   :  { %5138 = sst [smem:[#allocation15_spill]] %s5101_s4 }
   0x6   :  { %5139 = sst [smem:[#allocation16_spill]] %s5102_s5 }
   0x7   :  { %5140 = sst [smem:[#allocation17_spill]] %s5103_s6 }
   0x8   :  { %5141 = sst [smem:[#allocation18_spill]] %s5104_s7 }
   0x9   :  { %5142 = sst [smem:[#allocation19_spill]] %s5105_s8 }
   0xa   :  { %5143 = sst [smem:[#allocation20_spill]] %s5106_s9 }
   0xb   :  { %5144 = sst [smem:[#allocation21_spill]] %s5120_s23 }
   0xc   :  { %5145 = sst [smem:[#allocation22_spill]] %s5121_s24 }
   0xd   :  { %30 = vsyncpa [#allocation3], 0 }
   0xe   :  { %32 = vsyncpa [#allocation3 + $0x1], 0  ;;  %s3819_s5 = smov 0   ;;  %s3821_s26 = smov 0  }
   0xf   :  { %s3823_s27 = smov 0   ;;  %s3825_s28 = smov 0  }
  0x10 LB: > { %5146 = sst [smem:[#allocation5_spill]] %s3647_s5  ;;  %s3840_s6 = sadd.s32 4294967295, %s3659_s28   ;;  %s3659_s28 = sphi %s3825_s28, %s5198_s28   ;;  %s3655_s27 = sphi %s3823_s27, %s5200_s27   ;;  %s3651_s26 = sphi %s3821_s26, %s5202_s26   ;;  %s3647_s5 = sphi %s3819_s5, %s5201_s5  }
  0x11   : > { %5147 = sst [smem:[#allocation6_spill]] %s3655_s27  ;;  %s3202_s2 = sadd.s32 4294967294, %s3659_s28  }
  0x12   : > { %5148 = sst [smem:[#allocation7_spill]] %s3659_s28  ;;  %s3844_s29 = sadd.s32 1, %s3659_s28  }
  0x13   : > { %5149 = sst [smem:[#allocation8_spill]] %s3844_s29  ;;  %s548_s0 = sadd.s32 1, %s3655_s27 }
  0x14   : > { %s545_s7 = ssub.s32 %s3659_s28, %s3844_s29  ;;  %p558_p0 = scmp.ne.s32.totalorder %s3655_s27, %s3651_s26 }
  0x15   : > { %p546_p1 = scmp.eq.s32.totalorder %s545_s7, 0  ;;  %p559_p2 = scmp.eq.s32.totalorder %s3840_s6, 1 }
  0x16   : > { %p564_p3 = scmp.ne.s32.totalorder %s3651_s26, %s3647_s5  ;;  %p565_p4 = scmp.eq.s32.totalorder %s3202_s2, 1 }
  0x17   : > { %s3855_s30 = scalar_select %p546_p1, %s3655_s27, %s548_s0  }
  0x18   : > { %p3857_p5 = por %p559_p2, %p558_p0  ;;  %p3861_p6 = por %p565_p4, %p564_p3 }
  0x19   : > { %5150 = sst [smem:[#allocation9_spill]] %s3855_s30  ;;  %p3205_p7 = scmp.ge.s32.totalorder %s3659_s28, 1 }
  0x1a   : > { %s5152_s25 = scalar_select %p3861_p6, 1, 0 }
  0x1b   : > { %p691_p8 = scmp.lt.s32.totalorder %s3659_s28, 3 }
  0x1c   : > { %5153 = sst [smem:[#allocation10_spill]] %s5152_s25 }
  0x1d   : > { %p692_p9 = pnand %p3205_p7, %p691_p8 }
  0x1e   : > { %p768_p10 = scmp.lt.s32.totalorder (!%p692_p9), %s3840_s6, 1  ;;  %s5154_s0 = sld [smem:[#allocation11_spill]] (!%p692_p9) }
  0x1f   : > { %695 = sbr.rel (%p692_p9) target bundleno = 6993 (0x1b51), region = 112  ;;  %s5155_s2 = sld [smem:[#allocation17_spill]] (!%p692_p9) }
  0x20   : > { %s5158_s29 = sld [smem:[#allocation18_spill]] (!%p692_p9)  ;;  %s760_s27 = sand.u32 (!%p692_p9), 1, %s3651_s26  }
  0x21   : > { %s5159_s28 = sld [smem:[#allocation12_spill]] (!%p692_p9)  ;;  %s3206_s24 = sshll.u32 (!%p692_p9), %s760_s27, 3 }
  0x22   : > { %s5161_s9 = sld [smem:[#allocation20_spill]] (!%p692_p9)  ;;  %s4464_s30 = scalar_lea.vmem (!%p692_p9), [#allocation2], %s3206_s24 }
  0x23   : > { %s5162_s5 = sld [smem:[#allocation14_spill]] (!%p692_p9)  ;;  %s3663_s25 = smov (!%p692_p9), 124  }
  0x24   : > { %s3869_s8 = scalar_select %p768_p10, %s3840_s6, 1  ;;  %vm787_vm0 = vcmask 261120   ;;  %v3661_v2 = vmov 32.0   ;;  %vm1045_vm5 = vcmask 64512   ;;  %vm1266_vm9 = vcmask 523264  }
  0x25   : > { %3497 = vrcp.f32 %v3661_v2  ;;  %v844_v14 = vld [vmem:[%s5155_s2 + $0x90] sm:$0xff]  ;;  %v845_v15 = vld [vmem:[%s5155_s2 + $0x98] sm:$0xff]  ;;  %v847_v16 = vld [vmem:[%s5155_s2 + $0xa8] sm:$0xff]  ;;  %s5163_s23 = sld [smem:[#allocation13_spill]]  ;;  %s3679_s1 = smov 123  }
  0x26   : > { %s3207_s4 = sshll.u32 %s3869_s8, 3  ;;  %911 = vmatpush.msra.mxu2 %v844_v14  ;;  %931 = vmatpush.msra.mxu1 %v845_v15  ;;  %v848_v17 = vld [vmem:[%s5155_s2 + $0xb0] sm:$0xff]  ;;  %v838_v18 = vld [vmem:[%s5155_s2 + $0x60] sm:$0xff]  ;;  %v839_v19 = vld [vmem:[%s5155_s2 + $0x68] sm:$0xff] }
  0x27   : > { %s771_s7 = scalar_lea.vmem %s5154_s0, %s3207_s4  ;;  %971 = vmatpush.msra.mxu3 %v847_v16  ;;  %991 = vmatpush.msra.mxu0 %v848_v17  ;;  %v841_v20 = vld [vmem:[%s5155_s2 + $0x78] sm:$0xff]  ;;  %v842_v21 = vld [vmem:[%s5155_s2 + $0x80] sm:$0xff]  ;;  %v832_v22 = vld [vmem:[%s5155_s2 + $0x30] sm:$0xff]  ;;  %s5156_s4 = sld [smem:[#allocation15_spill]] }
  0x28   : > { %v784_v0 = vld [vmem:[%s771_s7] sm:$0xff]  ;;  %912 = vmatpush.msra.mxu2 %v838_v18  ;;  %932 = vmatpush.msra.mxu1 %v839_v19  ;;  %v833_v23 = vld [vmem:[%s5155_s2 + $0x38] sm:$0xff]  ;;  %v835_v24 = vld [vmem:[%s5155_s2 + $0x48] sm:$0xff]  ;;  %s5157_s7 = sld [smem:[#allocation16_spill]]  ;;  %s3680_s0 = smov 122  }
  0x29   : > { %v788_v1 = vsel %vm787_vm0, %v784_v0, 0.0  ;;  %972 = vmatpush.msra.mxu3 %v841_v20  ;;  %992 = vmatpush.msra.mxu0 %v842_v21  ;;  %v836_v25 = vld [vmem:[%s5155_s2 + $0x50] sm:$0xff]  ;;  %v826_v26 = vld [vmem:[%s5155_s2] sm:$0xff]  ;;  %v827_v27 = vld [vmem:[%s5155_s2 + $0x8] sm:$0xff] }
  0x2a   : > { %789 = vadd.xlane.f32.xlu0 %v788_v1  ;;  %913 = vmatpush.msra.mxu2 %v832_v22  ;;  %v829_v28 = vld [vmem:[%s5155_s2 + $0x18] sm:$0xff]  ;;  %v830_v29 = vld [vmem:[%s5155_s2 + $0x20] sm:$0xff]  ;;  %v840_v32 = vld [vmem:[%s5155_s2 + $0x70] sm:$0xff] }
  0x2b   : > { %v3498_v3 = vpop.eup %3497  ;;  %933 = vmatpush.msra.mxu1 %v833_v23  ;;  %973 = vmatpush.msra.mxu3 %v835_v24  ;;  %v846_v30 = vld [vmem:[%s5155_s2 + $0xa0] sm:$0xff]  ;;  %v849_v31 = vld [vmem:[%s5155_s2 + $0xb8] sm:$0xff]  ;;  %v843_v33 = vld [vmem:[%s5155_s2 + $0x88] sm:$0xff]  ;;  %s4493_s24 = scalar_lea.vmem %s5163_s23, %s3869_s8  ;;  %s3677_s23 = smov 125  }
  0x2c   : > { %v792_v4 = vmul.f32 32.0, %v3498_v3  ;;  %vm796_vm1 = vweird.f32 %v3498_v3  ;;  %993 = vmatpush.msra.mxu0 %v836_v25  ;;  %914 = vmatpush.msra.mxu2 %v826_v26  ;;  %v834_v35 = vld [vmem:[%s5155_s2 + $0x40] sm:$0xff]  ;;  %v837_v36 = vld [vmem:[%s5155_s2 + $0x58] sm:$0xff]  ;;  %v828_v38 = vld [vmem:[%s5155_s2 + $0x10] sm:$0xff] }
  0x2d   : > { %934 = vmatpush.msra.mxu1 %v827_v27  ;;  %974 = vmatpush.msra.mxu3 %v829_v28  ;;  %v831_v39 = vld [vmem:[%s5155_s2 + $0x28] sm:$0xff]  ;;  %v3479_v47 = vld [vmem:[%s5156_s4] ss:$0 sm:$0xff]  ;;  %s774_s4 = scalar_lea.vmem %s5159_s28, %s3869_s8  ;;  %s4447_s28 = scalar_lea.vmem %s5162_s5, %s3869_s8 }
  0x2e   : > { %v793_v5 = vsub.f32 1.0, %v792_v4  ;;  %994 = vmatpush.msra.mxu0 %v830_v29  ;;  %951 = vmatpush.msrb.mxu2 %v846_v30  ;;  %v3480_v49 = vld [vmem:[%s5157_s7] ss:$0 sm:$0xff]  ;;  %s5160_s7 = sld [smem:[#allocation19_spill]]  ;;  %s3673_s5 = smov 127  }
  0x2f   : > { %1011 = vmatpush.msrb.mxu1 %v849_v31  ;;  %v850_v53 = vld [vmem:[%s5158_s29] sm:$0x3f] }
  0x30   : > { %v794_v6 = vmul.f32 %v3498_v3, %v793_v5  ;;  %952 = vmatpush.msrb.mxu2 %v840_v32  ;;  %v885_v54 = vperm.slane %v850_v53, 1  ;;  %v888_v55 = vperm.slane %v850_v53, 4  ;;  %v884_v60 = vperm.slane %v850_v53, 0 }
  0x31   : > { %1012 = vmatpush.msrb.mxu1 %v843_v33  ;;  %v887_v61 = vperm.slane %v850_v53, 3  ;;  %v889_v62 = vperm.slane %v850_v53, 5  ;;  %v886_v5 = vperm.slane %v850_v53, 2 }
  0x32   : > { %v795_v7 = vadd.f32 %v3498_v3, %v794_v6  ;;  %953 = vmatpush.msrb.mxu2 %v834_v35 }
  0x33   : > { %1013 = vmatpush.msrb.mxu1 %v837_v36 }
  0x34   : > { %v3876_v8 = vsel %vm796_vm1, %v3498_v3, %v795_v7  ;;  %954 = vmatpush.msrb.mxu2 %v828_v38  ;;  %v882_v28 = vld [vmem:[%s5160_s7 + $0xf8] sm:$0xff]  ;;  %v881_v29 = vld [vmem:[%s5160_s7 + $0xf0] sm:$0xff]  ;;  %v880_v31 = vld [vmem:[%s5160_s7 + $0xe8] sm:$0xff] }
  0x35   : > { %1014 = vmatpush.msrb.mxu1 %v831_v39  ;;  %v866_v30 = vld [vmem:[%s5160_s7 + $0x78] sm:$0xff]  ;;  %v865_v32 = vld [vmem:[%s5160_s7 + $0x70] sm:$0xff]  ;;  %v864_v33 = vld [vmem:[%s5160_s7 + $0x68] sm:$0xff] }
  0x36   : > { %1080 = vmatpush.msrb.mxu0 %v866_v30  ;;  %v863_v35 = vld [vmem:[%s5160_s7 + $0x60] sm:$0xff]  ;;  %v878_v36 = vld [vmem:[%s5160_s7 + $0xd8] sm:$0xff]  ;;  %v877_v38 = vld [vmem:[%s5160_s7 + $0xd0] sm:$0xff] }
  0x37   : > { %v861_v39 = vld [vmem:[%s5160_s7 + $0x50] sm:$0xff] }
  0x38   : > { %1081 = vmatpush.msrb.mxu0 %v865_v32 }
  0x3a   : > { %1082 = vmatpush.msrb.mxu0 %v864_v33 }
  0x3c   : > { %1083 = vmatpush.msrb.mxu0 %v863_v35 }
  0x9d   : > { %v790_v9 = vpop.xlane.xlu0 %789 }
  0x9e   : > { %v798_v10 = vmul.f32 %v3876_v8, %v790_v9  ;;  %v3985_v9 = vld [vmem:[%s774_s4] ss:$0 sm:$0xff]  ;;  %s3675_s4 = smov 126  }
  0xa0   : > { %v3879_v11 = vsub.f32 %v784_v0, %v798_v10 }
  0xa2   : > { %v800_v12 = vmul.f32 %v3879_v11, %v3879_v11 }
  0xa4   : > { %v801_v13 = vsel %vm787_vm0, %v800_v12, 0.0 }
  0xa5   : > { %802 = vadd.xlane.f32.xlu0 %v801_v13 }
 0x118   : > { %v803_v34 = vpop.xlane.xlu0 %802 }
 0x119   : > { %v804_v37 = vmul.f32 %v803_v34, %v3876_v8  ;;  %v879_v34 = vld [vmem:[%s5160_s7 + $0xe0] sm:$0xff] }
 0x11b   : > { %v805_v40 = vadd.f32 1e-12, %v804_v37  ;;  %v862_v37 = vld [vmem:[%s5160_s7 + $0x58] sm:$0xff] }
 0x11c   : > { %1084 = vmatpush.msrb.mxu0 %v862_v37  ;;  %v1261_v37 = vld [vmem:[%s5111_s14 + $0x38] sm:$0xff] }
 0x11d   : > { %3499 = vrsqrt.f32 %v805_v40  ;;  %vm812_vm3 = vweird.f32 %v805_v40 }
 0x11e   : > { %1085 = vmatpush.msrb.mxu0 %v861_v39  ;;  %v1259_v39 = vld [vmem:[%s5111_s14 + $0x28] sm:$0xff] }
 0x123   : > { %v3500_v41 = vpop.eup %3499 }
 0x124   : > { %v807_v42 = vmul.f32 %v3500_v41, %v805_v40  ;;  %vm813_vm2 = vweird.f32 %v3500_v41  ;;  %v876_v40 = vld [vmem:[%s5160_s7 + $0xc8] sm:$0xff] }
 0x125   : > { %vm814_vm4 = vmor %vm812_vm3, %vm813_vm2 }
 0x126   : > { %v808_v43 = vmul.f32 %v3500_v41, %v807_v42  ;;  %v875_v42 = vld [vmem:[%s5160_s7 + $0xc0] sm:$0xff] }
 0x128   : > { %v809_v44 = vmul.f32 0.5, %v808_v43  ;;  %v859_v43 = vld [vmem:[%s5160_s7 + $0x40] sm:$0xff] }
 0x12a   : > { %v810_v45 = vsub.f32 1.5, %v809_v44 }
 0x12c   : > { %v811_v46 = vmul.f32 %v3500_v41, %v810_v45  ;;  %v874_v45 = vld [vmem:[%s5160_s7 + $0xb8] sm:$0xff] }
 0x12e   : > { %v815_v48 = vsel %vm814_vm4, %v3500_v41, %v811_v46  ;;  %v860_v41 = vld [vmem:[%s5160_s7 + $0x48] sm:$0xff]  ;;  %v858_v46 = vld [vmem:[%s5160_s7 + $0x38] sm:$0xff]  ;;  %vm1893_vm4 = vcmask 27648  }
 0x12f   : > { %v816_v50 = vmul.f32 %v815_v48, %v3879_v11  ;;  %1086 = vmatpush.msrb.mxu0 %v860_v41  ;;  %v857_v48 = vld [vmem:[%s5160_s7 + $0x30] sm:$0xff]  ;;  %v1257_v41 = vld [vmem:[%s5111_s14 + $0x18] sm:$0xff] }
 0x131   : > { %v820_v51 = vmul.f32 %v3479_v47, %v816_v50  ;;  %v873_v47 = vld [vmem:[%s5160_s7 + $0xb0] sm:$0xff]  ;;  %1087 = vmatpush.msrb.mxu0 %v859_v43  ;;  %v856_v50 = vld [vmem:[%s5160_s7 + $0x28] sm:$0xff] }
 0x132   : > { %v1255_v43 = vld [vmem:[%s5111_s14 + $0x8] sm:$0xff] }
 0x133   : > { %v3964_v52 = vadd.f32 %v3480_v49, %v820_v51  ;;  %v872_v49 = vld [vmem:[%s5160_s7 + $0xa8] sm:$0xff]  ;;  %1088 = vmatpush.msrb.mxu0 %v858_v46  ;;  %v871_v51 = vld [vmem:[%s5160_s7 + $0xa0] sm:$0xff] }
 0x135   : > { %3208 = vmatmul.msk.f32.vlgmr.msra.gmra.mxu2 %vm787_vm0, %v3964_v52  ;;  %3209 = vmatmul.msk.f32.vlgmr.msra.gmra.mxu1 %vm787_vm0, %v3964_v52 }
 0x136   : > { %3211 = vmatmul.msk.f32.vlgmr.msra.gmra.mxu3 %vm787_vm0, %v3964_v52  ;;  %3212 = vmatmul.msk.f32.vlgmr.msra.gmra.mxu0 %vm787_vm0, %v3964_v52 }
 0x137   : > { %1089 = vmatpush.msrb.mxu0 %v857_v48 }
 0x139   : > { %1090 = vmatpush.msrb.mxu0 %v856_v50 }
 0x13d   : > { %3210 = vmatmul.msk.f32.vlgmr.msrb.gmra.mxu2 %vm787_vm0, %v3964_v52  ;;  %3213 = vmatmul.msk.f32.vlgmr.msrb.gmra.mxu1 %vm787_vm0, %v3964_v52 }
 0x1b2   : > { %v936_v56 = vpop.f32.mrf.mxu1 }
 0x1b3   : > { %v937_v57 = vadd.f32 %v936_v56, %v885_v54  ;;  %v996_v58 = vpop.f32.mrf.mxu0  ;;  %v855_v54 = vld [vmem:[%s5160_s7 + $0x20] sm:$0xff] }
 0x1b4   : > { %v997_v59 = vadd.f32 %v996_v58, %v888_v55  ;;  %v869_v58 = vld [vmem:[%s5160_s7 + $0x90] sm:$0xff]  ;;  %1091 = vmatpush.msrb.mxu0 %v855_v54 }
 0x1b5   : > { %1035 = vmatpush.xpose.msra.mxu2 %v937_v57  ;;  %v870_v57 = vld [vmem:[%s5160_s7 + $0x98] sm:$0xff] }
 0x1b6   : > { %1119 = vmatpush.xpose.msra.mxu1 %v997_v59  ;;  %v868_v59 = vld [vmem:[%s5160_s7 + $0x88] sm:$0xff] }
 0x1b8   : > { %v916_v63 = vpop.f32.mrf.mxu2 }
 0x1b9   : > { %v917_v0 = vadd.f32 %v916_v63, %v884_v60  ;;  %v976_v1 = vpop.f32.mrf.mxu3  ;;  %v854_v63 = vld [vmem:[%s5160_s7 + $0x18] sm:$0xff] }
 0x1ba   : > { %v977_v2 = vadd.f32 %v976_v1, %v887_v61  ;;  %v1016_v3 = vpop.f32.mrf.mxu1  ;;  %1092 = vmatpush.msrb.mxu0 %v854_v63  ;;  %v852_v1 = vld [vmem:[%s5160_s7 + $0x8] sm:$0xff] }
 0x1bb   : > { %v1017_v4 = vadd.f32 %v1016_v3, %v889_v62  ;;  %1036 = vmatmul.f32.vlgmr.msra.gmra.mxu2 %v917_v0  ;;  %v867_v62 = vld [vmem:[%s5160_s7 + $0x80] sm:$0xff]  ;;  %v853_v0 = vld [vmem:[%s5160_s7 + $0x10] sm:$0xff] }
 0x1bc   : > { %1120 = vmatmul.f32.vlgmr.msra.gmra.mxu1 %v977_v2  ;;  %1093 = vmatpush.msrb.mxu0 %v853_v0  ;;  %v851_v2 = vld [vmem:[%s5160_s7] sm:$0xff] }
 0x1bd   : > { %1155 = vmatpush.msrb.mxu2 %v1017_v4 }
 0x1be   : > { %1094 = vmatpush.msrb.mxu0 %v852_v1 }
 0x1bf   : > { %1278 = vmatpush.msra.mxu2 %v1261_v37 }
 0x1c0   : > { %v956_v6 = vpop.f32.mrf.mxu2  ;;  %1095 = vmatpush.msrb.mxu0 %v851_v2 }
 0x1c1   : > { %v957_v7 = vadd.f32 %v956_v6, %v886_v5  ;;  %v3482_v5 = vld [vmem:[%s5161_s9] ss:$0 sm:$0xff] }
 0x1c3   : > { %1075 = vmatpush.msrb.mxu3 %v957_v7 }
 0x1c5   : > { %1160 = vmatpush.msra.mxu3 %v882_v28 }
 0x1c7   : > { %1161 = vmatpush.msra.mxu3 %v881_v29 }
 0x1c9   : > { %1162 = vmatpush.msra.mxu3 %v880_v31  ;;  %v3483_v31 = vld [vmem:[%s5107_s10] ss:$0 sm:$0xff] }
 0x1cb   : > { %1163 = vmatpush.msra.mxu3 %v879_v34  ;;  %v3484_v34 = vld [vmem:[%s5108_s11] ss:$0 sm:$0xff] }
 0x1cd   : > { %1164 = vmatpush.msra.mxu3 %v878_v36 }
 0x1cf   : > { %1165 = vmatpush.msra.mxu3 %v877_v38  ;;  %v1260_v38 = vld [vmem:[%s5111_s14 + $0x30] sm:$0xff] }
 0x1d0   : > { %1279 = vmatpush.msra.mxu2 %v1260_v38 }
 0x1d1   : > { %1166 = vmatpush.msra.mxu3 %v876_v40  ;;  %v1258_v40 = vld [vmem:[%s5111_s14 + $0x20] sm:$0xff] }
 0x1d2   : > { %1280 = vmatpush.msra.mxu2 %v1259_v39 }
 0x1d3   : > { %1167 = vmatpush.msra.mxu3 %v875_v42  ;;  %v1256_v42 = vld [vmem:[%s5111_s14 + $0x10] sm:$0xff] }
 0x1d4   : > { %1281 = vmatpush.msra.mxu2 %v1258_v40  ;;  %v3240_v40 = vld [vmem:[%s5155_s2 + $0x170] sm:$0xff] }
 0x1d5   : > { %1168 = vmatpush.msra.mxu3 %v874_v45  ;;  %v3485_v45 = vld [vmem:[%s5110_s13] ss:$0 sm:$0xff] }
 0x1d6   : > { %1282 = vmatpush.msra.mxu2 %v1257_v41  ;;  %v3234_v41 = vld [vmem:[%s5155_s2 + $0x140] sm:$0xff] }
 0x1d7   : > { %1169 = vmatpush.msra.mxu3 %v873_v47 }
 0x1d8   : > { %1283 = vmatpush.msra.mxu2 %v1256_v42  ;;  %v3228_v42 = vld [vmem:[%s5155_s2 + $0x110] sm:$0xff] }
 0x1d9   : > { %1170 = vmatpush.msra.mxu3 %v872_v49 }
 0x1da   : > { %1284 = vmatpush.msra.mxu2 %v1255_v43  ;;  %v3222_v43 = vld [vmem:[%s5155_s2 + $0xe0] sm:$0xff] }
 0x1db   : > { %1171 = vmatpush.msra.mxu3 %v871_v51 }
 0x1dd   : > { %1172 = vmatpush.msra.mxu3 %v870_v57 }
 0x1df   : > { %1173 = vmatpush.msra.mxu3 %v869_v58  ;;  %v3486_v58 = vld [vmem:[%s5112_s15] ss:$0 sm:$0xff] }
 0x1e1   : > { %1174 = vmatpush.msra.mxu3 %v868_v59 }
 0x1e3   : > { %1175 = vmatpush.msra.mxu3 %v867_v62 }
 0x239   : > { %v1121_v10 = vpop.f32.mrf.mxu1 }
 0x23a   : > { %v1124_v11 = vmul.f32 0.25, %v1121_v10 }
 0x23c   : > { %v1125_v12 = vadd.f32 %v3985_v9, %v1124_v11 }
 0x23e   : > { %v1126_v13 = vsel %vm1045_vm5, %v1125_v12, -inf  ;;  %v1037_v14 = vpop.f32.mrf.mxu2 }
 0x23f   : > { %1127 = vmax.xlane.f32.xlu1 %v1126_v13  ;;  %v1040_v15 = vmul.f32 0.25, %v1037_v14 }
 0x241   : > { %v1044_v16 = vadd.f32 %v3985_v9, %v1040_v15 }
 0x243   : > { %v1046_v17 = vsel %vm1045_vm5, %v1044_v16, -inf }
 0x247   : > { %1047 = vmax.xlane.f32.xlu1 %v1046_v17 }
 0x2b2   : > { %v1128_v18 = vpop.xlane.xlu1 %1127 }
 0x2b3   : > { %v1129_v19 = vsub.f32 %v1125_v12, %v1128_v18 }
 0x2b5   : > { %v1130_v20 = vmul.f32 1.442695, %v1129_v19  ;;  %v1217_v19 = vld [vmem:[%s5109_s12 + $0x18] sm:$0xff] }
 0x2b6   : > { %1237 = vmatpush.msrb.mxu1 %v1217_v19  ;;  %v3241_v19 = vld [vmem:[%s5155_s2 + $0x178] sm:$0xff] }
 0x2b7   : > { %3501 = vpow2.f32 %v1130_v20  ;;  %v1215_v20 = vld [vmem:[%s5109_s12 + $0x8] sm:$0xff] }
 0x2ba   : > { %v1048_v21 = vpop.xlane.xlu1 %1047 }
 0x2bb   : > { %v1049_v22 = vsub.f32 %v1044_v16, %v1048_v21  ;;  %v1214_v21 = vld [vmem:[%s5109_s12] sm:$0xff] }
 0x2bd   : > { %v3502_v23 = vpop.eup %3501  ;;  %v1050_v24 = vmul.f32 1.442695, %v1049_v22 }
 0x2be   : > { %v1132_v25 = vsel %vm1045_vm5, %v3502_v23, 0.0 }
 0x2bf   : > { %3503 = vpow2.f32 %v1050_v24  ;;  %1133 = vadd.xlane.f32.xlu2 %v1132_v25 }
 0x2c5   : > { %v3992_v26 = vpop.eup %3503 }
 0x2c6   : > { %v1052_v27 = vsel %vm1045_vm5, %v3992_v26, 0.0 }
 0x2c7   : > { %1053 = vadd.xlane.f32.xlu2 %v1052_v27 }
 0x332   : > { %v1134_v44 = vpop.xlane.xlu2 %1133 }
 0x333   : > { %3505 = vrcp.f32 %v1134_v44  ;;  %v1254_v44 = vld [vmem:[%s5111_s14] sm:$0xff] }
 0x334   : > { %1285 = vmatpush.msra.mxu2 %v1254_v44 }
 0x339   : > { %v3506_v53 = vpop.eup %3505 }
 0x33a   : > { %v1136_v55 = vmul.f32 %v3506_v53, %v3502_v23  ;;  %v1054_v56 = vpop.xlane.xlu2 %1053 }
 0x33b   : > { %3507 = vrcp.f32 %v1054_v56 }
 0x33c   : > { %3215 = vmatmul.msk.f32.vlgmr.msrb.gmra.mxu2 %vm1045_vm5, %v1136_v55 }
 0x341   : > { %v3508_v60 = vpop.eup %3507 }
 0x342   : > { %v1056_v61 = vmul.f32 %v3508_v60, %v3992_v26 }
 0x344   : > { %3214 = vmatmul.msk.f32.vlgmr.msrb.gmra.mxu3 %vm1045_vm5, %v1056_v61 }
 0x3bf   : > { %v1157_v3 = vpop.f32.mrf.mxu2 }
 0x3c0   : > { %1176 = vmatmul.f32.vlgmr.msra.gmra.mxu3 %v1157_v3 }
 0x3c7   : > { %v1077_v4 = vpop.f32.mrf.mxu3 }
 0x3c8   : > { %1096 = vmatmul.f32.vlgmr.msrb.gmra.mxu0 %v1077_v4  ;;  %v3236_v4 = vld [vmem:[%s5155_s2 + $0x150] sm:$0xff] }
 0x443   : > { %v1177_v10 = vpop.f32.mrf.mxu3 }
 0x445   : > { %v1097_v6 = vpop.f32.mrf.mxu0 }
 0x446   : > { %v1103_v7 = vadd.f32 %v3482_v5, %v1097_v6  ;;  %v3238_v5 = vld [vmem:[%s5155_s2 + $0x160] sm:$0xff]  ;;  %v3239_v6 = vld [vmem:[%s5155_s2 + $0x168] sm:$0xff] }
 0x447   : > { %1451 = vmatpush.msrb.mxu2 %v3238_v5  ;;  %1471 = vmatpush.msra.mxu0 %v3239_v6 }
 0x448   : > { %v1180_v11 = vadd.f32 %v1177_v10, %v1103_v7  ;;  %v3230_v7 = vld [vmem:[%s5155_s2 + $0x120] sm:$0xff]  ;;  %v3232_v10 = vld [vmem:[%s5155_s2 + $0x130] sm:$0xff] }
 0x449   : > { %1452 = vmatpush.msrb.mxu2 %v3232_v10 }
 0x44a   : > { %v1181_v12 = vadd.f32 %v1180_v11, %v3964_v52  ;;  %v1216_v52 = vld [vmem:[%s5109_s12 + $0x10] sm:$0xff]  ;;  %v3233_v11 = vld [vmem:[%s5155_s2 + $0x138] sm:$0xff] }
 0x44b   : > { %1238 = vmatpush.msrb.mxu1 %v1216_v52  ;;  %1472 = vmatpush.msra.mxu0 %v3233_v11  ;;  %v3231_v52 = vld [vmem:[%s5155_s2 + $0x128] sm:$0xff] }
 0x44c   : > { %v1184_v13 = vsel %vm787_vm0, %v1181_v12, 0.0 }
 0x44d   : > { %1185 = vadd.xlane.f32.xlu0 %v1184_v13  ;;  %1239 = vmatpush.msrb.mxu1 %v1215_v20  ;;  %v3226_v13 = vld [vmem:[%s5155_s2 + $0x100] sm:$0xff]  ;;  %v3235_v20 = vld [vmem:[%s5155_s2 + $0x148] sm:$0xff] }
 0x44e   : > { %1453 = vmatpush.msrb.mxu2 %v3226_v13 }
 0x44f   : > { %1240 = vmatpush.msrb.mxu1 %v1214_v21 }
 0x451   : > { %1411 = vmatpush.msra.mxu1 %v3236_v4 }
 0x453   : > { %1412 = vmatpush.msra.mxu1 %v3230_v7 }
 0x4c0   : > { %v1186_v14 = vpop.xlane.xlu0 %1185 }
 0x4c1   : > { %v1187_v15 = vmul.f32 %v1186_v14, %v3876_v8  ;;  %v3227_v14 = vld [vmem:[%s5155_s2 + $0x108] sm:$0xff] }
 0x4c2   : > { %1473 = vmatpush.msra.mxu0 %v3227_v14 }
 0x4c3   : > { %v1188_v16 = vsub.f32 %v1181_v12, %v1187_v15  ;;  %v3224_v12 = vld [vmem:[%s5155_s2 + $0xf0] sm:$0xff]  ;;  %v3218_v15 = vld [vmem:[%s5155_s2 + $0xc0] sm:$0xff] }
 0x4c4   : > { %1413 = vmatpush.msra.mxu1 %v3224_v12 }
 0x4c5   : > { %v1189_v17 = vmul.f32 %v1188_v16, %v1188_v16 }
 0x4c6   : > { %1414 = vmatpush.msra.mxu1 %v3218_v15 }
 0x4c7   : > { %v1190_v18 = vsel %vm787_vm0, %v1189_v17, 0.0  ;;  %v3221_v17 = vld [vmem:[%s5155_s2 + $0xd8] sm:$0xff] }
 0x4c8   : > { %1191 = vadd.xlane.f32.xlu1 %v1190_v18  ;;  %1474 = vmatpush.msra.mxu0 %v3221_v17  ;;  %v3237_v18 = vld [vmem:[%s5155_s2 + $0x158] sm:$0xff] }
 0x53b   : > { %v1192_v22 = vpop.xlane.xlu1 %1191 }
 0x53c   : > { %v1193_v23 = vmul.f32 %v1192_v22, %v3876_v8  ;;  %v3225_v22 = vld [vmem:[%s5155_s2 + $0xf8] sm:$0xff] }
 0x53e   : > { %v1194_v24 = vadd.f32 1e-12, %v1193_v23  ;;  %v3229_v23 = vld [vmem:[%s5155_s2 + $0x118] sm:$0xff] }
 0x540   : > { %3509 = vrsqrt.f32 %v1194_v24  ;;  %vm1201_vm7 = vweird.f32 %v1194_v24 }
 0x546   : > { %v3510_v25 = vpop.eup %3509 }
 0x547   : > { %v1196_v26 = vmul.f32 %v3510_v25, %v1194_v24  ;;  %vm1202_vm6 = vweird.f32 %v3510_v25 }
 0x548   : > { %vm1203_vm8 = vmor %vm1201_vm7, %vm1202_vm6  ;;  %vm1875_vm7 = vcmask 24576  }
 0x549   : > { %v1197_v27 = vmul.f32 %v3510_v25, %v1196_v26  ;;  %v3223_v26 = vld [vmem:[%s5155_s2 + $0xe8] sm:$0xff] }
 0x54b   : > { %v1198_v28 = vmul.f32 0.5, %v1197_v27 }
 0x54d   : > { %v1199_v29 = vsub.f32 1.5, %v1198_v28 }
 0x54f   : > { %v1200_v30 = vmul.f32 %v3510_v25, %v1199_v29 }
 0x551   : > { %v1204_v32 = vsel %vm1203_vm8, %v3510_v25, %v1200_v30  ;;  %v3219_v25 = vld [vmem:[%s5155_s2 + $0xc8] sm:$0xff] }
 0x552   : > { %v1205_v33 = vmul.f32 %v1204_v32, %v1188_v16  ;;  %v3220_v16 = vld [vmem:[%s5155_s2 + $0xd0] sm:$0xff]  ;;  %s3076_s2 = scalar_lea.sflag [#allocation3], %s760_s27 }
 0x553   : > { %1454 = vmatpush.msrb.mxu2 %v3220_v16 }
 0x554   : > { %v1209_v35 = vmul.f32 %v3483_v31, %v1205_v33 }
 0x556   : > { %v1213_v36 = vadd.f32 %v3484_v34, %v1209_v35  ;;  %v3487_v34 = vld [vmem:[%s5113_s16] ss:$0 sm:$0xff] }
 0x558   : > { %3216 = vmatmul.msk.f32.vlgmr.msrb.gmra.mxu1 %vm787_vm0, %v1213_v36 }
 0x559   : > { %1431 = vmatpush.msrb.mxu1 %v3237_v18 }
 0x55b   : > { %1432 = vmatpush.msrb.mxu1 %v3231_v52  ;;  %v3257_v52 = vld [vmem:[%s5160_s7 + $0x170] sm:$0xff] }
 0x55d   : > { %1433 = vmatpush.msrb.mxu1 %v3225_v22  ;;  %v3273_v22 = vld [vmem:[%s5160_s7 + $0x1f0] sm:$0xff] }
 0x55f   : > { %1434 = vmatpush.msrb.mxu1 %v3219_v25  ;;  %v3254_v25 = vld [vmem:[%s5160_s7 + $0x158] sm:$0xff] }
 0x5d5   : > { %v1242_v46 = vpop.f32.mrf.mxu1 }
 0x5d6   : > { %v1243_v47 = vadd.f32 %v3485_v45, %v1242_v46  ;;  %v3242_v45 = vld [vmem:[%s5158_s29 + $0x6] sm:$0x3f] }
 0x5d7   : > { %v1386_v46 = vperm.slane %v3242_v45, 2 }
 0x5d8   : > { %v1246_v48 = vmul.f32 0.044715, %v1243_v47  ;;  %v1245_v55 = vmul.f32 0.5, %v1243_v47 }
 0x5da   : > { %v1247_v49 = vmul.f32 %v1246_v48, %v1243_v47 }
 0x5dc   : > { %v1248_v50 = vmul.f32 %v1247_v49, %v1243_v47 }
 0x5de   : > { %v1249_v51 = vadd.f32 %v1248_v50, %v1243_v47  ;;  %v1385_v47 = vperm.slane %v3242_v45, 1  ;;  %v1384_v50 = vperm.slane %v3242_v45, 0 }
 0x5e0   : > { %v1250_v53 = vmul.f32 0.7978846, %v1249_v51 }
 0x5e2   : > { %3511 = vtanh.f32 %v1250_v53 }
 0x5e8   : > { %v3512_v54 = vpop.eup %3511 }
 0x5e9   : > { %v1252_v56 = vadd.f32 1.0, %v3512_v54  ;;  %v1389_v54 = vperm.slane %v3242_v45, 5 }
 0x5eb   : > { %v1253_v57 = vmul.f32 %v1252_v56, %v1245_v55  ;;  %v1388_v56 = vperm.slane %v3242_v45, 4 }
 0x5ed   : > { %3217 = vmatmul.msk.f32.vlgmr.msra.gmra.mxu2 %vm1266_vm9, %v1253_v57 }
 0x5ee   : > { %1511 = vmatpush.msra.mxu2 %v3241_v19 }
 0x5f0   : > { %1512 = vmatpush.msra.mxu2 %v3235_v20  ;;  %v3256_v20 = vld [vmem:[%s5160_s7 + $0x168] sm:$0xff] }
 0x5f2   : > { %1513 = vmatpush.msra.mxu2 %v3229_v23  ;;  %v3255_v23 = vld [vmem:[%s5160_s7 + $0x160] sm:$0xff] }
 0x5f4   : > { %1514 = vmatpush.msra.mxu2 %v3223_v26  ;;  %v3271_v26 = vld [vmem:[%s5160_s7 + $0x1e0] sm:$0xff] }
 0x670   : > { %v1287_v59 = vpop.f32.mrf.mxu2 }
 0x671   : > { %v1288_v60 = vadd.f32 %v3486_v58, %v1287_v59  ;;  %v1387_v59 = vperm.slane %v3242_v45, 3  ;;  %v3244_v45 = vld [vmem:[%s5160_s7 + $0x108] sm:$0xff] }
 0x673   : > { %v1290_v61 = vadd.f32 %v1288_v60, %v1213_v36  ;;  %v3488_v36 = vld [vmem:[%s5114_s17] ss:$0 sm:$0xff] }
 0x675   : > { %v1293_v62 = vsel %vm787_vm0, %v1290_v61, 0.0 }
 0x676   : > { %1294 = vadd.xlane.f32.xlu2 %v1293_v62 }
 0x6e9   : > { %v1295_v63 = vpop.xlane.xlu2 %1294 }
 0x6ea   : > { %v1296_v0 = vmul.f32 %v1295_v63, %v3876_v8 }
 0x6ec   : > { %v1297_v1 = vsub.f32 %v1290_v61, %v1296_v0 }
 0x6ee   : > { %v1298_v2 = vmul.f32 %v1297_v1, %v1297_v1 }
 0x6f0   : > { %v1299_v3 = vsel %vm787_vm0, %v1298_v2, 0.0 }
 0x6f1   : > { %1300 = vadd.xlane.f32.xlu0 %v1299_v3 }
 0x764   : > { %v1301_v21 = vpop.xlane.xlu0 %1300 }
 0x765   : > { %v1302_v24 = vmul.f32 %v1301_v21, %v3876_v8  ;;  %v3274_v21 = vld [vmem:[%s5160_s7 + $0x1f8] sm:$0xff] }
 0x767   : > { %v1303_v27 = vadd.f32 1e-12, %v1302_v24  ;;  %v3272_v24 = vld [vmem:[%s5160_s7 + $0x1e8] sm:$0xff] }
 0x769   : > { %3513 = vrsqrt.f32 %v1303_v27  ;;  %vm1310_vm11 = vweird.f32 %v1303_v27 }
 0x76f   : > { %v3514_v28 = vpop.eup %3513 }
 0x770   : > { %v1305_v29 = vmul.f32 %v3514_v28, %v1303_v27  ;;  %vm1311_vm10 = vweird.f32 %v3514_v28  ;;  %v3253_v27 = vld [vmem:[%s5160_s7 + $0x150] sm:$0xff] }
 0x771   : > { %vm1312_vm12 = vmor %vm1310_vm11, %vm1311_vm10 }
 0x772   : > { %v1306_v30 = vmul.f32 %v3514_v28, %v1305_v29  ;;  %v3252_v29 = vld [vmem:[%s5160_s7 + $0x148] sm:$0xff] }
 0x774   : > { %v1307_v31 = vmul.f32 0.5, %v1306_v30  ;;  %v3269_v30 = vld [vmem:[%s5160_s7 + $0x1d0] sm:$0xff] }
 0x776   : > { %v1308_v32 = vsub.f32 1.5, %v1307_v31  ;;  %v3251_v31 = vld [vmem:[%s5160_s7 + $0x140] sm:$0xff] }
 0x778   : > { %v1309_v33 = vmul.f32 %v3514_v28, %v1308_v32  ;;  %v3268_v32 = vld [vmem:[%s5160_s7 + $0x1c8] sm:$0xff] }
 0x77a   : > { %v1313_v35 = vsel %vm1312_vm12, %v3514_v28, %v1309_v33  ;;  %v3270_v28 = vld [vmem:[%s5160_s7 + $0x1d8] sm:$0xff] }
 0x77b   : > { %v1314_v37 = vmul.f32 %v1313_v35, %v1297_v1  ;;  %v3267_v35 = vld [vmem:[%s5160_s7 + $0x1c0] sm:$0xff] }
 0x77d   : > { %v1318_v38 = vmul.f32 %v3487_v34, %v1314_v37  ;;  %v3250_v34 = vld [vmem:[%s5160_s7 + $0x138] sm:$0xff]  ;;  %v3248_v37 = vld [vmem:[%s5160_s7 + $0x128] sm:$0xff] }
 0x77f   : > { %v4223_v39 = vadd.f32 %v3488_v36, %v1318_v38  ;;  %v3249_v36 = vld [vmem:[%s5160_s7 + $0x130] sm:$0xff]  ;;  %v3247_v38 = vld [vmem:[%s5160_s7 + $0x120] sm:$0xff] }
 0x781   : > { %3275 = vmatmul.msk.f32.vlgmr.msra.gmra.mxu1 %vm787_vm0, %v4223_v39  ;;  %3277 = vmatmul.msk.f32.vlgmr.msrb.gmra.mxu2 %vm787_vm0, %v4223_v39 }
 0x782   : > { %3278 = vmatmul.msk.f32.vlgmr.msra.gmra.mxu0 %vm787_vm0, %v4223_v39  ;;  %1491 = vmatpush.msra.mxu1 %v3240_v40 }
 0x784   : > { %1492 = vmatpush.msra.mxu1 %v3234_v41 }
 0x786   : > { %1493 = vmatpush.msra.mxu1 %v3228_v42 }
 0x788   : > { %1494 = vmatpush.msra.mxu1 %v3222_v43  ;;  %v3246_v43 = vld [vmem:[%s5160_s7 + $0x118] sm:$0xff] }
 0x789   : > { %3276 = vmatmul.msk.f32.vlgmr.msrb.gmra.mxu1 %vm787_vm0, %v4223_v39  ;;  %3280 = vmatmul.msk.f32.vlgmr.msra.gmra.mxu2 %vm787_vm0, %v4223_v39 }
 0x791   : > { %3279 = vmatmul.msk.f32.vlgmr.msra.gmra.mxu1 %vm787_vm0, %v4223_v39 }
 0x7fe   : > { %v1416_v44 = vpop.f32.mrf.mxu1 }
 0x7ff   : > { %v1417_v55 = vadd.f32 %v1416_v44, %v1384_v50  ;;  %v1476_v61 = vpop.f32.mrf.mxu0  ;;  %v3245_v44 = vld [vmem:[%s5160_s7 + $0x110] sm:$0xff] }
 0x800   : > { %v1477_v63 = vadd.f32 %v1476_v61, %v1387_v59  ;;  %v3265_v50 = vld [vmem:[%s5160_s7 + $0x1b0] sm:$0xff] }
 0x804   : > { %v1456_v48 = vpop.f32.mrf.mxu2 }
 0x805   : > { %v1457_v49 = vadd.f32 %v1456_v48, %v1386_v46  ;;  %v3243_v48 = vld [vmem:[%s5160_s7 + $0x100] sm:$0xff] }
 0x806   : > { %v1436_v51 = vpop.f32.mrf.mxu1 }
 0x807   : > { %v1437_v53 = vadd.f32 %v1436_v51, %v1385_v47  ;;  %1572 = vmatpush.msrb.mxu0 %v1457_v49  ;;  %v3266_v49 = vld [vmem:[%s5160_s7 + $0x1b8] sm:$0xff]  ;;  %v3264_v51 = vld [vmem:[%s5160_s7 + $0x1a8] sm:$0xff] }
 0x809   : > { %1536 = vmatpush.xpose.msrb.mxu3 %v1437_v53  ;;  %1657 = vmatpush.msra.mxu0 %v3274_v21  ;;  %v3263_v53 = vld [vmem:[%s5160_s7 + $0x1a0] sm:$0xff] }
 0x80b   : > { %1658 = vmatpush.msra.mxu0 %v3273_v22 }
 0x80c   : > { %v1516_v57 = vpop.f32.mrf.mxu2  ;;  %1537 = vmatmul.f32.vlgmr.msrb.gmra.mxu3 %v1417_v55  ;;  %v3261_v55 = vld [vmem:[%s5160_s7 + $0x190] sm:$0xff] }
 0x80d   : > { %v1517_v58 = vadd.f32 %v1516_v57, %v1389_v54  ;;  %1659 = vmatpush.msra.mxu0 %v3272_v24  ;;  %v3262_v54 = vld [vmem:[%s5160_s7 + $0x198] sm:$0xff]  ;;  %v3259_v57 = vld [vmem:[%s5160_s7 + $0x180] sm:$0xff] }
 0x80e   : > { %v1496_v60 = vpop.f32.mrf.mxu1 }
 0x80f   : > { %v1497_v62 = vadd.f32 %v1496_v60, %v1388_v56  ;;  %1652 = vmatpush.msra.mxu3 %v1517_v58  ;;  %1660 = vmatpush.msra.mxu0 %v3271_v26  ;;  %v3260_v56 = vld [vmem:[%s5160_s7 + $0x188] sm:$0xff]  ;;  %v3489_v60 = vld [vmem:[%s5161_s9 + $0x1] ss:$0 sm:$0xff]  ;;  %v3299_v26 = vld [vmem:[%s5111_s14 + $0x78] sm:$0xff] }
 0x811   : > { %1616 = vmatpush.xpose.msrb.mxu2 %v1497_v62  ;;  %1661 = vmatpush.msra.mxu0 %v3270_v28  ;;  %v3297_v28 = vld [vmem:[%s5111_s14 + $0x68] sm:$0xff] }
 0x812   : > { %1780 = vmatpush.msrb.mxu3 %v3299_v26 }
 0x813   : > { %1662 = vmatpush.msra.mxu0 %v3269_v30  ;;  %v3295_v30 = vld [vmem:[%s5111_s14 + $0x58] sm:$0xff] }
 0x814   : > { %1617 = vmatmul.f32.vlgmr.msrb.gmra.mxu2 %v1477_v63 }
 0x815   : > { %1663 = vmatpush.msra.mxu0 %v3268_v32  ;;  %v3293_v32 = vld [vmem:[%s5111_s14 + $0x48] sm:$0xff] }
 0x817   : > { %1664 = vmatpush.msra.mxu0 %v3267_v35 }
 0x819   : > { %1665 = vmatpush.msra.mxu0 %v3266_v49 }
 0x81b   : > { %1666 = vmatpush.msra.mxu0 %v3265_v50 }
 0x81d   : > { %1667 = vmatpush.msra.mxu0 %v3264_v51 }
 0x81f   : > { %1668 = vmatpush.msra.mxu0 %v3263_v53 }
 0x821   : > { %1669 = vmatpush.msra.mxu0 %v3262_v54 }
 0x823   : > { %1670 = vmatpush.msra.mxu0 %v3261_v55 }
 0x825   : > { %1671 = vmatpush.msra.mxu0 %v3260_v56 }
 0x827   : > { %1672 = vmatpush.msra.mxu0 %v3259_v57 }
 0x88f   : > { %v1538_v0 = vpop.f32.mrf.mxu3 }
 0x890   : > { %v1541_v1 = vmul.f32 0.25, %v1538_v0 }
 0x892   : > { %v1542_v2 = vadd.f32 %v3985_v9, %v1541_v1 }
 0x894   : > { %v1543_v3 = vsel %vm1045_vm5, %v1542_v2, -inf }
 0x895   : > { %1544 = vmax.xlane.f32.xlu2 %v1543_v3 }
 0x897   : > { %v1618_v4 = vpop.f32.mrf.mxu2 }
 0x898   : > { %v1621_v5 = vmul.f32 0.25, %v1618_v4 }
 0x89a   : > { %v1622_v6 = vadd.f32 %v3985_v9, %v1621_v5  ;;  %v3258_v9 = vld [vmem:[%s5160_s7 + $0x178] sm:$0xff] }
 0x89b   : > { %1577 = vmatpush.msrb.mxu1 %v3258_v9 }
 0x89c   : > { %v1623_v7 = vsel %vm1045_vm5, %v1622_v6, -inf }
 0x89d   : > { %1624 = vmax.xlane.f32.xlu1 %v1623_v7  ;;  %1578 = vmatpush.msrb.mxu1 %v3257_v52 }
 0x89f   : > { %1579 = vmatpush.msrb.mxu1 %v3256_v20  ;;  %v3490_v20 = vld [vmem:[%s5107_s10 + $0x1] ss:$0 sm:$0xff] }
 0x8a1   : > { %1580 = vmatpush.msrb.mxu1 %v3255_v23  ;;  %v3491_v23 = vld [vmem:[%s5108_s11 + $0x1] ss:$0 sm:$0xff] }
 0x8a3   : > { %1581 = vmatpush.msrb.mxu1 %v3254_v25 }
 0x8a5   : > { %1582 = vmatpush.msrb.mxu1 %v3253_v27  ;;  %v3298_v27 = vld [vmem:[%s5111_s14 + $0x70] sm:$0xff] }
 0x8a6   : > { %1781 = vmatpush.msrb.mxu3 %v3298_v27  ;;  %v3667_v27 = vmov 4  }
 0x8a7   : > { %1583 = vmatpush.msrb.mxu1 %v3252_v29  ;;  %v3296_v29 = vld [vmem:[%s5111_s14 + $0x60] sm:$0xff] }
 0x8a8   : > { %1782 = vmatpush.msrb.mxu3 %v3297_v28  ;;  %v3668_v28 = vmov 5  }
 0x8a9   : > { %1584 = vmatpush.msrb.mxu1 %v3251_v31  ;;  %v3294_v31 = vld [vmem:[%s5111_s14 + $0x50] sm:$0xff] }
 0x8aa   : > { %1783 = vmatpush.msrb.mxu3 %v3296_v29  ;;  %v3669_v29 = vmov 7  }
 0x8ab   : > { %1585 = vmatpush.msrb.mxu1 %v3250_v34  ;;  %v3492_v34 = vld [vmem:[%s5110_s13 + $0x1] ss:$0 sm:$0xff] }
 0x8ac   : > { %1784 = vmatpush.msrb.mxu3 %v3295_v30 }
 0x8ad   : > { %1586 = vmatpush.msrb.mxu1 %v3249_v36 }
 0x8ae   : > { %1785 = vmatpush.msrb.mxu3 %v3294_v31  ;;  %v3670_v31 = vmov 6  }
 0x8af   : > { %1587 = vmatpush.msrb.mxu1 %v3248_v37 }
 0x8b0   : > { %1786 = vmatpush.msrb.mxu3 %v3293_v32  ;;  %v4500_v32 = vld [vmem:[%s4493_s24] sm:$0x1] }
 0x8b1   : > { %1588 = vmatpush.msrb.mxu1 %v3247_v38 }
 0x8b3   : > { %1589 = vmatpush.msrb.mxu1 %v3246_v43 }
 0x8b5   : > { %1590 = vmatpush.msrb.mxu1 %v3245_v44 }
 0x8b7   : > { %1591 = vmatpush.msrb.mxu1 %v3244_v45 }
 0x8b9   : > { %1592 = vmatpush.msrb.mxu1 %v3243_v48 }
 0x908   : > { %v1545_v10 = vpop.xlane.xlu2 %1544 }
 0x909   : > { %v1546_v11 = vsub.f32 %v1542_v2, %v1545_v10  ;;  %v3289_v10 = vld [vmem:[%s5109_s12 + $0x38] sm:$0xff] }
 0x90a   : > { %1738 = vmatpush.msra.mxu2 %v3289_v10 }
 0x90b   : > { %v1547_v12 = vmul.f32 1.442695, %v1546_v11  ;;  %v3287_v11 = vld [vmem:[%s5109_s12 + $0x28] sm:$0xff] }
 0x90d   : > { %3515 = vpow2.f32 %v1547_v12  ;;  %v3286_v12 = vld [vmem:[%s5109_s12 + $0x20] sm:$0xff] }
 0x910   : > { %v1625_v13 = vpop.xlane.xlu1 %1624 }
 0x911   : > { %v1626_v14 = vsub.f32 %v1622_v6, %v1625_v13 }
 0x913   : > { %v3516_v15 = vpop.eup %3515  ;;  %v1627_v16 = vmul.f32 1.442695, %v1626_v14 }
 0x914   : > { %v1549_v17 = vsel %vm1045_vm5, %v3516_v15, 0.0 }
 0x915   : > { %3517 = vpow2.f32 %v1627_v16  ;;  %1550 = vadd.xlane.f32.xlu1 %v1549_v17 }
 0x91b   : > { %v3518_v18 = vpop.eup %3517 }
 0x91c   : > { %v1629_v19 = vsel %vm1045_vm5, %v3518_v18, 0.0 }
 0x91d   : > { %1630 = vadd.xlane.f32.xlu0 %v1629_v19 }
 0x988   : > { %v1551_v33 = vpop.xlane.xlu1 %1550 }
 0x989   : > { %3519 = vrcp.f32 %v1551_v33  ;;  %v3292_v33 = vld [vmem:[%s5111_s14 + $0x40] sm:$0xff] }
 0x98a   : > { %1787 = vmatpush.msrb.mxu3 %v3292_v33 }
 0x98f   : > { %v3520_v40 = vpop.eup %3519 }
 0x990   : > { %v1553_v41 = vmul.f32 %v3520_v40, %v3516_v15  ;;  %v1631_v42 = vpop.xlane.xlu0 %1630 }
 0x991   : > { %3521 = vrcp.f32 %v1631_v42 }
 0x992   : > { %3282 = vmatmul.msk.f32.vlgmr.msrb.gmra.mxu0 %vm1045_vm5, %v1553_v41 }
 0x997   : > { %v3522_v46 = vpop.eup %3521 }
 0x998   : > { %v1633_v47 = vmul.f32 %v3522_v46, %v3518_v18 }
 0x99a   : > { %3283 = vmatmul.msk.f32.vlgmr.msra.gmra.mxu3 %vm1045_vm5, %v1633_v47  ;;  %v3493_v47 = vld [vmem:[%s5112_s15 + $0x1] ss:$0 sm:$0xff] }
 0xa0f   : > { %v1574_v58 = vpop.f32.mrf.mxu0 }
 0xa10   : > { %1593 = vmatmul.f32.vlgmr.msrb.gmra.mxu1 %v1574_v58  ;;  %v1830_v58 = vld [vmem:[%s5115_s18 + $0x18] sm:$0xff] }
 0xa1d   : > { %v1654_v59 = vpop.f32.mrf.mxu3 }
 0xa1e   : > { %1673 = vmatmul.f32.vlgmr.msra.gmra.mxu0 %v1654_v59  ;;  %v1829_v59 = vld [vmem:[%s5115_s18 + $0x10] sm:$0xff] }
 0xa8d   : > { %v1594_v61 = vpop.f32.mrf.mxu1 }
 0xa8e   : > { %v1600_v62 = vadd.f32 %v3489_v60, %v1594_v61  ;;  %v1828_v60 = vld [vmem:[%s5115_s18 + $0x8] sm:$0xff]  ;;  %v1827_v61 = vld [vmem:[%s5115_s18] sm:$0xff] }
 0xa9b   : > { %v1674_v63 = vpop.f32.mrf.mxu0 }
 0xa9c   : > { %v1677_v0 = vadd.f32 %v1674_v63, %v1600_v62  ;;  %v1864_v62 = vlaneseq }
 0xa9e   : > { %v1678_v1 = vadd.f32 %v1677_v0, %v4223_v39  ;;  %v3288_v39 = vld [vmem:[%s5109_s12 + $0x30] sm:$0xff]  ;;  %v4430_v63 = vshrl.u32 %v1864_v62, 7 }
 0xa9f   : > { %1739 = vmatpush.msra.mxu2 %v3288_v39  ;;  %v3494_v39 = vld [vmem:[%s5113_s16 + $0x1] ss:$0 sm:$0xff] }
 0xaa0   : > { %v1683_v2 = vsel %vm787_vm0, %v1678_v1, 0.0  ;;  %3397 = vset.pattern.permute.xlu0 %v4430_v63 }
 0xaa1   : > { %1684 = vadd.xlane.f32.xlu2 %v1683_v2  ;;  %1740 = vmatpush.msra.mxu2 %v3287_v11 }
 0xaa3   : > { %1741 = vmatpush.msra.mxu2 %v3286_v12  ;;  %v3495_v12 = vld [vmem:[%s5114_s17 + $0x1] ss:$0 sm:$0xff] }
 0xaa5   : > { %1850 = vmatpush.msrb.mxu2 %v1830_v58 }
 0xaa7   : > { %1851 = vmatpush.msrb.mxu2 %v1829_v59 }
 0xaa9   : > { %1852 = vmatpush.msrb.mxu2 %v1828_v60 }
 0xaab   : > { %1853 = vmatpush.msrb.mxu2 %v1827_v61 }
 0xb14   : > { %v1685_v3 = vpop.xlane.xlu2 %1684 }
 0xb15   : > { %v1686_v4 = vmul.f32 %v1685_v3, %v3876_v8 }
 0xb17   : > { %v1687_v5 = vsub.f32 %v1678_v1, %v1686_v4 }
 0xb19   : > { %v1688_v6 = vmul.f32 %v1687_v5, %v1687_v5 }
 0xb1b   : > { %v1689_v7 = vsel %vm787_vm0, %v1688_v6, 0.0 }
 0xb1c   : > { %1690 = vadd.xlane.f32.xlu0 %v1689_v7 }
 0xb8f   : > { %v1691_v13 = vpop.xlane.xlu0 %1690 }
 0xb90   : > { %v1692_v14 = vmul.f32 %v1691_v13, %v3876_v8 }
 0xb92   : > { %v1693_v15 = vadd.f32 1e-12, %v1692_v14 }
 0xb94   : > { %3523 = vrsqrt.f32 %v1693_v15  ;;  %vm1700_vm14 = vweird.f32 %v1693_v15 }
 0xb9a   : > { %v3524_v16 = vpop.eup %3523 }
 0xb9b   : > { %v1695_v17 = vmul.f32 %v3524_v16, %v1693_v15  ;;  %vm1701_vm13 = vweird.f32 %v3524_v16  ;;  %v3662_v15 = vmov 2  }
 0xb9c   : > { %vm1702_vm15 = vmor %vm1700_vm14, %vm1701_vm13  ;;  %3400 = vset.pattern.permute.xlu1 %v3662_v15 }
 0xb9d   : > { %v1696_v18 = vmul.f32 %v3524_v16, %v1695_v17  ;;  %v1860_v17 = vld [vmem:[%s4447_s28] sm:$0x1] }
 0xb9f   : > { %v1697_v19 = vmul.f32 0.5, %v1696_v18 }
 0xba1   : > { %v1698_v9 = vsub.f32 1.5, %v1697_v19  ;;  %v1861_v19 = vld [vmem:[%s5117_s20] sm:$0x1] }
 0xba3   : > { %v1699_v52 = vmul.f32 %v3524_v16, %v1698_v9 }
 0xba5   : > { %v1703_v21 = vsel %vm1702_vm15, %v3524_v16, %v1699_v52  ;;  %v3496_v16 = vld [vmem:[%s5116_s19] ss:$0 sm:$0xff] }
 0xba6   : > { %v1704_v22 = vmul.f32 %v1703_v21, %v1687_v5 }
 0xba8   : > { %v1708_v24 = vmul.f32 %v3490_v20, %v1704_v22  ;;  %v3664_v22 = vmov 0  }
 0xbaa   : > { %v1712_v25 = vadd.f32 %v3491_v23, %v1708_v24  ;;  %v3665_v24 = vmov 1  }
 0xbab   : > { %3398 = vset.pattern.permute.xlu2 %v3665_v24 }
 0xbac   : > { %3291 = vmatmul.msk.f32.vlgmr.msra.gmra.mxu2 %vm787_vm0, %v1712_v25 }
 0xc2f   : > { %v1743_v35 = vpop.f32.mrf.mxu2 }
 0xc30   : > { %v1744_v36 = vadd.f32 %v3492_v34, %v1743_v35  ;;  %v4518_v35 = vld [vmem:[%s5119_s22] sm:$0xf] }
 0xc32   : > { %v1747_v37 = vmul.f32 0.044715, %v1744_v36  ;;  %v1746_v44 = vmul.f32 0.5, %v1744_v36 }
 0xc34   : > { %v1748_v38 = vmul.f32 %v1747_v37, %v1744_v36 }
 0xc36   : > { %v1749_v40 = vmul.f32 %v1748_v38, %v1744_v36 }
 0xc38   : > { %v1750_v41 = vadd.f32 %v1749_v40, %v1744_v36 }
 0xc3a   : > { %v1751_v42 = vmul.f32 0.7978846, %v1750_v41 }
 0xc3c   : > { %3525 = vtanh.f32 %v1751_v42 }
 0xc42   : > { %v3526_v43 = vpop.eup %3525 }
 0xc43   : > { %v1753_v45 = vadd.f32 1.0, %v3526_v43 }
 0xc45   : > { %v1754_v46 = vmul.f32 %v1753_v45, %v1746_v44 }
 0xc47   : > { %3301 = vmatmul.msk.f32.vlgmr.msrb.gmra.mxu3 %vm1266_vm9, %v1754_v46 }
 0xcca   : > { %v1789_v48 = vpop.f32.mrf.mxu3 }
 0xccb   : > { %v1790_v49 = vadd.f32 %v3493_v47, %v1789_v48 }
 0xccd   : > { %v1792_v50 = vadd.f32 %v1790_v49, %v1712_v25  ;;  %v3666_v25 = vmov 3  }
 0xccf   : > { %v1797_v51 = vsel %vm787_vm0, %v1792_v50, 0.0 }
 0xcd0   : > { %1798 = vadd.xlane.f32.xlu1 %v1797_v51 }
 0xd43   : > { %v1799_v53 = vpop.xlane.xlu1 %1798 }
 0xd44   : > { %v1800_v54 = vmul.f32 %v1799_v53, %v3876_v8 }
 0xd46   : > { %v1801_v55 = vsub.f32 %v1792_v50, %v1800_v54 }
 0xd48   : > { %v1802_v56 = vmul.f32 %v1801_v55, %v1801_v55 }
 0xd4a   : > { %v1803_v57 = vsel %vm787_vm0, %v1802_v56, 0.0 }
 0xd4b   : > { %1804 = vadd.xlane.f32.xlu2 %v1803_v57 }
 0xdbe   : > { %v1805_v0 = vpop.xlane.xlu2 %1804 }
 0xdbf   : > { %v1806_v1 = vmul.f32 %v1805_v0, %v3876_v8 }
 0xdc1   : > { %v1807_v2 = vadd.f32 1e-12, %v1806_v1  ;;  %v4530_v1 = vand.u32 127, %v1864_v62 }
 0xdc3   : > { %3527 = vrsqrt.f32 %v1807_v2  ;;  %vm1814_vm2 = vweird.f32 %v1807_v2 }
 0xdc9   : > { %v3528_v3 = vpop.eup %3527 }
 0xdca   : > { %v1809_v4 = vmul.f32 %v3528_v3, %v1807_v2  ;;  %vm1815_vm1 = vweird.f32 %v3528_v3 }
 0xdcb   : > { %vm1816_vm3 = vmor %vm1814_vm2, %vm1815_vm1  ;;  %vm1902_vm1 = vcmask 31744  }
 0xdcc   : > { %v1810_v5 = vmul.f32 %v3528_v3, %v1809_v4 }
 0xdce   : > { %v1811_v6 = vmul.f32 0.5, %v1810_v5 }
 0xdd0   : > { %v1812_v7 = vsub.f32 1.5, %v1811_v6 }
 0xdd2   : > { %v1813_v10 = vmul.f32 %v3528_v3, %v1812_v7 }
 0xdd4   : > { %v1817_v8 = vsel %vm1816_vm3, %v3528_v3, %v1813_v10  ;;  %v3671_v10 = vmov 0.0   ;;  %vm1991_vm3 = vcmask 25601  }
 0xdd5   : > { %v1818_v11 = vmul.f32 %v1817_v8, %v1801_v55 }
 0xdd7   : > { %v1822_v13 = vmul.f32 %v3494_v39, %v1818_v11 }
 0xdd9   : > { %v1826_v14 = vadd.f32 %v3495_v12, %v1822_v13 }
 0xddb   : > { %3304 = vmatmul.msk.f32.vlgmr.msrb.gmra.mxu2 %vm787_vm0, %v1826_v14  ;;  %vm1956_vm0 = vcmp.gt.f32.partialorder %v1860_v17, 0.0 }
 0xddc   : > { %v4471_v23 = vsel %vm1956_vm0, 1, %v3664_v22 }
 0xddd   : > { %1959 = vperm.xlu2 %3398, %v4471_v23  }
 0xde5   : > { %3399 = vset.pattern.permute.xlu2 %v4430_v63 }
 0xe37   : > { %v1960_v3 = vpop.permute.xlu2 %1959 }
 0xe38   : > { %v1961_v5 = vperm.slane %v1960_v3, 0 }
 0xe3a   : > { %vm4538_vm6 = vcmp.eq.s32.totalorder %v1961_v5, 1 }
 0xe5e   : > { %v1855_v18 = vpop.f32.mrf.mxu2 }
 0xe5f   : > { %v4458_v9 = vadd.f32 %v3496_v16, %v1855_v18 }
 0xe61   : > { %v1930_v52 = vperm.slane %v4458_v9, 0  ;;  %v4462_v20 = vadd.f32 %v1861_v19, %v4458_v9  ;;  %1858 = vst [vmem:[%s4464_s30] sm:$0xff] %v4458_v9  ;;  %v2012_v26 = vperm.slane %v4458_v9, 1  ;;  %v2167_v30 = vperm.slane %v4458_v9, 2 }
 0xe62   : > { %v2477_v33 = vperm.slane %v4458_v9, 4  ;;  %v2322_v34 = vperm.slane %v4458_v9, 3 }
 0xe63   : > { %1932 = vrot.lane.b32.xlu1 %v1930_v52, %s3663_s25  ;;  %v1922_v21 = vperm.slane %v4462_v20, 0 }
 0xe65   : > { %1927 = vperm.xlu0 %3397, %v1922_v21  }
 0xe6b   : > { %2035 = vperm.xlu1 %3400, %v4471_v23  }
 0xe6d   : > { %3401 = vset.pattern.permute.xlu0 %v3666_v25 }
 0xe6e   : > { %2114 = vperm.xlu0 %3401, %v4471_v23  }
 0xe73   : > { %2089 = vrot.lane.b32.xlu1 %v2012_v26, %s3663_s25 }
 0xe74   : > { %3402 = vset.pattern.permute.xlu1 %v3667_v27 }
 0xe76   : > { %3403 = vset.pattern.permute.xlu0 %v3668_v28 }
 0xe77   : > { %2269 = vperm.xlu0 %3403, %v4471_v23  }
 0xe7b   : > { %2190 = vperm.xlu1 %3402, %v4471_v23  }
 0xe7f   : > { %3405 = vset.pattern.permute.xlu0 %v3669_v29 }
 0xe80   : > { %2424 = vperm.xlu0 %3405, %v4471_v23  }
 0xe83   : > { %2244 = vrot.lane.b32.xlu1 %v2167_v30, %s3663_s25 }
 0xe84   : > { %3404 = vset.pattern.permute.xlu1 %v3670_v31 }
 0xe88   : > { %3408 = vset.pattern.permute.xlu0 %v3665_v24 }
 0xe89   : > { %1880 = vperm.xlu0 %3408, %v4500_v32  }
 0xe8b   : > { %2345 = vperm.xlu1 %3404, %v4471_v23  }
 0xe91   : > { %2554 = vrot.lane.b32.xlu0 %v2477_v33, %s3663_s25 }
 0xe92   : > { %3417 = vset.pattern.permute.xlu0 %v4430_v63 }
 0xe93   : > { %2399 = vrot.lane.b32.xlu1 %v2322_v34, %s3663_s25 }
 0xe99   : > { %1907 = vrot.lane.b32.xlu0 %v4458_v9, %s3663_s25 }
 0xed5   : > { %v1933_v38 = vpop.permute.xlu1 %1932 }
 0xed7   : > { %v1928_v36 = vpop.permute.xlu0 %1927 }
 0xed8   : > { %v1929_v37 = vadd.f32 %v1928_v36, %v4518_v35 }
 0xeda   : > { %v1935_v40 = vadd.f32 %v1933_v38, %v1929_v37 }
 0xedc   : > { %v1936_v41 = vsel %vm1893_vm4, %v1935_v40, -inf }
 0xedd   : > { %v1937_v42 = vrot.slane %v1936_v41, 4 }
 0xedf   : > { %v1938_v43 = vmax.f32 %v1936_v41, %v1937_v42 }
 0xee0   : > { %v4522_v44 = vpop.permute.xlu0 %2114 }
 0xee1   : > { %v1939_v45 = vrot.slane %v1938_v43, 2 }
 0xee3   : > { %v1940_v46 = vmax.f32 %v1938_v43, %v1939_v45 }
 0xee5   : > { %v1941_v47 = vrot.slane %v1940_v46, 1 }
 0xee7   : > { %v1942_v48 = vmax.f32 %v1940_v46, %v1941_v47 }
 0xee9   : > { %v1943_v49 = vsub.f32 %v1935_v40, %v1942_v48  ;;  %v4524_v50 = vpop.permute.xlu0 %2269 }
 0xeeb   : > { %v1944_v51 = vmul.f32 1.442695, %v1943_v49 }
 0xeed   : > { %3529 = vpow2.f32 %v1944_v51 }
 0xef2   : > { %v4526_v53 = vpop.permute.xlu0 %2424 }
 0xef3   : > { %v3530_v54 = vpop.eup %3529 }
 0xef4   : > { %v1946_v55 = vsel %vm1893_vm4, %v3530_v54, 0.0  ;;  %v2036_v54 = vpop.permute.xlu1 %2035 }
 0xef5   : > { %v1947_v56 = vrot.slane %v1946_v55, 4 }
 0xef7   : > { %v1948_v57 = vadd.f32 %v1947_v56, %v1946_v55  ;;  %v2037_v55 = vperm.slane %v2036_v54, 0 }
 0xef9   : > { %v1949_v58 = vrot.slane %v1948_v57, 2  ;;  %vm4552_vm8 = vcmp.eq.s32.totalorder %v2037_v55, 1 }
 0xefb   : > { %v1881_v59 = vpop.permute.xlu0 %1880  ;;  %v1950_v60 = vadd.f32 %v1949_v58, %v1948_v57 }
 0xefc   : > { %v1882_v2 = vperm.slane %v1881_v59, 0  ;;  %v2090_v3 = vpop.permute.xlu1 %2089 }
 0xefd   : > { %v1951_v61 = vrot.slane %v1950_v60, 1 }
 0xefe   : > { %vm1883_vm5 = vcmp.eq.s32.totalorder %v1882_v2, %v4530_v1 }
 0xeff   : > { %v1952_v0 = vadd.f32 %v1951_v61, %v1950_v60  ;;  %v4536_v39 = vsel %vm1883_vm5, 1.0, %v3671_v10 }
 0xf01   : > { %3531 = vlog2.f32 %v1952_v0 }
 0xf03   : > { %v4532_v4 = vpop.permute.xlu0 %2554 }
 0xf07   : > { %v3532_v6 = vpop.eup %3531 }
 0xf08   : > { %v1954_v7 = vmul.f32 0.6931472, %v3532_v6 }
 0xf0a   : > { %v1955_v11 = vadd.f32 %v1954_v7, %v1942_v48 }
 0xf0b   : > { %v1908_v62 = vpop.permute.xlu0 %1907 }
 0xf0c   : > { %v1963_v12 = vsel %vm4538_vm6, %v1955_v11, %v4462_v20  ;;  %v1910_v13 = vmul.f32 %v4536_v39, %v1908_v62 }
 0xf0d   : > { %v2004_v14 = vperm.slane %v1963_v12, 0 }
 0xf0e   : > { %v1911_v16 = vsel %vm1875_vm7, %v1910_v13, 0.0 }
 0xf0f   : > { %1912 = vadd.xlane.f32.xlu0 %v1911_v16  ;;  %2009 = vperm.xlu2 %3399, %v2004_v14  }
 0xf69   : > { %v2010_v17 = vpop.permute.xlu2 %2009 }
 0xf6a   : > { %v2011_v18 = vadd.f32 %v2010_v17, %v4518_v35 }
 0xf6c   : > { %v2013_v19 = vadd.f32 %v2012_v26, %v2011_v18 }
 0xf6e   : > { %v2014_v52 = vsel %vm1893_vm4, %v2013_v19, -inf }
 0xf6f   : > { %v2015_v21 = vrot.slane %v2014_v52, 4 }
 0xf71   : > { %v2016_v24 = vmax.f32 %v2014_v52, %v2015_v21 }
 0xf73   : > { %v2017_v36 = vrot.slane %v2016_v24, 2 }
 0xf75   : > { %v2018_v37 = vmax.f32 %v2016_v24, %v2017_v36 }
 0xf77   : > { %v2019_v38 = vrot.slane %v2018_v37, 1 }
 0xf79   : > { %v2020_v40 = vmax.f32 %v2018_v37, %v2019_v38 }
 0xf7b   : > { %v2021_v41 = vsub.f32 %v2013_v19, %v2020_v40 }
 0xf7d   : > { %v2022_v42 = vmul.f32 1.442695, %v2021_v41 }
 0xf7f   : > { %3533 = vpow2.f32 %v2022_v42 }
 0xf85   : > { %v3534_v43 = vpop.eup %3533 }
 0xf86   : > { %v2024_v45 = vsel %vm1893_vm4, %v3534_v43, 0.0 }
 0xf87   : > { %v2025_v46 = vrot.slane %v2024_v45, 4 }
 0xf89   : > { %v2026_v47 = vadd.f32 %v2025_v46, %v2024_v45 }
 0xf8b   : > { %v2027_v48 = vrot.slane %v2026_v47, 2 }
 0xf8d   : > { %v2028_v49 = vadd.f32 %v2027_v48, %v2026_v47 }
 0xf8f   : > { %v2029_v51 = vrot.slane %v2028_v49, 1 }
 0xf91   : > { %v2030_v26 = vadd.f32 %v2029_v51, %v2028_v49 }
 0xf93   : > { %3535 = vlog2.f32 %v2030_v26 }
 0xf99   : > { %v3536_v56 = vpop.eup %3535 }
 0xf9a   : > { %v2032_v57 = vmul.f32 0.6931472, %v3536_v56 }
 0xf9c   : > { %v2033_v59 = vadd.f32 %v2032_v57, %v2020_v40  ;;  %v2116_v40 = vperm.slane %v4522_v44, 0 }
 0xf9e   : > { %v2039_v60 = vsel %vm4552_vm8, %v2033_v59, %v1963_v12  ;;  %vm4562_vm9 = vcmp.eq.s32.totalorder %v2116_v40, 1 }
 0xf9f   : > { %v2080_v61 = vperm.slane %v2039_v60, 0 }
 0xfa1   : > { %2085 = vperm.xlu2 %3399, %v2080_v61  }
 0xffb   : > { %v2086_v0 = vpop.permute.xlu2 %2085 }
 0xffc   : > { %v2087_v2 = vadd.f32 %v2086_v0, %v4518_v35 }
 0xffe   : > { %v2092_v5 = vadd.f32 %v2090_v3, %v2087_v2 }
0x1000   : > { %v2093_v6 = vsel %vm1893_vm4, %v2092_v5, -inf }
0x1001   : > { %v2094_v7 = vrot.slane %v2093_v6, 4 }
0x1003   : > { %v2095_v11 = vmax.f32 %v2093_v6, %v2094_v7 }
0x1005   : > { %v2096_v62 = vrot.slane %v2095_v11, 2 }
0x1007   : > { %v2097_v13 = vmax.f32 %v2095_v11, %v2096_v62  ;;  %v2191_v62 = vpop.permute.xlu1 %2190 }
0x1009   : > { %v2098_v14 = vrot.slane %v2097_v13, 1 }
0x100b   : > { %v2099_v16 = vmax.f32 %v2097_v13, %v2098_v14  ;;  %v2192_v13 = vperm.slane %v2191_v62, 0 }
0x100d   : > { %v2100_v17 = vsub.f32 %v2092_v5, %v2099_v16  ;;  %vm4573_vm10 = vcmp.eq.s32.totalorder %v2192_v13, 1 }
0x100f   : > { %v2101_v18 = vmul.f32 1.442695, %v2100_v17 }
0x1011   : > { %3537 = vpow2.f32 %v2101_v18 }
0x1017   : > { %v3538_v19 = vpop.eup %3537 }
0x1018   : > { %v2103_v12 = vsel %vm1893_vm4, %v3538_v19, 0.0 }
0x1019   : > { %v2104_v52 = vrot.slane %v2103_v12, 4 }
0x101b   : > { %v2105_v21 = vadd.f32 %v2104_v52, %v2103_v12 }
0x101d   : > { %v2106_v24 = vrot.slane %v2105_v21, 2 }
0x101f   : > { %v2107_v36 = vadd.f32 %v2106_v24, %v2105_v21  ;;  %v2245_v24 = vpop.permute.xlu1 %2244 }
0x1021   : > { %v2108_v37 = vrot.slane %v2107_v36, 1 }
0x1023   : > { %v2109_v38 = vadd.f32 %v2108_v37, %v2107_v36 }
0x1025   : > { %3539 = vlog2.f32 %v2109_v38 }
0x102b   : > { %v3540_v41 = vpop.eup %3539 }
0x102c   : > { %v2111_v42 = vmul.f32 0.6931472, %v3540_v41 }
0x102e   : > { %v2112_v45 = vadd.f32 %v2111_v42, %v2099_v16 }
0x1030   : > { %v2118_v46 = vsel %vm4562_vm9, %v2112_v45, %v2039_v60 }
0x1031   : > { %v2159_v47 = vperm.slane %v2118_v46, 0 }
0x1033   : > { %2164 = vperm.xlu2 %3399, %v2159_v47  }
0x108d   : > { %v2165_v48 = vpop.permute.xlu2 %2164 }
0x108e   : > { %v2166_v49 = vadd.f32 %v2165_v48, %v4518_v35 }
0x1090   : > { %v2168_v51 = vadd.f32 %v2167_v30, %v2166_v49 }
0x1092   : > { %v2169_v44 = vsel %vm1893_vm4, %v2168_v51, -inf }
0x1093   : > { %v2170_v26 = vrot.slane %v2169_v44, 4 }
0x1095   : > { %v2171_v54 = vmax.f32 %v2169_v44, %v2170_v26 }
0x1097   : > { %v2172_v55 = vrot.slane %v2171_v54, 2 }
0x1099   : > { %v2173_v56 = vmax.f32 %v2171_v54, %v2172_v55 }
0x109b   : > { %v2174_v57 = vrot.slane %v2173_v56, 1 }
0x109d   : > { %v2175_v59 = vmax.f32 %v2173_v56, %v2174_v57 }
0x109f   : > { %v2176_v61 = vsub.f32 %v2168_v51, %v2175_v59 }
0x10a1   : > { %v2177_v0 = vmul.f32 1.442695, %v2176_v61 }
0x10a3   : > { %3541 = vpow2.f32 %v2177_v0 }
0x10a9   : > { %v3542_v60 = vpop.eup %3541 }
0x10aa   : > { %v2179_v2 = vsel %vm1893_vm4, %v3542_v60, 0.0 }
0x10ab   : > { %v2180_v3 = vrot.slane %v2179_v2, 4 }
0x10ad   : > { %v2181_v5 = vadd.f32 %v2180_v3, %v2179_v2 }
0x10af   : > { %v2182_v6 = vrot.slane %v2181_v5, 2 }
0x10b1   : > { %v2183_v7 = vadd.f32 %v2182_v6, %v2181_v5 }
0x10b3   : > { %v2184_v11 = vrot.slane %v2183_v7, 1 }
0x10b5   : > { %v2185_v30 = vadd.f32 %v2184_v11, %v2183_v7 }
0x10b7   : > { %3543 = vlog2.f32 %v2185_v30 }
0x10bd   : > { %v3544_v14 = vpop.eup %3543 }
0x10be   : > { %v2187_v16 = vmul.f32 0.6931472, %v3544_v14 }
0x10c0   : > { %v2188_v18 = vadd.f32 %v2187_v16, %v2175_v59  ;;  %v2271_v59 = vperm.slane %v4524_v50, 0 }
0x10c2   : > { %v2194_v19 = vsel %vm4573_vm10, %v2188_v18, %v2118_v46  ;;  %vm4583_vm11 = vcmp.eq.s32.totalorder %v2271_v59, 1 }
0x10c3   : > { %v2235_v12 = vperm.slane %v2194_v19, 0 }
0x10c5   : > { %2240 = vperm.xlu2 %3399, %v2235_v12  }
0x111f   : > { %v2241_v52 = vpop.permute.xlu2 %2240 }
0x1120   : > { %v2242_v21 = vadd.f32 %v2241_v52, %v4518_v35 }
0x1122   : > { %v2247_v36 = vadd.f32 %v2245_v24, %v2242_v21 }
0x1124   : > { %v2248_v37 = vsel %vm1893_vm4, %v2247_v36, -inf }
0x1125   : > { %v2249_v38 = vrot.slane %v2248_v37, 4 }
0x1127   : > { %v2250_v40 = vmax.f32 %v2248_v37, %v2249_v38 }
0x1129   : > { %v2251_v41 = vrot.slane %v2250_v40, 2 }
0x112b   : > { %v2252_v42 = vmax.f32 %v2250_v40, %v2251_v41  ;;  %v2346_v41 = vpop.permute.xlu1 %2345 }
0x112d   : > { %v2253_v45 = vrot.slane %v2252_v42, 1 }
0x112f   : > { %v2254_v47 = vmax.f32 %v2252_v42, %v2253_v45  ;;  %v2347_v42 = vperm.slane %v2346_v41, 0 }
0x1131   : > { %v2255_v48 = vsub.f32 %v2247_v36, %v2254_v47  ;;  %vm4594_vm12 = vcmp.eq.s32.totalorder %v2347_v42, 1 }
0x1133   : > { %v2256_v49 = vmul.f32 1.442695, %v2255_v48 }
0x1135   : > { %3545 = vpow2.f32 %v2256_v49 }
0x113b   : > { %v3546_v51 = vpop.eup %3545 }
0x113c   : > { %v2258_v46 = vsel %vm1893_vm4, %v3546_v51, 0.0 }
0x113d   : > { %v2259_v44 = vrot.slane %v2258_v46, 4 }
0x113f   : > { %v2260_v26 = vadd.f32 %v2259_v44, %v2258_v46 }
0x1141   : > { %v2261_v54 = vrot.slane %v2260_v26, 2 }
0x1143   : > { %v2262_v55 = vadd.f32 %v2261_v54, %v2260_v26  ;;  %v2400_v54 = vpop.permute.xlu1 %2399 }
0x1145   : > { %v2263_v56 = vrot.slane %v2262_v55, 1 }
0x1147   : > { %v2264_v57 = vadd.f32 %v2263_v56, %v2262_v55 }
0x1149   : > { %3547 = vlog2.f32 %v2264_v57 }
0x114f   : > { %v3548_v61 = vpop.eup %3547 }
0x1150   : > { %v2266_v0 = vmul.f32 0.6931472, %v3548_v61 }
0x1152   : > { %v2267_v2 = vadd.f32 %v2266_v0, %v2254_v47 }
0x1154   : > { %v2273_v3 = vsel %vm4583_vm11, %v2267_v2, %v2194_v19 }
0x1155   : > { %v2314_v5 = vperm.slane %v2273_v3, 0 }
0x1157   : > { %2319 = vperm.xlu2 %3399, %v2314_v5  }
0x11b1   : > { %v2320_v6 = vpop.permute.xlu2 %2319 }
0x11b2   : > { %v2321_v7 = vadd.f32 %v2320_v6, %v4518_v35 }
0x11b4   : > { %v2323_v11 = vadd.f32 %v2322_v34, %v2321_v7 }
0x11b6   : > { %v2324_v50 = vsel %vm1893_vm4, %v2323_v11, -inf }
0x11b7   : > { %v2325_v30 = vrot.slane %v2324_v50, 4 }
0x11b9   : > { %v2326_v62 = vmax.f32 %v2324_v50, %v2325_v30 }
0x11bb   : > { %v2327_v13 = vrot.slane %v2326_v62, 2 }
0x11bd   : > { %v2328_v14 = vmax.f32 %v2326_v62, %v2327_v13  ;;  %v3672_v13 = vmov 8  }
0x11be   : > { %3406 = vset.pattern.permute.xlu1 %v3672_v13 }
0x11bf   : > { %v2329_v16 = vrot.slane %v2328_v14, 1  ;;  %2500 = vperm.xlu1 %3406, %v4471_v23  }
0x11c1   : > { %v2330_v18 = vmax.f32 %v2328_v14, %v2329_v16 }
0x11c3   : > { %v2331_v12 = vsub.f32 %v2323_v11, %v2330_v18 }
0x11c5   : > { %v2332_v52 = vmul.f32 1.442695, %v2331_v12  ;;  %v2426_v12 = vperm.slane %v4526_v53, 0 }
0x11c7   : > { %3549 = vpow2.f32 %v2332_v52  ;;  %3416 = vset.pattern.permute.xlu1 %v3662_v15  ;;  %vm4607_vm13 = vcmp.eq.s32.totalorder %v2426_v12, 1 }
0x11cd   : > { %v3550_v19 = vpop.eup %3549 }
0x11ce   : > { %v2334_v21 = vsel %vm1893_vm4, %v3550_v19, 0.0 }
0x11cf   : > { %v2335_v24 = vrot.slane %v2334_v21, 4 }
0x11d1   : > { %v2336_v36 = vadd.f32 %v2335_v24, %v2334_v21 }
0x11d3   : > { %v2337_v37 = vrot.slane %v2336_v36, 2 }
0x11d5   : > { %v2338_v38 = vadd.f32 %v2337_v37, %v2336_v36 }
0x11d7   : > { %v2339_v40 = vrot.slane %v2338_v38, 1 }
0x11d9   : > { %v2340_v34 = vadd.f32 %v2339_v40, %v2338_v38 }
0x11db   : > { %3551 = vlog2.f32 %v2340_v34 }
0x11e1   : > { %v3552_v45 = vpop.eup %3551 }
0x11e2   : > { %v2342_v47 = vmul.f32 0.6931472, %v3552_v45 }
0x11e4   : > { %v2343_v49 = vadd.f32 %v2342_v47, %v2330_v18 }
0x11e6   : > { %v2349_v51 = vsel %vm4594_vm12, %v2343_v49, %v2273_v3 }
0x11e7   : > { %v2390_v46 = vperm.slane %v2349_v51, 0 }
0x11e9   : > { %2395 = vperm.xlu2 %3399, %v2390_v46  }
0x1243   : > { %v2396_v44 = vpop.permute.xlu2 %2395 }
0x1244   : > { %v2397_v26 = vadd.f32 %v2396_v44, %v4518_v35 }
0x1246   : > { %v2402_v55 = vadd.f32 %v2400_v54, %v2397_v26 }
0x1248   : > { %v2403_v56 = vsel %vm1893_vm4, %v2402_v55, -inf }
0x1249   : > { %v2404_v57 = vrot.slane %v2403_v56, 4 }
0x124b   : > { %v2405_v59 = vmax.f32 %v2403_v56, %v2404_v57 }
0x124d   : > { %v2406_v61 = vrot.slane %v2405_v59, 2 }
0x124f   : > { %v2407_v0 = vmax.f32 %v2405_v59, %v2406_v61 }
0x1251   : > { %v2408_v2 = vrot.slane %v2407_v0, 1 }
0x1253   : > { %v2409_v5 = vmax.f32 %v2407_v0, %v2408_v2 }
0x1255   : > { %v2410_v6 = vsub.f32 %v2402_v55, %v2409_v5 }
0x1257   : > { %v2411_v7 = vmul.f32 1.442695, %v2410_v6  ;;  %v4631_v6 = vld [vmem:[%s4447_s28] ss:$0 sm:$0xff] }
0x1259   : > { %3553 = vpow2.f32 %v2411_v7 }
0x125f   : > { %v3554_v11 = vpop.eup %3553 }
0x1260   : > { %v2413_v3 = vsel %vm1893_vm4, %v3554_v11, 0.0 }
0x1261   : > { %v2414_v50 = vrot.slane %v2413_v3, 4 }
0x1263   : > { %v2415_v30 = vadd.f32 %v2414_v50, %v2413_v3 }
0x1265   : > { %v2416_v62 = vrot.slane %v2415_v30, 2 }
0x1267   : > { %v2417_v14 = vadd.f32 %v2416_v62, %v2415_v30 }
0x1269   : > { %v2418_v16 = vrot.slane %v2417_v14, 1 }
0x126b   : > { %v2419_v18 = vadd.f32 %v2418_v16, %v2417_v14 }
0x126d   : > { %3555 = vlog2.f32 %v2419_v18 }
0x1273   : > { %v3556_v52 = vpop.eup %3555 }
0x1274   : > { %v2421_v19 = vmul.f32 0.6931472, %v3556_v52 }
0x1276   : > { %v2422_v24 = vadd.f32 %v2421_v19, %v2409_v5 }
0x1278   : > { %v2428_v36 = vsel %vm4607_vm13, %v2422_v24, %v2349_v51 }
0x1279   : > { %v2469_v37 = vperm.slane %v2428_v36, 0 }
0x127b   : > { %2474 = vperm.xlu2 %3399, %v2469_v37  }
0x1283   : > { %3407 = vset.pattern.permute.xlu2 %v3664_v22 }
0x1284   : > { %1867 = vperm.xlu2 %3407, %v4500_v32  }
0x128c   : > { %3409 = vset.pattern.permute.xlu2 %v4430_v63 }
0x12d5   : > { %v2475_v15 = vpop.permute.xlu2 %2474 }
0x12d6   : > { %v2476_v53 = vadd.f32 %v2475_v15, %v4518_v35 }
0x12d8   : > { %v2478_v38 = vadd.f32 %v2477_v33, %v2476_v53 }
0x12da   : > { %v2479_v40 = vsel %vm1893_vm4, %v2478_v38, -inf }
0x12db   : > { %v2480_v34 = vrot.slane %v2479_v40, 4 }
0x12dd   : > { %v2481_v41 = vmax.f32 %v2479_v40, %v2480_v34 }
0x12de   : > { %v1868_v42 = vpop.permute.xlu2 %1867 }
0x12df   : > { %v2482_v45 = vrot.slane %v2481_v41, 2  ;;  %v1869_v47 = vperm.slane %v1868_v42, 0  ;;  %v3674_v42 = vmov 9  }
0x12e1   : > { %v2483_v49 = vmax.f32 %v2481_v41, %v2482_v45  ;;  %vm1870_vm14 = vcmp.eq.s32.totalorder %v1869_v47, %v4530_v1 }
0x12e2   : > { %v4622_v51 = vsel %vm1870_vm14, 1.0, %v3671_v10 }
0x12e3   : > { %v2484_v46 = vrot.slane %v2483_v49, 1  ;;  %v3410_v44 = vpack.i.bf16 %v4536_v39, %v4622_v51  ;;  %v1874_v33 = vmul.f32 %v4622_v51, %v4462_v20  ;;  %v2501_v20 = vpop.permute.xlu1 %2500 }
0x12e4   : > { %v2502_v3 = vperm.slane %v2501_v20, 0 }
0x12e5   : > { %v2485_v26 = vmax.f32 %v2483_v49, %v2484_v46  ;;  %3411 = vperm.xlu2 %3409, %v3410_v44   ;;  %v1876_v54 = vsel %vm1875_vm7, %v1874_v33, 0.0 }
0x12e6   : > { %1877 = vadd.xlane.f32.xlu1 %v1876_v54  ;;  %vm4634_vm15 = vcmp.eq.s32.totalorder %v2502_v3, 1 }
0x12e7   : > { %v2486_v55 = vsub.f32 %v2478_v38, %v2485_v26 }
0x12e9   : > { %v2487_v56 = vmul.f32 1.442695, %v2486_v55 }
0x12eb   : > { %3557 = vpow2.f32 %v2487_v56 }
0x12f1   : > { %v3558_v57 = vpop.eup %3557 }
0x12f2   : > { %v2489_v59 = vsel %vm1893_vm4, %v3558_v57, 0.0 }
0x12f3   : > { %v2490_v61 = vrot.slane %v2489_v59, 4 }
0x12f5   : > { %v2491_v0 = vadd.f32 %v2490_v61, %v2489_v59 }
0x12f7   : > { %v2492_v2 = vrot.slane %v2491_v0, 2 }
0x12f9   : > { %v2493_v5 = vadd.f32 %v2492_v2, %v2491_v0 }
0x12fb   : > { %v2494_v7 = vrot.slane %v2493_v5, 1 }
0x12fd   : > { %v2495_v11 = vadd.f32 %v2494_v7, %v2493_v5 }
0x12ff   : > { %1917 = vrot.lane.b32.xlu1 %v4631_v6, %s3673_s5  ;;  %3559 = vlog2.f32 %v2495_v11 }
0x1305   : > { %v3560_v50 = vpop.eup %3559 }
0x1306   : > { %v2497_v30 = vmul.f32 0.6931472, %v3560_v50 }
0x1307   : > { %1966 = vperm.xlu1 %3416, %v4500_v32  }
0x1308   : > { %v2498_v14 = vadd.f32 %v2497_v30, %v2485_v26 }
0x130a   : > { %v4641_v16 = vsel %vm4634_vm15, %v2498_v14, %v2428_v36 }
0x130b   : > { %v2545_v18 = vperm.slane %v4641_v16, 0 }
0x130d   : > { %2550 = vperm.xlu2 %3409, %v2545_v18  }
0x1315   : > { %3415 = vset.pattern.permute.xlu2 %v3674_v42 }
0x133f   : > { %v3412_v12 = vpop.permute.xlu2 %3411 }
0x1340   : > { %v3413_v52 = vunpack.i.l.bf16 %v3412_v12  ;;  %v3414_v45 = vunpack.i.h.bf16 %v3412_v12 }
0x1342   : > { %v1892_v19 = vmul.f32 %v3413_v52, %v4518_v35  ;;  %v1978_v47 = vmul.f32 %v3414_v45, %v4518_v35 }
0x1344   : > { %v1894_v24 = vsel %vm1893_vm4, %v1892_v19, 0.0  ;;  %v1979_v49 = vsel %vm1893_vm4, %v1978_v47, 0.0  ;;  %v1913_v47 = vpop.xlane.xlu0 %1912 }
0x1345   : > { %v1895_v37 = vrot.slane %v1894_v24, 4  ;;  %v1980_v46 = vrot.slane %v1979_v49, 4 }
0x1347   : > { %v1896_v15 = vadd.f32 %v1895_v37, %v1894_v24  ;;  %v1981_v33 = vadd.f32 %v1980_v46, %v1979_v49  ;;  %v2066_v24 = vrot.slane %v4458_v9, 1 }
0x1349   : > { %v1897_v53 = vrot.slane %v1896_v15, 2  ;;  %v1982_v26 = vrot.slane %v1981_v33, 2 }
0x134b   : > { %v1898_v38 = vadd.f32 %v1897_v53, %v1896_v15  ;;  %v1983_v56 = vadd.f32 %v1982_v26, %v1981_v33 }
0x134d   : > { %v1899_v40 = vrot.slane %v1898_v38, 1  ;;  %v1984_v59 = vrot.slane %v1983_v56, 1 }
0x134f   : > { %v1900_v34 = vadd.f32 %v1899_v40, %v1898_v38  ;;  %v1985_v5 = vadd.f32 %v1984_v59, %v1983_v56 }
0x1351   : > { %v1901_v41 = vmul.f32 %v4536_v39, %v1900_v34 }
0x1353   : > { %v1903_v36 = vsel %vm1902_vm1, %v1901_v41, 0.0 }
0x1354   : > { %1904 = vadd.xlane.f32.xlu2 %v1903_v36 }
0x1359   : > { %v4651_v44 = vpop.xlane.xlu1 %1877 }
0x1367   : > { %v2551_v55 = vpop.permute.xlu2 %2550 }
0x1368   : > { %v2552_v57 = vadd.f32 %v2551_v55, %v4518_v35 }
0x136a   : > { %v2557_v61 = vadd.f32 %v4532_v4, %v2552_v57 }
0x136c   : > { %2579 = vperm.xlu2 %3415, %v4471_v23   ;;  %v2558_v7 = vsel %vm1893_vm4, %v2557_v61, -inf }
0x136d   : > { %v2559_v3 = vrot.slane %v2558_v7, 4 }
0x136f   : > { %v2560_v30 = vmax.f32 %v2558_v7, %v2559_v3 }
0x1371   : > { %v4654_v54 = vpop.permute.xlu1 %1917  ;;  %v2561_v14 = vrot.slane %v2560_v30, 2 }
0x1373   : > { %v2562_v18 = vmax.f32 %v2560_v30, %v2561_v14 }
0x1374   : > { %1996 = vrot.lane.b32.xlu2 %v4631_v6, %s3675_s4  ;;  %s3682_s4 = smov 121  }
0x1375   : > { %3418 = vset.pattern.permute.xlu2 %v3666_v25  ;;  %v2563_v12 = vrot.slane %v2562_v18, 1 }
0x1377   : > { %v2564_v52 = vmax.f32 %v2562_v18, %v2563_v12 }
0x1379   : > { %v1967_v0 = vpop.permute.xlu1 %1966  ;;  %v2565_v19 = vsub.f32 %v2557_v61, %v2564_v52 }
0x137a   : > { %v1968_v2 = vperm.slane %v1967_v0, 0 }
0x137b   : > { %v2566_v37 = vmul.f32 1.442695, %v2565_v19 }
0x137c   : > { %vm1969_vm2 = vcmp.eq.s32.totalorder %v1968_v2, %v4530_v1  ;;  %2042 = vperm.xlu2 %3418, %v4500_v32  }
0x137d   : > { %v4664_v11 = vsel %vm1969_vm2, 1.0, %v3671_v10  ;;  %3561 = vpow2.f32 %v2566_v37 }
0x137e   : > { %v1990_v20 = vmul.f32 %v4664_v11, %v4458_v9  ;;  %v1986_v25 = vmul.f32 %v4664_v11, %v1985_v5  ;;  %v3676_v5 = vmov 10  }
0x137f   : > { %3425 = vset.pattern.permute.xlu1 %v3676_v5 }
0x1380   : > { %v1992_v4 = vsel %vm1991_vm3, %v1990_v20, 0.0  ;;  %v1987_v50 = vsel %vm1902_vm1, %v1986_v25, 0.0  ;;  %vm2146_vm3 = vcmask 26626  }
0x1381   : > { %1993 = vadd.xlane.f32.xlu0 %v1992_v4  ;;  %1988 = vadd.xlane.f32.xlu1 %v1987_v50 }
0x1383   : > { %v3562_v15 = vpop.eup %3561 }
0x1384   : > { %3419 = vset.pattern.permute.xlu2 %v4430_v63  ;;  %v2568_v53 = vsel %vm1893_vm4, %v3562_v15, 0.0 }
0x1385   : > { %v2569_v38 = vrot.slane %v2568_v53, 4 }
0x1387   : > { %v2570_v40 = vadd.f32 %v2569_v38, %v2568_v53 }
0x1389   : > { %v2571_v34 = vrot.slane %v2570_v40, 2 }
0x138b   : > { %v2572_v41 = vadd.f32 %v2571_v34, %v2570_v40 }
0x138d   : > { %v2573_v36 = vrot.slane %v2572_v41, 1 }
0x138f   : > { %v2574_v45 = vadd.f32 %v2573_v36, %v2572_v41 }
0x1391   : > { %3563 = vlog2.f32 %v2574_v45 }
0x1397   : > { %v3564_v33 = vpop.eup %3563 }
0x1398   : > { %v2576_v26 = vmul.f32 0.6931472, %v3564_v33 }
0x139a   : > { %2067 = vrot.lane.b32.xlu1 %v2066_v24, %s3663_s25  ;;  %v2577_v57 = vadd.f32 %v2576_v26, %v2564_v52 }
0x13a2   : > { %2655 = vperm.xlu1 %3425, %v4471_v23  }
0x13aa   : > { %2075 = vrot.lane.b32.xlu1 %v4631_v6, %s3677_s23  ;;  %s3683_s23 = smov 120  }
0x13ab   : > { %3428 = vset.pattern.permute.xlu1 %v4430_v63 }
0x13c7   : > { %v1905_v49 = vpop.xlane.xlu2 %1904 }
0x13c8   : > { %v1914_v46 = vadd.f32 %v1913_v47, %v1905_v49 }
0x13ca   : > { %v1920_v50 = vmul.f32 %v4654_v54, %v1914_v46 }
0x13cc   : > { %v1921_v18 = vadd.f32 %v1920_v50, %v4651_v44  ;;  %v2632_v44 = vperm.slane %v4458_v9, 5 }
0x13cf   : > { %v2580_v55 = vpop.permute.xlu2 %2579 }
0x13d0   : > { %v2581_v56 = vperm.slane %v2580_v55, 0 }
0x13d2   : > { %vm4674_vm0 = vcmp.eq.s32.totalorder %v2581_v56, 1 }
0x13d3   : > { %v4681_v61 = vsel %vm4674_vm0, %v2577_v57, %v4641_v16 }
0x13d4   : > { %v2624_v0 = vperm.slane %v4681_v61, 0 }
0x13d6   : > { %2629 = vperm.xlu0 %3417, %v2624_v0  }
0x13d7   : > { %v1997_v2 = vpop.permute.xlu2 %1996 }
0x13df   : > { %v2043_v7 = vpop.permute.xlu2 %2042 }
0x13e0   : > { %v2044_v20 = vperm.slane %v2043_v7, 0 }
0x13e2   : > { %vm2045_vm5 = vcmp.eq.s32.totalorder %v2044_v20, %v4530_v1 }
0x13e3   : > { %v4688_v25 = vsel %vm2045_vm5, 1.0, %v3671_v10 }
0x13e4   : > { %v3420_v16 = vpack.i.bf16 %v4688_v25, %v4664_v11 }
0x13e6   : > { %3421 = vperm.xlu2 %3419, %v3420_v16  }
0x13ee   : > { %3426 = vset.pattern.permute.xlu2 %v3667_v27 }
0x13f4   : > { %v1994_v3 = vpop.xlane.xlu0 %1993  ;;  %v1989_v4 = vpop.xlane.xlu1 %1988 }
0x13f5   : > { %v1995_v30 = vadd.f32 %v1994_v3, %v1989_v4 }
0x13f7   : > { %v1999_v14 = vmul.f32 %v1997_v2, %v1995_v30 }
0x13f9   : > { %v2001_v12 = vrot.slane %v1999_v14, 1 }
0x13fb   : > { %v4697_v52 = vadd.f32 %v2001_v12, %v1921_v18 }
0x140c   : > { %v2068_v19 = vpop.permute.xlu1 %2067 }
0x140d   : > { %v2070_v24 = vmul.f32 %v4688_v25, %v2068_v19 }
0x140f   : > { %v2071_v37 = vsel %vm1875_vm7, %v2070_v24, 0.0 }
0x1410   : > { %2072 = vadd.xlane.f32.xlu0 %v2071_v37 }
0x1414   : > { %v2656_v37 = vpop.permute.xlu1 %2655 }
0x1440   : > { %v3422_v15 = vpop.permute.xlu2 %3421 }
0x1441   : > { %v3423_v53 = vunpack.i.l.bf16 %v3422_v15 }
0x1443   : > { %v2054_v27 = vmul.f32 %v3423_v53, %v4518_v35  ;;  %v2657_v53 = vperm.slane %v2656_v37, 0 }
0x1445   : > { %v2055_v38 = vsel %vm1893_vm4, %v2054_v27, 0.0  ;;  %vm4712_vm14 = vcmp.eq.s32.totalorder %v2657_v53, 1 }
0x1446   : > { %v2056_v54 = vrot.slane %v2055_v38, 4 }
0x1448   : > { %v2057_v40 = vadd.f32 %v2056_v54, %v2055_v38  ;;  %v2630_v34 = vpop.permute.xlu0 %2629 }
0x1449   : > { %v2631_v41 = vadd.f32 %v2630_v34, %v4518_v35 }
0x144a   : > { %v2058_v36 = vrot.slane %v2057_v40, 2 }
0x144b   : > { %v2633_v45 = vadd.f32 %v2632_v44, %v2631_v41 }
0x144c   : > { %v2059_v47 = vadd.f32 %v2058_v36, %v2057_v40  ;;  %v3424_v36 = vunpack.i.h.bf16 %v3422_v15 }
0x144d   : > { %v2634_v49 = vsel %vm1893_vm4, %v2633_v45, -inf }
0x144e   : > { %v2635_v46 = vrot.slane %v2634_v49, 4  ;;  %v2060_v33 = vrot.slane %v2059_v47, 1 }
0x1450   : > { %v2636_v26 = vmax.f32 %v2634_v49, %v2635_v46  ;;  %v2061_v55 = vadd.f32 %v2060_v33, %v2059_v47 }
0x1452   : > { %v2637_v56 = vrot.slane %v2636_v26, 2  ;;  %v2062_v57 = vmul.f32 %v4688_v25, %v2061_v55  ;;  %v2076_v55 = vpop.permute.xlu1 %2075 }
0x1454   : > { %v2638_v0 = vmax.f32 %v2636_v26, %v2637_v56  ;;  %v2063_v2 = vsel %vm1902_vm1, %v2062_v57, 0.0 }
0x1455   : > { %2064 = vadd.xlane.f32.xlu2 %v2063_v2 }
0x1456   : > { %v2639_v7 = vrot.slane %v2638_v0, 1 }
0x1458   : > { %v2640_v20 = vmax.f32 %v2638_v0, %v2639_v7  ;;  %v1964_v7 = vsel %vm4538_vm6, %v4536_v39, %v4622_v51 }
0x145a   : > { %v2641_v16 = vsub.f32 %v2633_v45, %v2640_v20  ;;  %v2133_v45 = vmul.f32 %v3424_v36, %v4518_v35 }
0x145c   : > { %v2642_v3 = vmul.f32 1.442695, %v2641_v16 }
0x145e   : > { %3565 = vpow2.f32 %v2642_v3 }
0x1464   : > { %v3566_v4 = vpop.eup %3565 }
0x1465   : > { %v2644_v50 = vsel %vm1893_vm4, %v3566_v4, 0.0 }
0x1466   : > { %v2645_v30 = vrot.slane %v2644_v50, 4 }
0x1468   : > { %v2646_v14 = vadd.f32 %v2645_v30, %v2644_v50 }
0x146a   : > { %v2647_v18 = vrot.slane %v2646_v14, 2 }
0x146c   : > { %v2648_v12 = vadd.f32 %v2647_v18, %v2646_v14 }
0x146d   : > { %2121 = vperm.xlu2 %3426, %v4500_v32  }
0x146e   : > { %v2649_v19 = vrot.slane %v2648_v12, 1 }
0x1470   : > { %v2650_v24 = vadd.f32 %v2649_v19, %v2648_v12 }
0x1472   : > { %3567 = vlog2.f32 %v2650_v24 }
0x1475   : > { %2709 = vrot.lane.b32.xlu2 %v2632_v44, %s3663_s25  ;;  %v3678_v44 = vmov 11  }
0x1476   : > { %3435 = vset.pattern.permute.xlu2 %v4430_v63 }
0x1478   : > { %v3568_v27 = vpop.eup %3567 }
0x1479   : > { %v2652_v38 = vmul.f32 0.6931472, %v3568_v27 }
0x147b   : > { %v2653_v40 = vadd.f32 %v2652_v38, %v2640_v20  ;;  %v2040_v20 = vsel %vm4552_vm8, %v4664_v11, %v1964_v7  ;;  %v4752_v11 = vld [vmem:[%s4464_s30] sm:$0xff] }
0x147c   : > { %v2221_v43 = vrot.slane %v4752_v11, 2 }
0x147d   : > { %v4719_v34 = vsel %vm4712_vm14, %v2653_v40, %v4681_v61  ;;  %v2134_v61 = vsel %vm1893_vm4, %v2133_v45, 0.0 }
0x147e   : > { %v2700_v41 = vperm.slane %v4719_v34, 0  ;;  %v2135_v47 = vrot.slane %v2134_v61, 4 }
0x1480   : > { %2705 = vperm.xlu0 %3417, %v2700_v41   ;;  %v2136_v49 = vadd.f32 %v2135_v47, %v2134_v61 }
0x1482   : > { %v2137_v33 = vrot.slane %v2136_v49, 2 }
0x1483   : > { %v2073_v46 = vpop.xlane.xlu0 %2072 }
0x1484   : > { %v2138_v57 = vadd.f32 %v2137_v33, %v2136_v49 }
0x1486   : > { %v2139_v0 = vrot.slane %v2138_v57, 1 }
0x1488   : > { %2151 = vrot.lane.b32.xlu0 %v4631_v6, %s3663_s25  ;;  %v2140_v16 = vadd.f32 %v2139_v0, %v2138_v57 }
0x1489   : > { %3427 = vset.pattern.permute.xlu0 %v3668_v28 }
0x1490   : > { %2197 = vperm.xlu0 %3427, %v4500_v32  }
0x1498   : > { %3434 = vset.pattern.permute.xlu0 %v3678_v44 }
0x1499   : > { %2734 = vperm.xlu0 %3434, %v4471_v23  }
0x14c8   : > { %v2065_v26 = vpop.xlane.xlu2 %2064 }
0x14c9   : > { %v2074_v56 = vadd.f32 %v2073_v46, %v2065_v26 }
0x14cb   : > { %v2078_v28 = vmul.f32 %v2076_v55, %v2074_v56 }
0x14cd   : > { %v4731_v32 = vadd.f32 %v2078_v28, %v4697_v52  ;;  %v2119_v52 = vsel %vm4562_vm9, %v4688_v25, %v2040_v20  ;;  %v4778_v20 = vld [vmem:[%s4493_s24] sm:$0x1]  ;;  %s3690_s24 = smov 116  }
0x14d0   : > { %v2122_v2 = vpop.permute.xlu2 %2121 }
0x14d1   : > { %v2123_v15 = vperm.slane %v2122_v2, 0 }
0x14d3   : > { %vm2124_vm2 = vcmp.eq.s32.totalorder %v2123_v15, %v4530_v1 }
0x14d4   : > { %v3309_v3 = vsel %vm2124_vm2, 1.0, %v3671_v10 }
0x14d5   : > { %v4747_v4 = vsel %vm4573_vm10, %v3309_v3, %v2119_v52  ;;  %v2145_v39 = vmul.f32 %v3309_v3, %v4458_v9  ;;  %v2141_v8 = vmul.f32 %v3309_v3, %v2140_v16  ;;  %vm2301_vm10 = vcmask 27651  }
0x14d7   : > { %v2147_v51 = vsel %vm2146_vm3, %v2145_v39, 0.0  ;;  %v2142_v58 = vsel %vm1902_vm1, %v2141_v8, 0.0 }
0x14d8   : > { %2148 = vadd.xlane.f32.xlu2 %v2147_v51  ;;  %2143 = vadd.xlane.f32.xlu1 %v2142_v58  ;;  %v2710_v17 = vpop.permute.xlu2 %2709 }
0x14f0   : > { %2222 = vrot.lane.b32.xlu2 %v2221_v43, %s3663_s25 }
0x14f2   : > { %v2706_v25 = vpop.permute.xlu0 %2705 }
0x14f3   : > { %v2707_v50 = vadd.f32 %v2706_v25, %v4518_v35 }
0x14f5   : > { %v2712_v30 = vadd.f32 %v2710_v17, %v2707_v50 }
0x14f7   : > { %v2713_v14 = vsel %vm1893_vm4, %v2712_v30, -inf }
0x14f8   : > { %v2714_v9 = vrot.slane %v2713_v14, 4  ;;  %2230 = vrot.lane.b32.xlu2 %v4631_v6, %s3679_s1  ;;  %s3685_s1 = smov 119  }
0x14fa   : > { %v2715_v18 = vmax.f32 %v2713_v14, %v2714_v9  ;;  %v2152_v12 = vpop.permute.xlu0 %2151 }
0x14fc   : > { %v2716_v19 = vrot.slane %v2715_v18, 2 }
0x14fe   : > { %v2717_v24 = vmax.f32 %v2715_v18, %v2716_v19 }
0x1500   : > { %v2718_v37 = vrot.slane %v2717_v24, 1 }
0x1502   : > { %v2719_v53 = vmax.f32 %v2717_v24, %v2718_v37  ;;  %v2198_v27 = vpop.permute.xlu0 %2197 }
0x1503   : > { %v2199_v38 = vperm.slane %v2198_v27, 0 }
0x1504   : > { %v2720_v40 = vsub.f32 %v2712_v30, %v2719_v53  ;;  %v4793_v30 = vld [vmem:[%s5119_s22] sm:$0xf] }
0x1505   : > { %vm2200_vm6 = vcmp.eq.s32.totalorder %v2199_v38, %v4530_v1 }
0x1506   : > { %v2721_v35 = vmul.f32 1.442695, %v2720_v40  ;;  %v4761_v41 = vsel %vm2200_vm6, 1.0, %v3671_v10  ;;  %vm2456_vm6 = vcmask 28676  }
0x1507   : > { %v3429_v36 = vpack.i.bf16 %v4761_v41, %v3309_v3 }
0x1508   : > { %3569 = vpow2.f32 %v2721_v35  ;;  %v3681_v35 = vmov 12  }
0x1509   : > { %3430 = vperm.xlu1 %3428, %v3429_v36   ;;  %3438 = vset.pattern.permute.xlu0 %v3681_v35 }
0x150b   : > { %v2735_v56 = vpop.permute.xlu0 %2734 }
0x150c   : > { %v2736_v28 = vperm.slane %v2735_v56, 0 }
0x150e   : > { %v3570_v45 = vpop.eup %3569  ;;  %vm4766_vm8 = vcmp.eq.s32.totalorder %v2736_v28, 1 }
0x150f   : > { %v2723_v61 = vsel %vm1893_vm4, %v3570_v45, 0.0 }
0x1510   : > { %v2724_v47 = vrot.slane %v2723_v61, 4 }
0x1511   : > { %3437 = vset.pattern.permute.xlu1 %v3669_v29 }
0x1512   : > { %v2725_v49 = vadd.f32 %v2724_v47, %v2723_v61 }
0x1514   : > { %v2726_v46 = vrot.slane %v2725_v49, 2 }
0x1516   : > { %v2727_v33 = vadd.f32 %v2726_v46, %v2725_v49 }
0x1518   : > { %v2728_v26 = vrot.slane %v2727_v33, 1 }
0x151a   : > { %v2729_v55 = vadd.f32 %v2728_v26, %v2727_v33 }
0x151c   : > { %3571 = vlog2.f32 %v2729_v55 }
0x1522   : > { %v3572_v57 = vpop.eup %3571 }
0x1523   : > { %v2731_v0 = vmul.f32 0.6931472, %v3572_v57 }
0x1525   : > { %v2732_v15 = vadd.f32 %v2731_v0, %v2719_v53 }
0x1527   : > { %v4773_v29 = vsel %vm4766_vm8, %v2732_v15, %v4719_v34 }
0x1528   : > { %v2779_v7 = vperm.slane %v4773_v29, 0 }
0x152a   : > { %2784 = vperm.xlu2 %3435, %v2779_v7   ;;  %v2376_v7 = vrot.slane %v4752_v11, 3 }
0x1532   : > { %3436 = vset.pattern.permute.xlu2 %v3670_v31 }
0x1533   : > { %2276 = vperm.xlu2 %3436, %v4778_v20  }
0x153b   : > { %2306 = vrot.lane.b32.xlu2 %v4631_v6, %s3680_s0  ;;  %s3687_s0 = smov 118  }
0x153c   : > { %3439 = vset.pattern.permute.xlu2 %v4430_v63 }
0x154b   : > { %v2149_v16 = vpop.xlane.xlu2 %2148  ;;  %v2144_v52 = vpop.xlane.xlu1 %2143 }
0x154c   : > { %v2150_v3 = vadd.f32 %v2149_v16, %v2144_v52  ;;  %v2787_v52 = vperm.slane %v4752_v11, 6 }
0x154e   : > { %v2154_v39 = vmul.f32 %v2152_v12, %v2150_v3 }
0x1550   : > { %v2156_v34 = vrot.slane %v2154_v39, 2 }
0x1552   : > { %v4784_v8 = vadd.f32 %v2156_v34, %v4731_v32 }
0x1553   : > { %v2223_v51 = vpop.permute.xlu2 %2222 }
0x1554   : > { %v2225_v31 = vmul.f32 %v4761_v41, %v2223_v51 }
0x1556   : > { %v2226_v58 = vsel %vm1875_vm7, %v2225_v31, 0.0 }
0x1557   : > { %2227 = vadd.xlane.f32.xlu0 %v2226_v58 }
0x155b   : > { %v4788_v43 = vpop.permute.xlu2 %2230 }
0x157b   : > { %v3431_v25 = vpop.permute.xlu1 %3430 }
0x157c   : > { %v3433_v50 = vunpack.i.h.bf16 %v3431_v25  ;;  %v3432_v17 = vunpack.i.l.bf16 %v3431_v25 }
0x157e   : > { %v2288_v14 = vmul.f32 %v4793_v30, %v3433_v50  ;;  %v2209_v32 = vmul.f32 %v4793_v30, %v3432_v17 }
0x1580   : > { %v2289_v9 = vsel %vm1893_vm4, %v2288_v14, 0.0  ;;  %v2210_v18 = vsel %vm1893_vm4, %v2209_v32, 0.0 }
0x1581   : > { %v2290_v12 = vrot.slane %v2289_v9, 4  ;;  %v2211_v19 = vrot.slane %v2210_v18, 4 }
0x1583   : > { %v2291_v24 = vadd.f32 %v2290_v12, %v2289_v9  ;;  %v2212_v37 = vadd.f32 %v2211_v19, %v2210_v18 }
0x1584   : > { %v2785_v53 = vpop.permute.xlu2 %2784 }
0x1585   : > { %v2213_v27 = vrot.slane %v2212_v37, 2  ;;  %v2292_v38 = vrot.slane %v2291_v24, 2  ;;  %v2786_v16 = vadd.f32 %v4793_v30, %v2785_v53 }
0x1587   : > { %v2214_v40 = vadd.f32 %v2213_v27, %v2212_v37  ;;  %v2293_v45 = vadd.f32 %v2292_v38, %v2291_v24  ;;  %v2788_v3 = vadd.f32 %v2787_v52, %v2786_v16 }
0x1589   : > { %v2215_v36 = vrot.slane %v2214_v40, 1  ;;  %v2294_v46 = vrot.slane %v2293_v45, 1  ;;  %v2789_v39 = vsel %vm1893_vm4, %v2788_v3, -inf }
0x158a   : > { %v2790_v34 = vrot.slane %v2789_v39, 4 }
0x158b   : > { %v2216_v61 = vadd.f32 %v2215_v36, %v2214_v40  ;;  %v2295_v56 = vadd.f32 %v2294_v46, %v2293_v45 }
0x158c   : > { %v2791_v51 = vmax.f32 %v2789_v39, %v2790_v34 }
0x158d   : > { %v2277_v47 = vpop.permute.xlu2 %2276  ;;  %v2217_v49 = vmul.f32 %v4761_v41, %v2216_v61 }
0x158e   : > { %v2278_v33 = vperm.slane %v2277_v47, 0  ;;  %v2792_v31 = vrot.slane %v2791_v51, 2 }
0x158f   : > { %v2218_v26 = vsel %vm1902_vm1, %v2217_v49, 0.0 }
0x1590   : > { %vm2279_vm9 = vcmp.eq.s32.totalorder %v2278_v33, %v4530_v1  ;;  %2219 = vadd.xlane.f32.xlu1 %v2218_v26  ;;  %v2793_v58 = vmax.f32 %v2791_v51, %v2792_v31 }
0x1591   : > { %v4804_v55 = vsel %vm2279_vm9, 1.0, %v3671_v10 }
0x1592   : > { %v2300_v28 = vmul.f32 %v4752_v11, %v4804_v55  ;;  %v2296_v57 = vmul.f32 %v4804_v55, %v2295_v56  ;;  %v2794_v25 = vrot.slane %v2793_v58, 1 }
0x1594   : > { %v2302_v0 = vsel %vm2301_vm10, %v2300_v28, 0.0  ;;  %v2297_v15 = vsel %vm1902_vm1, %v2296_v57, 0.0  ;;  %v2795_v50 = vmax.f32 %v2793_v58, %v2794_v25 }
0x1595   : > { %2303 = vadd.xlane.f32.xlu0 %v2302_v0  ;;  %v2307_v45 = vpop.permute.xlu2 %2306 }
0x1596   : > { %v2796_v17 = vsub.f32 %v2788_v3, %v2795_v50 }
0x1598   : > { %2298 = vadd.xlane.f32.xlu1 %v2297_v15  ;;  %v2797_v14 = vmul.f32 1.442695, %v2796_v17 }
0x159a   : > { %3573 = vpow2.f32 %v2797_v14 }
0x15a0   : > { %v3574_v32 = vpop.eup %3573 }
0x15a1   : > { %v2799_v9 = vsel %vm1893_vm4, %v3574_v32, 0.0 }
0x15a2   : > { %v2800_v18 = vrot.slane %v2799_v9, 4 }
0x15a4   : > { %v2801_v12 = vadd.f32 %v2800_v18, %v2799_v9 }
0x15a6   : > { %v2802_v19 = vrot.slane %v2801_v12, 2 }
0x15a8   : > { %v2803_v27 = vadd.f32 %v2802_v19, %v2801_v12 }
0x15a9   : > { %2810 = vperm.xlu0 %3438, %v4471_v23  }
0x15aa   : > { %v2804_v36 = vrot.slane %v2803_v27, 1 }
0x15ac   : > { %v2805_v46 = vadd.f32 %v2804_v36, %v2803_v27 }
0x15ae   : > { %3575 = vlog2.f32 %v2805_v46 }
0x15b1   : > { %2352 = vperm.xlu1 %3437, %v4778_v20   ;;  %3445 = vset.pattern.permute.xlu0 %v4430_v63 }
0x15b4   : > { %v3576_v28 = vpop.eup %3575 }
0x15b5   : > { %v2807_v57 = vmul.f32 0.6931472, %v3576_v28 }
0x15b9   : > { %2377 = vrot.lane.b32.xlu1 %v2376_v7, %s3663_s25  ;;  %v2808_v7 = vadd.f32 %v2807_v57, %v2795_v50 }
0x15ba   : > { %3457 = vset.pattern.permute.xlu1 %v4430_v63 }
0x15ca   : > { %v2228_v24 = vpop.xlane.xlu0 %2227 }
0x1603   : > { %v2220_v37 = vpop.xlane.xlu1 %2219 }
0x1604   : > { %v2229_v53 = vadd.f32 %v2228_v24, %v2220_v37 }
0x1606   : > { %v2233_v38 = vmul.f32 %v4788_v43, %v2229_v53 }
0x1608   : > { %v2234_v40 = vadd.f32 %v2233_v38, %v4784_v8  ;;  %v2304_v61 = vpop.xlane.xlu0 %2303 }
0x160b   : > { %v2299_v47 = vpop.xlane.xlu1 %2298 }
0x160c   : > { %v2305_v49 = vadd.f32 %v2304_v61, %v2299_v47 }
0x160e   : > { %v2309_v33 = vmul.f32 %v2307_v45, %v2305_v49 }
0x1610   : > { %v2311_v26 = vrot.slane %v2309_v33, 3 }
0x1612   : > { %v4824_v56 = vadd.f32 %v2311_v26, %v2234_v40  ;;  %v3684_v40 = vmov 13  }
0x161b   : > { %v2811_v0 = vpop.permute.xlu0 %2810 }
0x161c   : > { %v2812_v15 = vperm.slane %v2811_v0, 0 }
0x161e   : > { %vm4826_vm5 = vcmp.eq.s32.totalorder %v2812_v15, 1 }
0x161f   : > { %v4833_v8 = vsel %vm4826_vm5, %v2808_v7, %v4773_v29 }
0x1620   : > { %v2855_v16 = vperm.slane %v4833_v8, 0 }
0x1622   : > { %2860 = vperm.xlu0 %3445, %v2855_v16  }
0x1623   : > { %v2353_v3 = vpop.permute.xlu1 %2352 }
0x1624   : > { %v2354_v39 = vperm.slane %v2353_v3, 0 }
0x1626   : > { %vm2355_vm2 = vcmp.eq.s32.totalorder %v2354_v39, %v4530_v1 }
0x1627   : > { %v4838_v34 = vsel %vm2355_vm2, 1.0, %v3671_v10 }
0x1628   : > { %v3440_v51 = vpack.i.bf16 %v4838_v34, %v4804_v55 }
0x162a   : > { %2385 = vrot.lane.b32.xlu0 %v4631_v6, %s3682_s4  ;;  %3441 = vperm.xlu2 %3439, %v3440_v51  }
0x162b   : > { %v2378_v31 = vpop.permute.xlu1 %2377  ;;  %3446 = vset.pattern.permute.xlu0 %v3672_v13 }
0x162c   : > { %v2380_v29 = vmul.f32 %v4838_v34, %v2378_v31 }
0x162e   : > { %v2381_v58 = vsel %vm1875_vm7, %v2380_v29, 0.0 }
0x162f   : > { %2382 = vadd.xlane.f32.xlu1 %v2381_v58 }
0x1632   : > { %2431 = vperm.xlu0 %3446, %v4778_v20   ;;  %3447 = vset.pattern.permute.xlu2 %v3684_v40 }
0x163a   : > { %2461 = vrot.lane.b32.xlu0 %v4631_v6, %s3683_s23  ;;  %s3692_s23 = smov 115  }
0x163b   : > { %3449 = vset.pattern.permute.xlu0 %v4430_v63 }
0x1684   : > { %v3442_v25 = vpop.permute.xlu2 %3441 }
0x1685   : > { %v3443_v50 = vunpack.i.l.bf16 %v3442_v25  ;;  %v3444_v14 = vunpack.i.h.bf16 %v3442_v25 }
0x1687   : > { %v2364_v17 = vmul.f32 %v4793_v30, %v3443_v50  ;;  %v2443_v9 = vmul.f32 %v4793_v30, %v3444_v14 }
0x1689   : > { %v2365_v32 = vsel %vm1893_vm4, %v2364_v17, 0.0  ;;  %v2444_v19 = vsel %vm1893_vm4, %v2443_v9, 0.0 }
0x168a   : > { %v2366_v13 = vrot.slane %v2365_v32, 4  ;;  %v2445_v53 = vrot.slane %v2444_v19, 4 }
0x168c   : > { %v2367_v18 = vadd.f32 %v2366_v13, %v2365_v32  ;;  %v2446_v45 = vadd.f32 %v2445_v53, %v2444_v19 }
0x168e   : > { %v2368_v12 = vrot.slane %v2367_v18, 2  ;;  %v2447_v47 = vrot.slane %v2446_v45, 2 }
0x1690   : > { %v2369_v24 = vadd.f32 %v2368_v12, %v2367_v18  ;;  %v2448_v46 = vadd.f32 %v2447_v47, %v2446_v45 }
0x1692   : > { %v2370_v37 = vrot.slane %v2369_v24, 1  ;;  %v2449_v33 = vrot.slane %v2448_v46, 1 }
0x1694   : > { %v2861_v27 = vpop.permute.xlu0 %2860  ;;  %v2371_v38 = vadd.f32 %v2370_v37, %v2369_v24  ;;  %v2450_v57 = vadd.f32 %v2449_v33, %v2448_v46  ;;  %v2531_v37 = vrot.slane %v4752_v11, 4 }
0x1695   : > { %v2862_v25 = vadd.f32 %v4793_v30, %v2861_v27 }
0x1696   : > { %v2372_v36 = vmul.f32 %v4838_v34, %v2371_v38 }
0x1698   : > { %v2373_v61 = vsel %vm1902_vm1, %v2372_v36, 0.0 }
0x1699   : > { %2374 = vadd.xlane.f32.xlu2 %v2373_v61 }
0x169c   : > { %v2386_v49 = vpop.permute.xlu0 %2385 }
0x16a2   : > { %v2383_v39 = vpop.xlane.xlu1 %2382 }
0x16a4   : > { %v2432_v26 = vpop.permute.xlu0 %2431 }
0x16a5   : > { %v2433_v28 = vperm.slane %v2432_v26, 0 }
0x16a7   : > { %vm2434_vm3 = vcmp.eq.s32.totalorder %v2433_v28, %v4530_v1 }
0x16a8   : > { %v4858_v0 = vsel %vm2434_vm3, 1.0, %v3671_v10  ;;  %vm2766_vm3 = vcmask 30726  }
0x16a9   : > { %v2451_v15 = vmul.f32 %v4858_v0, %v2450_v57  ;;  %v2455_v16 = vmul.f32 %v4752_v11, %v4858_v0 }
0x16ab   : > { %v2452_v7 = vsel %vm1902_vm1, %v2451_v15, 0.0  ;;  %v2457_v3 = vsel %vm2456_vm6, %v2455_v16, 0.0  ;;  %vm2921_vm6 = vcmask 31751  }
0x16ac   : > { %2453 = vadd.xlane.f32.xlu1 %v2452_v7  ;;  %v2462_v9 = vpop.permute.xlu0 %2461 }
0x16b1   : > { %2864 = vrot.lane.b32.xlu2 %v2787_v52, %s3663_s25 }
0x16b4   : > { %2458 = vadd.xlane.f32.xlu1 %v2457_v3 }
0x16b9   : > { %2889 = vperm.xlu2 %3447, %v4471_v23  }
0x16c1   : > { %3448 = vset.pattern.permute.xlu2 %v3674_v42 }
0x16c2   : > { %2507 = vperm.xlu2 %3448, %v4778_v20  }
0x16ca   : > { %3456 = vset.pattern.permute.xlu2 %v3676_v5 }
0x170c   : > { %v2375_v51 = vpop.xlane.xlu2 %2374 }
0x170d   : > { %v2384_v31 = vadd.f32 %v2383_v39, %v2375_v51 }
0x170f   : > { %v2388_v29 = vmul.f32 %v2386_v49, %v2384_v31 }
0x1711   : > { %v2389_v58 = vadd.f32 %v2388_v29, %v4824_v56 }
0x1714   : > { %v2865_v50 = vpop.permute.xlu2 %2864 }
0x1715   : > { %v2867_v52 = vadd.f32 %v2865_v50, %v2862_v25 }
0x1717   : > { %v2868_v53 = vsel %vm1893_vm4, %v2867_v52, -inf }
0x1718   : > { %v2869_v27 = vrot.slane %v2868_v53, 4 }
0x171a   : > { %v2870_v38 = vmax.f32 %v2868_v53, %v2869_v27 }
0x171c   : > { %v2890_v17 = vpop.permute.xlu2 %2889  ;;  %v2871_v36 = vrot.slane %v2870_v38, 2 }
0x171e   : > { %v2872_v45 = vmax.f32 %v2870_v38, %v2871_v36 }
0x171f   : > { %v2454_v14 = vpop.xlane.xlu1 %2453 }
0x1720   : > { %v2873_v61 = vrot.slane %v2872_v45, 1 }
0x1722   : > { %v2874_v47 = vmax.f32 %v2872_v45, %v2873_v61  ;;  %v3686_v45 = vmov 14  }
0x1724   : > { %v2508_v32 = vpop.permute.xlu2 %2507  ;;  %v2875_v49 = vsub.f32 %v2867_v52, %v2874_v47 }
0x1725   : > { %v2509_v13 = vperm.slane %v2508_v32, 0 }
0x1726   : > { %v2876_v46 = vmul.f32 1.442695, %v2875_v49 }
0x1727   : > { %vm2510_vm9 = vcmp.eq.s32.totalorder %v2509_v13, %v4530_v1  ;;  %v2459_v42 = vpop.xlane.xlu1 %2458 }
0x1728   : > { %v4875_v5 = vsel %vm2510_vm9, 1.0, %v3671_v10  ;;  %v2460_v18 = vadd.f32 %v2459_v42, %v2454_v14  ;;  %3577 = vpow2.f32 %v2876_v46 }
0x1729   : > { %v3450_v12 = vpack.i.bf16 %v4875_v5, %v4858_v0 }
0x172a   : > { %v2464_v56 = vmul.f32 %v2462_v9, %v2460_v18 }
0x172b   : > { %3451 = vperm.xlu0 %3449, %v3450_v12  }
0x172c   : > { %v2466_v19 = vrot.slane %v2464_v56, 4 }
0x172e   : > { %v4879_v24 = vadd.f32 %v2466_v19, %v2389_v58  ;;  %v3578_v33 = vpop.eup %3577 }
0x172f   : > { %v2878_v26 = vsel %vm1893_vm4, %v3578_v33, 0.0 }
0x1730   : > { %v2879_v28 = vrot.slane %v2878_v26, 4 }
0x1732   : > { %v2880_v57 = vadd.f32 %v2879_v28, %v2878_v26 }
0x1733   : > { %2532 = vrot.lane.b32.xlu0 %v2531_v37, %s3663_s25  ;;  %v2891_v37 = vperm.slane %v2890_v17, 0 }
0x1734   : > { %v2881_v15 = vrot.slane %v2880_v57, 2  ;;  %3455 = vset.pattern.permute.xlu0 %v3686_v45 }
0x1735   : > { %vm4892_vm10 = vcmp.eq.s32.totalorder %v2891_v37, 1  ;;  %v2686_v37 = vrot.slane %v4752_v11, 5 }
0x1736   : > { %v2882_v3 = vadd.f32 %v2881_v15, %v2880_v57 }
0x1738   : > { %v2883_v29 = vrot.slane %v2882_v3, 1 }
0x173a   : > { %v2884_v14 = vadd.f32 %v2883_v29, %v2882_v3 }
0x173b   : > { %2540 = vrot.lane.b32.xlu0 %v4631_v6, %s3685_s1  ;;  %s3693_s1 = smov 113  }
0x173c   : > { %3579 = vlog2.f32 %v2884_v14 }
0x1742   : > { %v3580_v56 = vpop.eup %3579 }
0x1743   : > { %v2886_v19 = vmul.f32 0.6931472, %v3580_v56  ;;  %2965 = vperm.xlu0 %3455, %v4471_v23  }
0x1745   : > { %v2887_v53 = vadd.f32 %v2886_v19, %v2874_v47 }
0x1747   : > { %v4899_v38 = vsel %vm4892_vm10, %v2887_v53, %v4833_v8  ;;  %v2942_v8 = vperm.slane %v4752_v11, 7 }
0x1748   : > { %v2934_v36 = vperm.slane %v4899_v38, 0 }
0x174b   : > { %3459 = vset.pattern.permute.xlu0 %v4430_v63 }
0x179d   : > { %v3452_v7 = vpop.permute.xlu0 %3451 }
0x179e   : > { %v3453_v16 = vunpack.i.l.bf16 %v3452_v7  ;;  %v3454_v17 = vunpack.i.h.bf16 %v3452_v7 }
0x17a0   : > { %v2519_v39 = vmul.f32 %v4793_v30, %v3453_v16  ;;  %v2598_v61 = vmul.f32 %v4793_v30, %v3454_v17 }
0x17a2   : > { %v2520_v51 = vsel %vm1893_vm4, %v2519_v39, 0.0  ;;  %v2599_v47 = vsel %vm1893_vm4, %v2598_v61, 0.0 }
0x17a3   : > { %v2521_v31 = vrot.slane %v2520_v51, 4  ;;  %v2600_v49 = vrot.slane %v2599_v47, 4 }
0x17a5   : > { %v2522_v58 = vadd.f32 %v2521_v31, %v2520_v51  ;;  %v2533_v25 = vpop.permute.xlu0 %2532  ;;  %v2601_v46 = vadd.f32 %v2600_v49, %v2599_v47 }
0x17a6   : > { %v2535_v50 = vmul.f32 %v4875_v5, %v2533_v25 }
0x17a7   : > { %v2523_v52 = vrot.slane %v2522_v58, 2  ;;  %v2602_v26 = vrot.slane %v2601_v46, 2 }
0x17a8   : > { %v2536_v32 = vsel %vm1875_vm7, %v2535_v50, 0.0 }
0x17a9   : > { %2537 = vadd.xlane.f32.xlu1 %v2536_v32  ;;  %v2524_v13 = vadd.f32 %v2523_v52, %v2522_v58  ;;  %v2603_v15 = vadd.f32 %v2602_v26, %v2601_v46 }
0x17ab   : > { %v2525_v42 = vrot.slane %v2524_v13, 1  ;;  %v2604_v3 = vrot.slane %v2603_v15, 1 }
0x17ad   : > { %v2526_v9 = vadd.f32 %v2525_v42, %v2524_v13  ;;  %v2541_v33 = vpop.permute.xlu0 %2540  ;;  %v2605_v29 = vadd.f32 %v2604_v3, %v2603_v15 }
0x17af   : > { %v2527_v18 = vmul.f32 %v4875_v5, %v2526_v9 }
0x17b1   : > { %v2528_v12 = vsel %vm1902_vm1, %v2527_v18, 0.0 }
0x17b2   : > { %2529 = vadd.xlane.f32.xlu2 %v2528_v12 }
0x17c2   : > { %2939 = vperm.xlu1 %3457, %v2934_v36  }
0x17ca   : > { %2586 = vperm.xlu2 %3456, %v4778_v20  }
0x17d2   : > { %2616 = vrot.lane.b32.xlu2 %v4631_v6, %s3687_s0  ;;  %s3322_s0 = sshll.u32 %s3840_s6, 3 }
0x17d3   : > { %3458 = vset.pattern.permute.xlu2 %v3678_v44 }
0x17da   : > { %3019 = vrot.lane.b32.xlu2 %v2942_v8, %s3663_s25 }
0x17e2   : > { %2662 = vperm.xlu2 %3458, %v4778_v20  }
0x17ea   : > { %3466 = vset.pattern.permute.xlu2 %v3684_v40  ;;  %v2274_v40 = vsel %vm4583_vm11, %v4761_v41, %v4747_v4  ;;  %vm2611_vm11 = vcmask 29701  }
0x17eb   : > { %v2350_v39 = vsel %vm4594_vm12, %v4804_v55, %v2274_v40 }
0x17ec   : > { %v2429_v31 = vsel %vm4607_vm13, %v4838_v34, %v2350_v39 }
0x181c   : > { %v2538_v6 = vpop.xlane.xlu1 %2537 }
0x1825   : > { %v2530_v28 = vpop.xlane.xlu2 %2529 }
0x1826   : > { %v2539_v44 = vadd.f32 %v2538_v6, %v2530_v28 }
0x1828   : > { %v2543_v57 = vmul.f32 %v2541_v33, %v2539_v44  ;;  %v2966_v33 = vpop.permute.xlu0 %2965 }
0x1829   : > { %v2967_v26 = vperm.slane %v2966_v33, 0 }
0x182a   : > { %v4915_v16 = vadd.f32 %v2543_v57, %v4879_v24  ;;  %v2505_v24 = vsel %vm4634_vm15, %v4858_v0, %v2429_v31 }
0x182b   : > { %v2584_v60 = vsel %vm4674_vm0, %v4875_v5, %v2505_v24  ;;  %vm4956_vm13 = vcmp.eq.s32.totalorder %v2967_v26, 1 }
0x182d   : > { %v2587_v7 = vpop.permute.xlu2 %2586 }
0x182e   : > { %v2588_v51 = vperm.slane %v2587_v7, 0 }
0x1830   : > { %vm2589_vm2 = vcmp.eq.s32.totalorder %v2588_v51, %v4530_v1 }
0x1831   : > { %v3315_v4 = vsel %vm2589_vm2, 1.0, %v3671_v10 }
0x1832   : > { %v4937_v48 = vsel %vm4712_vm14, %v3315_v4, %v2584_v60  ;;  %v2606_v21 = vmul.f32 %v3315_v4, %v2605_v29  ;;  %v2610_v41 = vmul.f32 %v4752_v11, %v3315_v4 }
0x1834   : > { %v2940_v55 = vpop.permute.xlu1 %2939  ;;  %v2607_v62 = vsel %vm1902_vm1, %v2606_v21, 0.0  ;;  %v2612_v34 = vsel %vm2611_vm11, %v2610_v41, 0.0 }
0x1835   : > { %v2941_v0 = vadd.f32 %v4793_v30, %v2940_v55  ;;  %2608 = vadd.xlane.f32.xlu0 %v2607_v62  ;;  %v2617_v58 = vpop.permute.xlu2 %2616  ;;  %2613 = vadd.xlane.f32.xlu1 %v2612_v34 }
0x1837   : > { %v2943_v59 = vadd.f32 %v2942_v8, %v2941_v0 }
0x1839   : > { %v2944_v5 = vsel %vm1893_vm4, %v2943_v59, -inf }
0x183a   : > { %v2945_v25 = vrot.slane %v2944_v5, 4 }
0x183c   : > { %v2946_v50 = vmax.f32 %v2944_v5, %v2945_v25  ;;  %v2841_v5 = vrot.slane %v4752_v11, 6  ;;  %v2996_v25 = vrot.slane %v4752_v11, 7 }
0x183d   : > { %v4943_v54 = vpop.permute.xlu2 %3019 }
0x183e   : > { %v2947_v52 = vrot.slane %v2946_v50, 2 }
0x1840   : > { %v2948_v14 = vmax.f32 %v2946_v50, %v2947_v52 }
0x1842   : > { %v2949_v32 = vrot.slane %v2948_v14, 1 }
0x1844   : > { %v2950_v13 = vmax.f32 %v2948_v14, %v2949_v32 }
0x1845   : > { %v2663_v42 = vpop.permute.xlu2 %2662 }
0x1846   : > { %v2951_v9 = vsub.f32 %v2943_v59, %v2950_v13  ;;  %v2664_v18 = vperm.slane %v2663_v42, 0 }
0x1848   : > { %v2952_v12 = vmul.f32 1.442695, %v2951_v9  ;;  %vm2665_vm12 = vcmp.eq.s32.totalorder %v2664_v18, %v4530_v1 }
0x1849   : > { %v4947_v56 = vsel %vm2665_vm12, 1.0, %v3671_v10 }
0x184a   : > { %3581 = vpow2.f32 %v2952_v12  ;;  %v3460_v19 = vpack.i.bf16 %v4947_v56, %v3315_v4 }
0x184c   : > { %3461 = vperm.xlu0 %3459, %v3460_v19  }
0x184e   : > { %2687 = vrot.lane.b32.xlu1 %v2686_v37, %s3663_s25 }
0x1850   : > { %v3582_v53 = vpop.eup %3581 }
0x1851   : > { %v2954_v36 = vsel %vm1893_vm4, %v3582_v53, 0.0 }
0x1852   : > { %v2955_v8 = vrot.slane %v2954_v36, 4 }
0x1854   : > { %v2956_v17 = vadd.f32 %v2955_v8, %v2954_v36  ;;  %3465 = vset.pattern.permute.xlu0 %v3681_v35 }
0x1855   : > { %2741 = vperm.xlu0 %3465, %v4778_v20  }
0x1856   : > { %v2957_v61 = vrot.slane %v2956_v17, 2 }
0x1858   : > { %v2958_v47 = vadd.f32 %v2957_v61, %v2956_v17 }
0x185a   : > { %v2959_v49 = vrot.slane %v2958_v47, 1 }
0x185c   : > { %v2960_v46 = vadd.f32 %v2959_v49, %v2958_v47 }
0x185d   : > { %3474 = vset.pattern.permute.xlu0 %v4430_v63 }
0x185e   : > { %3583 = vlog2.f32 %v2960_v46 }
0x1864   : > { %v3584_v6 = vpop.eup %3583 }
0x1865   : > { %v2962_v28 = vmul.f32 0.6931472, %v3584_v6 }
0x1867   : > { %v2963_v57 = vadd.f32 %v2962_v28, %v2950_v13 }
0x1869   : > { %v4963_v35 = vsel %vm4956_vm13, %v2963_v57, %v4899_v38 }
0x186a   : > { %v3010_v15 = vperm.slane %v4963_v35, 0 }
0x186c   : > { %3015 = vperm.xlu1 %3457, %v3010_v15   ;;  %v3688_v15 = vmov 15  }
0x1874   : > { %3467 = vset.pattern.permute.xlu1 %v3686_v45 }
0x18a8   : > { %v2609_v3 = vpop.xlane.xlu0 %2608  ;;  %v2614_v40 = vpop.xlane.xlu1 %2613 }
0x18a9   : > { %v2615_v7 = vadd.f32 %v2614_v40, %v2609_v3  ;;  %v5004_v3 = vld [vmem:[%s4447_s28] ss:$0 sm:$0xff]  ;;  %s3691_s28 = smov 114  }
0x18ab   : > { %v2619_v39 = vmul.f32 %v2617_v58, %v2615_v7 }
0x18ad   : > { %v2621_v51 = vrot.slane %v2619_v39, 5 }
0x18af   : > { %v4968_v31 = vadd.f32 %v2621_v51, %v4915_v16 }
0x18be   : > { %v3462_v24 = vpop.permute.xlu0 %3461 }
0x18bf   : > { %v3463_v29 = vunpack.i.l.bf16 %v3462_v24  ;;  %v3464_v50 = vunpack.i.h.bf16 %v3462_v24 }
0x18c0   : > { %v2688_v60 = vpop.permute.xlu1 %2687 }
0x18c1   : > { %v2674_v4 = vmul.f32 %v4793_v30, %v3463_v29  ;;  %v2690_v38 = vmul.f32 %v4947_v56, %v2688_v60  ;;  %v2753_v52 = vmul.f32 %v4793_v30, %v3464_v50 }
0x18c3   : > { %v2675_v21 = vsel %vm1893_vm4, %v2674_v4, 0.0  ;;  %v2691_v41 = vsel %vm1875_vm7, %v2690_v38, 0.0  ;;  %v2754_v14 = vsel %vm1893_vm4, %v2753_v52, 0.0 }
0x18c4   : > { %v2676_v45 = vrot.slane %v2675_v21, 4  ;;  %2692 = vadd.xlane.f32.xlu1 %v2691_v41  ;;  %v2755_v32 = vrot.slane %v2754_v14, 4 }
0x18c6   : > { %v2677_v55 = vadd.f32 %v2676_v45, %v2675_v21  ;;  %v2756_v13 = vadd.f32 %v2755_v32, %v2754_v14 }
0x18c7   : > { %v2742_v18 = vpop.permute.xlu0 %2741 }
0x18c8   : > { %v2678_v62 = vrot.slane %v2677_v55, 2  ;;  %v2757_v42 = vrot.slane %v2756_v13, 2  ;;  %v2743_v12 = vperm.slane %v2742_v18, 0 }
0x18ca   : > { %v2679_v34 = vadd.f32 %v2678_v62, %v2677_v55  ;;  %v2758_v9 = vadd.f32 %v2757_v42, %v2756_v13  ;;  %vm2744_vm15 = vcmp.eq.s32.totalorder %v2743_v12, %v4530_v1 }
0x18cb   : > { %v4988_v53 = vsel %vm2744_vm15, 1.0, %v3671_v10 }
0x18cc   : > { %v2680_v0 = vrot.slane %v2679_v34, 1  ;;  %v2759_v19 = vrot.slane %v2758_v9, 1  ;;  %v2765_v60 = vmul.f32 %v4752_v11, %v4988_v53 }
0x18ce   : > { %v2681_v58 = vadd.f32 %v2680_v0, %v2679_v34  ;;  %v2760_v37 = vadd.f32 %v2759_v19, %v2758_v9 }
0x18d0   : > { %v2682_v16 = vmul.f32 %v4947_v56, %v2681_v58  ;;  %v2761_v36 = vmul.f32 %v4988_v53, %v2760_v37 }
0x18d2   : > { %v2683_v59 = vsel %vm1902_vm1, %v2682_v16, 0.0  ;;  %v2762_v8 = vsel %vm1902_vm1, %v2761_v36, 0.0 }
0x18d3   : > { %2684 = vadd.xlane.f32.xlu2 %v2683_v59 }
0x18dd   : > { %2896 = vperm.xlu1 %3467, %v4778_v20  }
0x18e5   : > { %2842 = vrot.lane.b32.xlu1 %v2841_v5, %s3663_s25 }
0x18e6   : > { %3476 = vset.pattern.permute.xlu1 %v3664_v22 }
0x18eb   : > { %2817 = vperm.xlu2 %3466, %v4778_v20  }
0x18ed   : > { %2997 = vrot.lane.b32.xlu1 %v2996_v25, %s3663_s25  ;;  %s3689_s25 = smov 117  }
0x18f3   : > { %3468 = vset.pattern.permute.xlu2 %v4430_v63  ;;  %v3016_v63 = vpop.permute.xlu1 %3015 }
0x18f4   : > { %v3017_v40 = vadd.f32 %v4793_v30, %v3016_v63 }
0x18f6   : > { %v3022_v7 = vadd.f32 %v4943_v54, %v3017_v40 }
0x18f8   : > { %v3023_v39 = vsel %vm1893_vm4, %v3022_v7, -inf }
0x18f9   : > { %v3024_v51 = vrot.slane %v3023_v39, 4 }
0x18fb   : > { %v3025_v24 = vmax.f32 %v3023_v39, %v3024_v51 }
0x18fd   : > { %v3026_v29 = vrot.slane %v3025_v24, 2 }
0x1917   : > { %2763 = vadd.xlane.f32.xlu1 %v2762_v8 }
0x1937   : > { %v2693_v17 = vpop.xlane.xlu1 %2692 }
0x1946   : > { %v2685_v61 = vpop.xlane.xlu2 %2684 }
0x1947   : > { %v2694_v47 = vadd.f32 %v2693_v17, %v2685_v61 }
0x194e   : > { %v2818_v49 = vpop.permute.xlu2 %2817 }
0x194f   : > { %v2819_v46 = vperm.slane %v2818_v49, 0  ;;  %v2897_v33 = vpop.permute.xlu1 %2896 }
0x1950   : > { %v2898_v26 = vperm.slane %v2897_v33, 0 }
0x1951   : > { %vm2820_vm0 = vcmp.eq.s32.totalorder %v2819_v46, %v4530_v1 }
0x1952   : > { %v4994_v6 = vsel %vm2820_vm0, 1.0, %v3671_v10  ;;  %vm2899_vm14 = vcmp.eq.s32.totalorder %v2898_v26, %v4530_v1 }
0x1953   : > { %v4998_v28 = vsel %vm2899_vm14, 1.0, %v3671_v10  ;;  %v3469_v57 = vpack.i.bf16 %v4994_v6, %v4988_v53 }
0x1954   : > { %2982 = vperm.xlu0 %3474, %v4998_v28   ;;  %v2920_v39 = vmul.f32 %v4752_v11, %v4998_v28  ;;  %v2739_v11 = vsel %vm4766_vm8, %v4947_v56, %v4937_v48 }
0x1955   : > { %3470 = vperm.xlu2 %3468, %v3469_v57  }
0x1957   : > { %v2843_v4 = vpop.permute.xlu1 %2842 }
0x195c   : > { %3475 = vset.pattern.permute.xlu0 %v3688_v15 }
0x195d   : > { %2695 = vrot.lane.b32.xlu2 %v5004_v3, %s3689_s25  ;;  %3044 = vperm.xlu0 %3475, %v4471_v23   ;;  %v3027_v23 = vmax.f32 %v3025_v24, %v3026_v29  ;;  %v2922_v24 = vsel %vm2921_vm6, %v2920_v39, 0.0 }
0x195f   : > { %v3028_v38 = vrot.slane %v3027_v23, 1 }
0x1961   : > { %v3029_v21 = vmax.f32 %v3027_v23, %v3028_v38 }
0x1963   : > { %v3030_v54 = vsub.f32 %v3022_v7, %v3029_v21 }
0x1965   : > { %2972 = vperm.xlu0 %3475, %v4778_v20   ;;  %2771 = vrot.lane.b32.xlu2 %v5004_v3, %s3690_s24  ;;  %v2767_v20 = vsel %vm2766_vm3, %v2765_v60, 0.0  ;;  %v3031_v45 = vmul.f32 1.442695, %v3030_v54  ;;  %v2815_v54 = vsel %vm4826_vm5, %v4988_v53, %v2739_v11 }
0x1967   : > { %3585 = vpow2.f32 %v3031_v45  ;;  %v2894_v45 = vsel %vm4892_vm10, %v4994_v6, %v2815_v54 }
0x1968   : > { %v2970_v2 = vsel %vm4956_vm13, %v4998_v28, %v2894_v45 }
0x196d   : > { %3477 = vset.pattern.permute.xlu0 %v3664_v22  ;;  %v2845_v22 = vmul.f32 %v4994_v6, %v2843_v4  ;;  %v3586_v55 = vpop.eup %3585  ;;  %v1862_v4 = vld [vmem:[%s5118_s21] sm:$0x1] }
0x196e   : > { %v3033_v62 = vsel %vm1893_vm4, %v3586_v55, 0.0 }
0x196f   : > { %v2846_v41 = vsel %vm1875_vm7, %v2845_v22, 0.0  ;;  %v3034_v34 = vrot.slane %v3033_v62, 4 }
0x1971   : > { %v3035_v58 = vadd.f32 %v3034_v34, %v3033_v62 }
0x1973   : > { %v3036_v50 = vrot.slane %v3035_v58, 2 }
0x1975   : > { %v3037_v19 = vadd.f32 %v3036_v50, %v3035_v58 }
0x1977   : > { %v3038_v61 = vrot.slane %v3037_v19, 1 }
0x1979   : > { %v3039_v57 = vadd.f32 %v3038_v61, %v3037_v19 }
0x197b   : > { %3587 = vlog2.f32 %v3039_v57 }
0x1981   : > { %v3588_v51 = vpop.eup %3587 }
0x1982   : > { %v3041_v29 = vmul.f32 0.6931472, %v3588_v51 }
0x198f   : > { %2768 = vadd.xlane.f32.xlu0 %v2767_v20  ;;  %v3042_v20 = vadd.f32 %v3041_v29, %v3029_v21 }
0x1997   : > { %2847 = vadd.xlane.f32.xlu0 %v2846_v41 }
0x19ab   : > { %2926 = vrot.lane.b32.xlu0 %v5004_v3, %s3691_s28  ;;  %s5192_s28 = sld [smem:[#allocation21_spill]] }
0x19af   : > { %v3471_v0 = vpop.permute.xlu2 %3470 }
0x19b0   : > { %v3473_v16 = vunpack.i.h.bf16 %v3471_v0  ;;  %v3472_v59 = vunpack.i.l.bf16 %v3471_v0 }
0x19b1   : > { %s5193_s4 = smov %s5192_s28  ;;  %s3089_s5 = scalar_lea.hbm %s5192_s28, %s3322_s0 }
0x19b2   : > { %v2908_v5 = vmul.f32 %v4793_v30, %v3473_v16  ;;  %v2829_v25 = vmul.f32 %v4793_v30, %v3472_v59 }
0x19b4   : > { %v2909_v52 = vsel %vm1893_vm4, %v2908_v5, 0.0  ;;  %v2830_v14 = vsel %vm1893_vm4, %v2829_v25, 0.0 }
0x19b5   : > { %v2910_v32 = vrot.slane %v2909_v52, 4  ;;  %v2831_v13 = vrot.slane %v2830_v14, 4 }
0x19b7   : > { %v2911_v42 = vadd.f32 %v2910_v32, %v2909_v52  ;;  %v2832_v9 = vadd.f32 %v2831_v13, %v2830_v14  ;;  %v2696_v18 = vpop.permute.xlu2 %2695 }
0x19b8   : > { %v2698_v12 = vmul.f32 %v2696_v18, %v2694_v47 }
0x19b9   : > { %v2833_v37 = vrot.slane %v2832_v9, 2  ;;  %v2912_v36 = vrot.slane %v2911_v42, 2 }
0x19ba   : > { %v2699_v8 = vadd.f32 %v2698_v12, %v4968_v31 }
0x19bb   : > { %v2834_v63 = vadd.f32 %v2833_v37, %v2832_v9  ;;  %v2913_v17 = vadd.f32 %v2912_v36, %v2911_v42 }
0x19bd   : > { %v2835_v49 = vrot.slane %v2834_v63, 1  ;;  %v2914_v46 = vrot.slane %v2913_v17, 1 }
0x19bf   : > { %v2836_v33 = vadd.f32 %v2835_v49, %v2834_v63  ;;  %v2915_v26 = vadd.f32 %v2914_v46, %v2913_v17  ;;  %v2772_v0 = vpop.permute.xlu2 %2771 }
0x19c1   : > { %v2837_v15 = vmul.f32 %v4994_v6, %v2836_v33  ;;  %v2916_v40 = vmul.f32 %v4998_v28, %v2915_v26  ;;  %v2998_v6 = vpop.permute.xlu1 %2997 }
0x19c3   : > { %v2838_v7 = vsel %vm1902_vm1, %v2837_v15, 0.0  ;;  %v2917_v47 = vsel %vm1902_vm1, %v2916_v40, 0.0 }
0x19c4   : > { %2839 = vadd.xlane.f32.xlu1 %v2838_v7  ;;  %2918 = vadd.xlane.f32.xlu2 %v2917_v47 }
0x19c6   : > { %v2983_v31 = vpop.permute.xlu0 %2982 }
0x19c7   : > { %v2984_v43 = vmul.f32 %v4793_v30, %v2983_v31 }
0x19c9   : > { %v2985_v27 = vsel %vm1893_vm4, %v2984_v43, 0.0  ;;  %v2764_v34 = vpop.xlane.xlu1 %2763 }
0x19ca   : > { %v2986_v53 = vrot.slane %v2985_v27, 4 }
0x19cc   : > { %2923 = vadd.xlane.f32.xlu1 %v2922_v24 }
0x19cf   : > { %v3045_v60 = vpop.permute.xlu0 %3044 }
0x19d0   : > { %v3046_v23 = vperm.slane %v3045_v60, 0 }
0x19d2   : > { %vm3047_vm9 = vcmp.eq.s32.totalorder %v3046_v23, 1 }
0x19d3   : > { %v3048_v38 = vsel %vm3047_vm9, %v3042_v20, %v4963_v35 }
0x19d4   : > { %v3055_v22 = vadd.f32 %v3048_v38, %v1862_v4 }
0x19d6   : > { %v3056_v41 = vsel %vm1875_vm7, %v3055_v22, -inf }
0x19d7   : > { %v2973_v21 = vpop.permute.xlu0 %2972  ;;  %3057 = vmax.xlane.f32.xlu2 %v3056_v41 }
0x19d8   : > { %v2974_v55 = vperm.slane %v2973_v21, 0 }
0x19da   : > { %vm2975_vm2 = vcmp.eq.s32.totalorder %v2974_v55, %v4530_v1  ;;  %v2987_v1 = vadd.f32 %v2986_v53, %v2985_v27 }
0x19db   : > { %v3320_v35 = vsel %vm2975_vm2, 1.0, %v3671_v10 }
0x19dc   : > { %v3049_v48 = vsel %vm3047_vm9, %v3320_v35, %v2970_v2  ;;  %v2988_v10 = vrot.slane %v2987_v1, 2  ;;  %v3000_v33 = vmul.f32 %v3320_v35, %v2998_v6 }
0x19dd   : > { %v3050_v56 = vmul.f32 %v3049_v48, %v1862_v4 }
0x19de   : > { %v2989_v62 = vadd.f32 %v2988_v10, %v2987_v1  ;;  %v3001_v57 = vsel %vm1875_vm7, %v3000_v33, 0.0 }
0x19e0   : > { %v2990_v58 = vrot.slane %v2989_v62, 1 }
0x19e2   : > { %v2991_v5 = vadd.f32 %v2990_v58, %v2989_v62 }
0x19e4   : > { %v2992_v30 = vmul.f32 %v3320_v35, %v2991_v5 }
0x19e5   : > { %2850 = vrot.lane.b32.xlu1 %v5004_v3, %s3692_s23  ;;  %s3091_s23 = sshll.u32 %s4464_s30, 4  ;;  %s3617_s30 = scalar_lea.hbm %s5193_s4, 16  ;;  %s3092_s23 = int_to_ptr.vmem [resolvable:$true] %s3091_s23 }
0x19e6   : > { %v2993_v50 = vsel %vm1902_vm1, %v2992_v30, 0.0 }
0x19ef   : > { %3005 = vrot.lane.b32.xlu2 %v5004_v3, %s3693_s1  ;;  %v3051_v3 = vsel %vm1875_vm7, %v3050_v56, 0.0  ;;  %s3093_s1 = sshll.u32 %s3089_s5, 4  ;;  %s3094_s1 = int_to_ptr.hbm [resolvable:$true] %s3093_s1 }
0x19f0   : > { %s3611_s7 = sshra.s32 %s3094_s1, 4  ;;  %s3612_s7 = int_to_ptr.hbm [resolvable:$true] %s3611_s7 }
0x19f1   : > { %s3613_s9 = scalar_lea.hbm %s3612_s7, 8  ;;  %p3618_p0 = scmp.lt.s32.totalorder %s3612_s7, %s5193_s4 }
0x19f2   : > { %p3614_p11 = scmp.ne.s32.totalorder %s3612_s7, %s3613_s9  ;;  %p3619_p1 = scmp.lt.s32.totalorder %s3617_s30, %s3613_s9 }
0x19f4   : > { %p3615_p12 = pnand %p3614_p11, %p3857_p5  ;;  %p3620_p2 = por %p3619_p1, %p3618_p0 }
0x19f6   : > { %p3616_p13 = pneg %p3615_p12 }
0x19f8   : > { %p3621_p3 = pnand %p3620_p2, %p3616_p13 }
0x1a02   : > { %v2769_v44 = vpop.xlane.xlu0 %2768 }
0x1a03   : > { %v2770_v28 = vadd.f32 %v2769_v44, %v2764_v34 }
0x1a05   : > { %v2774_v16 = vmul.f32 %v2772_v0, %v2770_v28 }
0x1a07   : > { %v2776_v59 = vrot.slane %v2774_v16, 6 }
0x1a09   : > { %v2778_v25 = vadd.f32 %v2776_v59, %v2699_v8 }
0x1a0a   : > { %v2848_v13 = vpop.xlane.xlu0 %2847 }
0x1a0f   : > { %2994 = vadd.xlane.f32.xlu1 %v2993_v50 }
0x1a18   : > { %3052 = vadd.xlane.f32.xlu2 %v3051_v3 }
0x1a1d   : > { %v2927_v19 = vpop.permute.xlu0 %2926 }
0x1a37   : > { %v2919_v52 = vpop.xlane.xlu2 %2918  ;;  %v2840_v14 = vpop.xlane.xlu1 %2839 }
0x1a38   : > { %v2849_v36 = vadd.f32 %v2848_v13, %v2840_v14 }
0x1a3f   : > { %v2924_v18 = vpop.xlane.xlu1 %2923 }
0x1a40   : > { %v2925_v12 = vadd.f32 %v2924_v18, %v2919_v52 }
0x1a42   : > { %v2929_v8 = vmul.f32 %v2927_v19, %v2925_v12 }
0x1a44   : > { %v2931_v49 = vrot.slane %v2929_v8, 7 }
0x1a4a   : > { %v3058_v32 = vpop.xlane.xlu2 %3057 }
0x1a4b   : > { %v3059_v42 = vsub.f32 %v3055_v22, %v3058_v32 }
0x1a4d   : > { %v3060_v9 = vmul.f32 1.442695, %v3059_v42 }
0x1a4f   : > { %3589 = vpow2.f32 %v3060_v9 }
0x1a52   : > { %v3006_v40 = vpop.permute.xlu2 %3005 }
0x1a55   : > { %v3590_v37 = vpop.eup %3589 }
0x1a56   : > { %v3062_v63 = vsel %vm1875_vm7, %v3590_v37, 0.0 }
0x1a57   : > { %3063 = vadd.xlane.f32.xlu0 %v3062_v63  ;;  %v2851_v17 = vpop.permute.xlu1 %2850 }
0x1a58   : > { %v2853_v61 = vmul.f32 %v2851_v17, %v2849_v36 }
0x1a5a   : > { %v2854_v46 = vadd.f32 %v2853_v61, %v2778_v25 }
0x1a5c   : > { %v2933_v26 = vadd.f32 %v2931_v49, %v2854_v46 }
0x1a5f   : > { %3002 = vadd.xlane.f32.xlu0 %v3001_v57 }
0x1a82   : > { %v2995_v47 = vpop.xlane.xlu1 %2994 }
0x1aca   : > { %v3064_v15 = vpop.xlane.xlu0 %3063 }
0x1acb   : > { %3591 = vlog2.f32 %v3064_v15 }
0x1ad1   : > { %v3592_v7 = vpop.eup %3591 }
0x1ad2   : > { %v3003_v31 = vpop.xlane.xlu0 %3002 }
0x1ad3   : > { %v3004_v39 = vadd.f32 %v3003_v31, %v2995_v47 }
0x1ad4   : > { %3624 = shalt.err (!%p3621_p3)
}
0x1ad5   : > { %3325 = dma.vmem_to_hbm [thread:$0]  (%p3857_p5), %s3092_s23, 128, %s3094_s1, %s3076_s2   ;;  %v3066_v51 = vmul.f32 0.6931472, %v3592_v7  ;;  %v3008_v24 = vmul.f32 %v3006_v40, %v3004_v39  ;;  %v3053_v60 = vpop.xlane.xlu2 %3052 }
0x1ad6   : > { %s5194_s5 = sld [smem:[#allocation22_spill]] }
0x1ad7   : > { %v3009_v29 = vadd.f32 %v3008_v24, %v2933_v26  ;;  %v3067_v23 = vadd.f32 %v3066_v51, %v3058_v32 }
0x1ad9   : > { %v3054_v20 = vadd.f32 %v3053_v60, %v3009_v29 }
0x1adb   : > { %v3068_v4 = vsub.f32 %v3054_v20, %v3067_v23 }
0x1adc   : > { %s783_s7 = scalar_lea.vmem %s5194_s5, %s3869_s8 }
0x1add   : > { %3071 = vperm.xlu1 %3476, %v3068_v4  }
0x1b4f   : > { %v3072_v38 = vpop.permute.xlu1 %3071 }
0x1b50   : > { %3074 = vst [vmem:[%s783_s7] sm:$0x1] %v3072_v38 }
0x1b51 PF: > { %s5195_s9 = sld [smem:[#allocation7_spill]] }
0x1b52   : > { %s5196_s6 = sld [smem:[#allocation5_spill]] }
0x1b57   : > { %p3331_p4 = scmp.ge.s32.totalorder %s5195_s9, 2 }
0x1b58   : > { %s3108_s2 = sand.u32 1, %s5196_s6  }
0x1b59   : > { %p3328_p5 = pnand %p3331_p4, %p3861_p6  ;;  %s3109_s23 = scalar_lea.sflag [#allocation3], %s3108_s2 }
0x1b5b   : > { %p3329_p7 = pneg %p3328_p5 }
0x1b5d   : > { %3642 = dma.done.wait (%p3329_p7), %s3109_s23, 128  }
0x1b5e   : > { %3644 = vsyncadd (%p3329_p7), %s3109_s23, 4294967168  ;;  %s5198_s28 = sld [smem:[#allocation8_spill]]  ;;  %s5201_s5 = smov %s3651_s26 }
0x1b5f   : > { %s5199_s1 = sld [smem:[#allocation6_spill]] }
0x1b60   : > { %s5200_s27 = sld [smem:[#allocation9_spill]] }
0x1b64   : > { %p35_p8 = scmp.ge.s32.totalorder %s5198_s28, 4  }
0x1b65   : > { %s5202_s26 = smov %s5199_s1 }
0x1b66   :  { %37 = sbr.rel (!%p35_p8) target bundleno = 16 (0x10), region = 180 }
0x1b6b   :  { %3121 = vsyncpa [#allocation3], 1 }
0x1b6c   :  { %3123 = vsyncpa [#allocation3 + $0x1], 1 }

</bundles_post_ra>
